<compile_context>
chip_gen: v5e
topology: v5e:2x2
jax: 0.10.0
libtpu: 0.0.40
codegen_flags: <defaults>
</compile_context>

<pallas_src>
import numpy as np
import jax
import jax.numpy as jnp
from jax.experimental import pallas as pl
from jax.experimental.pallas import tpu as pltpu

LN_EPS = 1e-5


def _layernorm(y, gamma, beta):
    # mean and mean-of-squares are issued without a data dependency so both
    # cross-lane reductions can overlap on the XLU.
    mu = jnp.mean(y, axis=-1, keepdims=True)
    msq = jnp.mean(y * y, axis=-1, keepdims=True)
    var = jnp.maximum(msq - mu * mu, 0.0)
    return (y - mu) * jax.lax.rsqrt(var + LN_EPS) * gamma + beta


# ----------------------------------------------------------------------------
# Fused kernel
# ----------------------------------------------------------------------------
def _make_pgn_kernel(n_layers: int, bb: int, C: int):
    """Fused PGN forward for one grid step (bb batch elements).

    Ref order:
      refs[0]                     x       (bb*C, F0)     f32
      refs[1]                     adj_bd  (bb*C, bb*C)   bf16 block-diagonal
      refs[2 : 2+3*n_layers]      per layer: (w_enc bf16 (f,f),
                                              vecs  f32  (4,f) = [b_enc;gamma;beta;b_gcn],
                                              w_gcn bf16 (f,f))
      next 2                      head: (w_post bf16 (f_out,f_out),
                                         head_vecs f32 (3,f_out) = [b;gamma;beta])
      refs[-1]                    o_ref   (bb, f_out)    f32
    """
    n_layer_refs = 3 * n_layers

    def kernel(*refs):
        x_ref, adj_ref = refs[0], refs[1]
        layer_refs = refs[2:2 + n_layer_refs]
        wp_ref = refs[2 + n_layer_refs]
        hv_ref = refs[3 + n_layer_refs]
        o_ref = refs[4 + n_layer_refs]

        adj = adj_ref[...]                      # (bb*C, bb*C) bf16 block-diag
        h = x_ref[...]                          # layer-0 input (bb*C, F0) f32
        agg = None

        # All PolylineLayers unrolled; activations never leave VMEM/vregs.
        for l in range(n_layers):
            we_ref, vec_ref, wg_ref = layer_refs[3 * l: 3 * l + 3]
            vec = vec_ref[...]                  # (4, f) f32, one DMA
            b_enc, gamma, beta, b_gcn = vec[0:1], vec[1:2], vec[2:3], vec[3:4]

            # feature encoding: bf16 operands on the MXU, f32 accumulation.
            if l == 0:
                y = jnp.dot(h.astype(jnp.bfloat16), we_ref[...],
                            preferred_element_type=jnp.float32)
            else:
                # concat([h, agg]) @ We  ==  h @ We_top + agg @ We_bot
                half = we_ref.shape[0] // 2
                y = (jnp.dot(h.astype(jnp.bfloat16), we_ref[0:half, :],
                             preferred_element_type=jnp.float32)
                     + jnp.dot(agg.astype(jnp.bfloat16), we_ref[half:, :],
                               preferred_element_type=jnp.float32))
            y = _layernorm(y + b_enc, gamma, beta)

            # GCN: h = relu(linear(y)); agg = adj @ h  (block-diag adjacency ==
            # per-batch adjacency, one well-shaped MXU dot for all bb elems).
            h = jnp.dot(y.astype(jnp.bfloat16), wg_ref[...],
                        preferred_element_type=jnp.float32) + b_gcn
            h = jnp.maximum(h, 0.0)
            agg = jnp.dot(adj, h.astype(jnp.bfloat16),
                          preferred_element_type=jnp.float32)

        f_last = h.shape[-1]
        # max over the C polyline points commutes with the (virtual) concat.
        m_h = jnp.max(h.reshape(bb, C, f_last), axis=1)        # (bb, f_last)
        m_agg = jnp.max(agg.reshape(bb, C, f_last), axis=1)    # (bb, f_last)

        hv = hv_ref[...]                        # (3, f_out) f32
        b_post, g_post, bt_post = hv[0:1], hv[1:2], hv[2:3]
        y = (jnp.dot(m_h.astype(jnp.bfloat16), wp_ref[0:f_last, :],
                     preferred_element_type=jnp.float32)
             + jnp.dot(m_agg.astype(jnp.bfloat16), wp_ref[f_last:2 * f_last, :],
                       preferred_element_type=jnp.float32)
             + b_post)
        # lane-dense final store (f_out == 128 in the example config).
        o_ref[...] = _layernorm(y, g_post, bt_post)

    return kernel


# ----------------------------------------------------------------------------
# Grid selection (generation-aware)
# ----------------------------------------------------------------------------
def _num_tensorcores() -> int:
    try:
        kind = jax.devices()[0].device_kind.lower()
    except Exception:
        return 1
    # v7x has 2 TensorCores per chip (v4/v5p megacore also benefits from >= 2
    # parallel grid steps).  v5e / v6e are single-TC -> prefer one big step.
    return 2 if any(tag in kind for tag in ("v7", "v4", "v5p")) else 1


def _choose_block_batch(B: int, C: int, n_tc: int, row_target: int = 256) -> int:
    """Largest divisor of B with bb*C <= row_target.  Single-TC: one big step
    (fills the 256-row MXU, amortizes per-step overhead).  Multi-TC: keep the
    grid a multiple of the core count so cores split the batch."""
    divs = [d for d in range(1, B + 1) if B % d == 0 and d * C <= row_target]
    if not divs:
        return 1
    if n_tc <= 1:
        return max(divs)
    multi = [d for d in divs if (B // d) % n_tc == 0]
    return max(multi) if multi else max(divs)


# ----------------------------------------------------------------------------
# Adjacency (fixed, non-trainable function of cluster_size)
# ----------------------------------------------------------------------------
def make_adj(cluster_size: int) -> np.ndarray:
    raw = np.array([[1 if i >= j else 0 for i in range(cluster_size)]
                    for j in range(cluster_size)], dtype=np.float64)
    adj = np.linalg.inv(np.diag(raw.sum(axis=1))) @ raw
    return adj.astype(np.float32)


# ----------------------------------------------------------------------------
# Wrapper: the whole forward is ONE jitted dispatch wrapping ONE pallas_call.
# ----------------------------------------------------------------------------
@jax.jit
def pgn_forward(x, params):
    B, C, F0 = x.shape
    layers = params["layers"]
    w_post, head_vecs = params["head"]
    n_layers = len(layers)
    f_out = w_post.shape[0]            # taken from the params, not re-derived

    bb = _choose_block_batch(B, C, _num_tensorcores())
    assert B % bb == 0
    grid = (B // bb,)

    # (B, C, F0) -> (B*C, F0): row-major reshape, free under jit.
    x2d = x.reshape(B * C, F0)

    # Block-diagonal adjacency for the bb batch elements of one grid step.
    # adj is a fixed (non-trainable) function of C, so this is a host-side
    # numpy constant folded at trace time -> zero per-call cost.
    adj_bd = jnp.asarray(np.kron(np.eye(bb, dtype=np.float32), make_adj(C)),
                         dtype=jnp.bfloat16)

    flat_params = []
    in_specs = [
        pl.BlockSpec((bb * C, F0), lambda b: (b, 0)),
        pl.BlockSpec((bb * C, bb * C), lambda b: (0, 0)),
    ]
    for layer in layers:                          # (w_enc, vecs, w_gcn)
        for p in layer:
            flat_params.append(p)
            in_specs.append(pl.BlockSpec(p.shape, lambda b: (0, 0)))
    for p in (w_post, head_vecs):
        flat_params.append(p)
        in_specs.append(pl.BlockSpec(p.shape, lambda b: (0, 0)))

    return pl.pallas_call(
        _make_pgn_kernel(n_layers, bb, C),
        out_shape=jax.ShapeDtypeStruct((B, f_out), jnp.float32),
        grid_spec=pltpu.PrefetchScalarGridSpec(
            num_scalar_prefetch=0,
            grid=grid,
            in_specs=in_specs,
            out_specs=pl.BlockSpec((bb, f_out), lambda b: (b, 0)),
        ),
        compiler_params=pltpu.CompilerParams(
            dimension_semantics=("parallel",),
            vmem_limit_bytes=32 * 1024 * 1024,
        ),
    )(x2d, adj_bd, *flat_params)


# ----------------------------------------------------------------------------
# Parameter construction (deterministic, synthetic)
# ----------------------------------------------------------------------------
def init_pgn_params(key, cluster_size: int, in_features: int, n_layers: int):
    out_features_list = [in_features * 2 ** i for i in range(n_layers)]

    layers = []
    for f in out_features_list:
        key, k1, k2, k3, k4 = jax.random.split(key, 5)
        w_enc = (jax.random.normal(k1, (f, f), jnp.float32) * 0.05).astype(jnp.bfloat16)
        w_gcn = (jax.random.normal(k3, (f, f), jnp.float32) * 0.05).astype(jnp.bfloat16)
        b_enc = jax.random.normal(k2, (1, f), jnp.float32) * 0.05
        b_gcn = jax.random.normal(k4, (1, f), jnp.float32) * 0.05
        gamma = jnp.ones((1, f), jnp.float32)
        beta = jnp.zeros((1, f), jnp.float32)
        # pack the four (1, f) vectors into one (4, f) tile -> one DMA / layer
        vecs = jnp.concatenate([b_enc, gamma, beta, b_gcn], axis=0)
        layers.append((w_enc, vecs, w_gcn))

    f_out = 2 * out_features_list[-1]
    key, k1, k2 = jax.random.split(key, 3)
    w_post = (jax.random.normal(k1, (f_out, f_out), jnp.float32) * 0.05).astype(jnp.bfloat16)
    b_post = jax.random.normal(k2, (1, f_out), jnp.float32) * 0.05
    g_post = jnp.ones((1, f_out), jnp.float32)
    bt_post = jnp.zeros((1, f_out), jnp.float32)
    head_vecs = jnp.concatenate([b_post, g_post, bt_post], axis=0)   # (3, f_out)

    return {"layers": layers,
            "head": (w_post, head_vecs),
            "adj": jnp.asarray(make_adj(cluster_size))}


# ----------------------------------------------------------------------------
# Pure-JAX reference (mirrors the PyTorch forward semantics, same bf16 casts)
# ----------------------------------------------------------------------------
def pgn_forward_ref(x, params):
    adj16 = params["adj"].astype(jnp.bfloat16)
    for (w_enc, vecs, w_gcn) in params["layers"]:
        b_enc, gamma, beta, b_gcn = vecs[0:1], vecs[1:2], vecs[2:3], vecs[3:4]
        y = jnp.dot(x.astype(jnp.bfloat16), w_enc,
                    preferred_element_type=jnp.float32) + b_enc
        y = _layernorm(y, gamma, beta)
        h = jnp.dot(y.astype(jnp.bfloat16), w_gcn,
                    preferred_element_type=jnp.float32) + b_gcn
        h = jnp.maximum(h, 0.0)
        agg = jnp.einsum("jk,bkf->bjf", adj16, h.astype(jnp.bfloat16),
                         preferred_element_type=jnp.float32)
        x = jnp.concatenate([h, agg], axis=-1)
    x = jnp.max(x, axis=-2)
    w_post, hv = params["head"]
    b_post, g_post, bt_post = hv[0:1], hv[1:2], hv[2:3]
    y = jnp.dot(x.astype(jnp.bfloat16), w_post,
                preferred_element_type=jnp.float32) + b_post
    return _layernorm(y, g_post, bt_post)


# ----------------------------------------------------------------------------
if __name__ == "__main__":
    batch = 32
    cluster_size = 8
    in_features = 32
    n_layers = 2

    key = jax.random.PRNGKey(0)
    key, kx = jax.random.split(key)
    x = jax.random.normal(kx, (batch, cluster_size, in_features), jnp.float32)

    params = init_pgn_params(key, cluster_size, in_features, n_layers)

    out = jax.block_until_ready(pgn_forward(x, params))
    ref = pgn_forward_ref(x, params)

    assert out.shape == (batch, in_features * 2 ** n_layers), out.shape
    np.testing.assert_allclose(np.asarray(out), np.asarray(ref),
                               rtol=1e-2, atol=1e-2)

    print("KERNEL_OK")
</pallas_src>

<mosaic_0001>
module attributes {stable_mosaic.version = 11 : i64} {
  func.func @kernel(%arg0: i32, %arg1: memref<256x32xf32, #tpu.memory_space<vmem>>, %arg2: memref<256x256xbf16, #tpu.memory_space<vmem>>, %arg3: memref<32x32xbf16, #tpu.memory_space<vmem>>, %arg4: memref<4x32xf32, #tpu.memory_space<vmem>>, %arg5: memref<32x32xbf16, #tpu.memory_space<vmem>>, %arg6: memref<64x64xbf16, #tpu.memory_space<vmem>>, %arg7: memref<4x64xf32, #tpu.memory_space<vmem>>, %arg8: memref<64x64xbf16, #tpu.memory_space<vmem>>, %arg9: memref<128x128xbf16, #tpu.memory_space<vmem>>, %arg10: memref<3x128xf32, #tpu.memory_space<vmem>>, %arg11: memref<32x128xf32, #tpu.memory_space<vmem>>) attributes {dimension_semantics = [#tpu.dimension_semantics<parallel>], iteration_bounds = array<i64: 1>, scalar_prefetch = 0 : i64, scratch_operands = 0 : i64, tpu.core_type = #tpu.core_type<tc>, window_params = [{transform_indices = @transform_0, window_bounds = array<i64: 256, 32>}, {pipeline_mode = #tpu.pipeline_mode<synchronous>, transform_indices = @transform_1, window_bounds = array<i64: 256, 256>}, {pipeline_mode = #tpu.pipeline_mode<synchronous>, transform_indices = @transform_2, window_bounds = array<i64: 32, 32>}, {pipeline_mode = #tpu.pipeline_mode<synchronous>, transform_indices = @transform_3, window_bounds = array<i64: 4, 32>}, {pipeline_mode = #tpu.pipeline_mode<synchronous>, transform_indices = @transform_4, window_bounds = array<i64: 32, 32>}, {pipeline_mode = #tpu.pipeline_mode<synchronous>, transform_indices = @transform_5, window_bounds = array<i64: 64, 64>}, {pipeline_mode = #tpu.pipeline_mode<synchronous>, transform_indices = @transform_6, window_bounds = array<i64: 4, 64>}, {pipeline_mode = #tpu.pipeline_mode<synchronous>, transform_indices = @transform_7, window_bounds = array<i64: 64, 64>}, {pipeline_mode = #tpu.pipeline_mode<synchronous>, transform_indices = @transform_8, window_bounds = array<i64: 128, 128>}, {pipeline_mode = #tpu.pipeline_mode<synchronous>, transform_indices = @transform_9, window_bounds = array<i64: 3, 128>}, {transform_indices = @transform_10, window_bounds = array<i64: 32, 128>}]} {
    %c0 = arith.constant 0 : index
    %c0_0 = arith.constant 0 : index
    %0 = vector.load %arg2[%c0, %c0_0] : memref<256x256xbf16, #tpu.memory_space<vmem>>, vector<256x256xbf16>
    %c0_1 = arith.constant 0 : index
    %c0_2 = arith.constant 0 : index
    %1 = vector.load %arg1[%c0_1, %c0_2] : memref<256x32xf32, #tpu.memory_space<vmem>>, vector<256x32xf32>
    %c0_3 = arith.constant 0 : index
    %c0_4 = arith.constant 0 : index
    %2 = vector.load %arg4[%c0_3, %c0_4] : memref<4x32xf32, #tpu.memory_space<vmem>>, vector<4x32xf32>
    %3 = vector.extract_strided_slice %2 {offsets = [0, 0], sizes = [1, 32], strides = [1, 1]} : vector<4x32xf32> to vector<1x32xf32>
    %4 = vector.extract_strided_slice %2 {offsets = [1, 0], sizes = [1, 32], strides = [1, 1]} : vector<4x32xf32> to vector<1x32xf32>
    %5 = vector.extract_strided_slice %2 {offsets = [2, 0], sizes = [1, 32], strides = [1, 1]} : vector<4x32xf32> to vector<1x32xf32>
    %6 = vector.extract_strided_slice %2 {offsets = [3, 0], sizes = [1, 32], strides = [1, 1]} : vector<4x32xf32> to vector<1x32xf32>
    %7 = arith.truncf %1 : vector<256x32xf32> to vector<256x32xbf16>
    %c0_5 = arith.constant 0 : index
    %c0_6 = arith.constant 0 : index
    %8 = vector.load %arg3[%c0_5, %c0_6] : memref<32x32xbf16, #tpu.memory_space<vmem>>, vector<32x32xbf16>
    %cst = arith.constant dense<0.000000e+00> : vector<256x32xf32>
    %9 = tpu.matmul %7, %8, %cst {dimension_numbers = #tpu.dot_dimension_numbers<[1], [0], [0], [1], [0, 0, 1, 1], [], []>} : vector<256x32xbf16>, vector<32x32xbf16>, vector<256x32xf32> -> vector<256x32xf32>
    %10 = vector.broadcast %3 : vector<1x32xf32> to vector<256x32xf32>
    %11 = arith.addf %9, %10 : vector<256x32xf32>
    %cst_7 = arith.constant dense<0.000000e+00> : vector<256xf32>
    %12 = vector.multi_reduction <add>, %11, %cst_7 [1] : vector<256x32xf32> to vector<256xf32>
    %13 = vector.shape_cast %12 : vector<256xf32> to vector<256x1xf32>
    %cst_8 = arith.constant 3.200000e+01 : f32
    %14 = vector.broadcast %cst_8 : f32 to vector<256x1xf32>
    %15 = arith.divf %13, %14 : vector<256x1xf32>
    %16 = arith.mulf %11, %11 : vector<256x32xf32>
    %cst_9 = arith.constant dense<0.000000e+00> : vector<256xf32>
    %17 = vector.multi_reduction <add>, %16, %cst_9 [1] : vector<256x32xf32> to vector<256xf32>
    %18 = vector.shape_cast %17 : vector<256xf32> to vector<256x1xf32>
    %cst_10 = arith.constant 3.200000e+01 : f32
    %19 = vector.broadcast %cst_10 : f32 to vector<256x1xf32>
    %20 = arith.divf %18, %19 : vector<256x1xf32>
    %21 = arith.mulf %15, %15 : vector<256x1xf32>
    %22 = arith.subf %20, %21 : vector<256x1xf32>
    %cst_11 = arith.constant 0.000000e+00 : f32
    %23 = vector.broadcast %cst_11 : f32 to vector<256x1xf32>
    %24 = arith.maximumf %22, %23 : vector<256x1xf32>
    %25 = vector.broadcast %15 : vector<256x1xf32> to vector<256x32xf32>
    %26 = arith.subf %11, %25 : vector<256x32xf32>
    %cst_12 = arith.constant 9.99999974E-6 : f32
    %27 = vector.broadcast %cst_12 : f32 to vector<256x1xf32>
    %28 = arith.addf %24, %27 : vector<256x1xf32>
    %29 = math.rsqrt %28 : vector<256x1xf32>
    %30 = vector.broadcast %29 : vector<256x1xf32> to vector<256x32xf32>
    %31 = arith.mulf %26, %30 : vector<256x32xf32>
    %32 = vector.broadcast %4 : vector<1x32xf32> to vector<256x32xf32>
    %33 = arith.mulf %31, %32 : vector<256x32xf32>
    %34 = vector.broadcast %5 : vector<1x32xf32> to vector<256x32xf32>
    %35 = arith.addf %33, %34 : vector<256x32xf32>
    %36 = arith.truncf %35 : vector<256x32xf32> to vector<256x32xbf16>
    %c0_13 = arith.constant 0 : index
    %c0_14 = arith.constant 0 : index
    %37 = vector.load %arg5[%c0_13, %c0_14] : memref<32x32xbf16, #tpu.memory_space<vmem>>, vector<32x32xbf16>
    %cst_15 = arith.constant dense<0.000000e+00> : vector<256x32xf32>
    %38 = tpu.matmul %36, %37, %cst_15 {dimension_numbers = #tpu.dot_dimension_numbers<[1], [0], [0], [1], [0, 0, 1, 1], [], []>} : vector<256x32xbf16>, vector<32x32xbf16>, vector<256x32xf32> -> vector<256x32xf32>
    %39 = vector.broadcast %6 : vector<1x32xf32> to vector<256x32xf32>
    %40 = arith.addf %38, %39 : vector<256x32xf32>
    %cst_16 = arith.constant 0.000000e+00 : f32
    %41 = vector.broadcast %cst_16 : f32 to vector<256x32xf32>
    %42 = arith.maximumf %40, %41 : vector<256x32xf32>
    %43 = arith.truncf %42 : vector<256x32xf32> to vector<256x32xbf16>
    %cst_17 = arith.constant dense<0.000000e+00> : vector<256x32xf32>
    %44 = tpu.matmul %0, %43, %cst_17 {dimension_numbers = #tpu.dot_dimension_numbers<[1], [0], [0], [1], [0, 0, 1, 1], [], []>} : vector<256x256xbf16>, vector<256x32xbf16>, vector<256x32xf32> -> vector<256x32xf32>
    %c0_18 = arith.constant 0 : index
    %c0_19 = arith.constant 0 : index
    %45 = vector.load %arg7[%c0_18, %c0_19] : memref<4x64xf32, #tpu.memory_space<vmem>>, vector<4x64xf32>
    %46 = vector.extract_strided_slice %45 {offsets = [0, 0], sizes = [1, 64], strides = [1, 1]} : vector<4x64xf32> to vector<1x64xf32>
    %47 = vector.extract_strided_slice %45 {offsets = [1, 0], sizes = [1, 64], strides = [1, 1]} : vector<4x64xf32> to vector<1x64xf32>
    %48 = vector.extract_strided_slice %45 {offsets = [2, 0], sizes = [1, 64], strides = [1, 1]} : vector<4x64xf32> to vector<1x64xf32>
    %49 = vector.extract_strided_slice %45 {offsets = [3, 0], sizes = [1, 64], strides = [1, 1]} : vector<4x64xf32> to vector<1x64xf32>
    %50 = arith.truncf %42 : vector<256x32xf32> to vector<256x32xbf16>
    %c0_20 = arith.constant 0 : index
    %c0_21 = arith.constant 0 : index
    %51 = vector.load %arg6[%c0_20, %c0_21] : memref<64x64xbf16, #tpu.memory_space<vmem>>, vector<32x64xbf16>
    %cst_22 = arith.constant dense<0.000000e+00> : vector<256x64xf32>
    %52 = tpu.matmul %50, %51, %cst_22 {dimension_numbers = #tpu.dot_dimension_numbers<[1], [0], [0], [1], [0, 0, 1, 1], [], []>} : vector<256x32xbf16>, vector<32x64xbf16>, vector<256x64xf32> -> vector<256x64xf32>
    %53 = arith.truncf %44 : vector<256x32xf32> to vector<256x32xbf16>
    %c32 = arith.constant 32 : index
    %c0_23 = arith.constant 0 : index
    %54 = vector.load %arg6[%c32, %c0_23] : memref<64x64xbf16, #tpu.memory_space<vmem>>, vector<32x64xbf16>
    %cst_24 = arith.constant dense<0.000000e+00> : vector<256x64xf32>
    %55 = tpu.matmul %53, %54, %cst_24 {dimension_numbers = #tpu.dot_dimension_numbers<[1], [0], [0], [1], [0, 0, 1, 1], [], []>} : vector<256x32xbf16>, vector<32x64xbf16>, vector<256x64xf32> -> vector<256x64xf32>
    %56 = arith.addf %52, %55 : vector<256x64xf32>
    %57 = vector.broadcast %46 : vector<1x64xf32> to vector<256x64xf32>
    %58 = arith.addf %56, %57 : vector<256x64xf32>
    %cst_25 = arith.constant dense<0.000000e+00> : vector<256xf32>
    %59 = vector.multi_reduction <add>, %58, %cst_25 [1] : vector<256x64xf32> to vector<256xf32>
    %60 = vector.shape_cast %59 : vector<256xf32> to vector<256x1xf32>
    %cst_26 = arith.constant 6.400000e+01 : f32
    %61 = vector.broadcast %cst_26 : f32 to vector<256x1xf32>
    %62 = arith.divf %60, %61 : vector<256x1xf32>
    %63 = arith.mulf %58, %58 : vector<256x64xf32>
    %cst_27 = arith.constant dense<0.000000e+00> : vector<256xf32>
    %64 = vector.multi_reduction <add>, %63, %cst_27 [1] : vector<256x64xf32> to vector<256xf32>
    %65 = vector.shape_cast %64 : vector<256xf32> to vector<256x1xf32>
    %cst_28 = arith.constant 6.400000e+01 : f32
    %66 = vector.broadcast %cst_28 : f32 to vector<256x1xf32>
    %67 = arith.divf %65, %66 : vector<256x1xf32>
    %68 = arith.mulf %62, %62 : vector<256x1xf32>
    %69 = arith.subf %67, %68 : vector<256x1xf32>
    %cst_29 = arith.constant 0.000000e+00 : f32
    %70 = vector.broadcast %cst_29 : f32 to vector<256x1xf32>
    %71 = arith.maximumf %69, %70 : vector<256x1xf32>
    %72 = vector.broadcast %62 : vector<256x1xf32> to vector<256x64xf32>
    %73 = arith.subf %58, %72 : vector<256x64xf32>
    %cst_30 = arith.constant 9.99999974E-6 : f32
    %74 = vector.broadcast %cst_30 : f32 to vector<256x1xf32>
    %75 = arith.addf %71, %74 : vector<256x1xf32>
    %76 = math.rsqrt %75 : vector<256x1xf32>
    %77 = vector.broadcast %76 : vector<256x1xf32> to vector<256x64xf32>
    %78 = arith.mulf %73, %77 : vector<256x64xf32>
    %79 = vector.broadcast %47 : vector<1x64xf32> to vector<256x64xf32>
    %80 = arith.mulf %78, %79 : vector<256x64xf32>
    %81 = vector.broadcast %48 : vector<1x64xf32> to vector<256x64xf32>
    %82 = arith.addf %80, %81 : vector<256x64xf32>
    %83 = arith.truncf %82 : vector<256x64xf32> to vector<256x64xbf16>
    %c0_31 = arith.constant 0 : index
    %c0_32 = arith.constant 0 : index
    %84 = vector.load %arg8[%c0_31, %c0_32] : memref<64x64xbf16, #tpu.memory_space<vmem>>, vector<64x64xbf16>
    %cst_33 = arith.constant dense<0.000000e+00> : vector<256x64xf32>
    %85 = tpu.matmul %83, %84, %cst_33 {dimension_numbers = #tpu.dot_dimension_numbers<[1], [0], [0], [1], [0, 0, 1, 1], [], []>} : vector<256x64xbf16>, vector<64x64xbf16>, vector<256x64xf32> -> vector<256x64xf32>
    %86 = vector.broadcast %49 : vector<1x64xf32> to vector<256x64xf32>
    %87 = arith.addf %85, %86 : vector<256x64xf32>
    %cst_34 = arith.constant 0.000000e+00 : f32
    %88 = vector.broadcast %cst_34 : f32 to vector<256x64xf32>
    %89 = arith.maximumf %87, %88 : vector<256x64xf32>
    %90 = arith.truncf %89 : vector<256x64xf32> to vector<256x64xbf16>
    %cst_35 = arith.constant dense<0.000000e+00> : vector<256x64xf32>
    %91 = tpu.matmul %0, %90, %cst_35 {dimension_numbers = #tpu.dot_dimension_numbers<[1], [0], [0], [1], [0, 0, 1, 1], [], []>} : vector<256x256xbf16>, vector<256x64xbf16>, vector<256x64xf32> -> vector<256x64xf32>
    %92 = vector.shape_cast %89 : vector<256x64xf32> to vector<32x8x64xf32>
    %cst_36 = arith.constant dense<0xFF800000> : vector<32x64xf32>
    %93 = vector.multi_reduction <maximumf>, %92, %cst_36 [1] : vector<32x8x64xf32> to vector<32x64xf32>
    %94 = vector.shape_cast %91 : vector<256x64xf32> to vector<32x8x64xf32>
    %cst_37 = arith.constant dense<0xFF800000> : vector<32x64xf32>
    %95 = vector.multi_reduction <maximumf>, %94, %cst_37 [1] : vector<32x8x64xf32> to vector<32x64xf32>
    %c0_38 = arith.constant 0 : index
    %c0_39 = arith.constant 0 : index
    %96 = vector.load %arg10[%c0_38, %c0_39] : memref<3x128xf32, #tpu.memory_space<vmem>>, vector<3x128xf32>
    %97 = vector.extract_strided_slice %96 {offsets = [0, 0], sizes = [1, 128], strides = [1, 1]} : vector<3x128xf32> to vector<1x128xf32>
    %98 = vector.extract_strided_slice %96 {offsets = [1, 0], sizes = [1, 128], strides = [1, 1]} : vector<3x128xf32> to vector<1x128xf32>
    %99 = vector.extract_strided_slice %96 {offsets = [2, 0], sizes = [1, 128], strides = [1, 1]} : vector<3x128xf32> to vector<1x128xf32>
    %100 = arith.truncf %93 : vector<32x64xf32> to vector<32x64xbf16>
    %c0_40 = arith.constant 0 : index
    %c0_41 = arith.constant 0 : index
    %101 = vector.load %arg9[%c0_40, %c0_41] : memref<128x128xbf16, #tpu.memory_space<vmem>>, vector<64x128xbf16>
    %cst_42 = arith.constant dense<0.000000e+00> : vector<32x128xf32>
    %102 = tpu.matmul %100, %101, %cst_42 {dimension_numbers = #tpu.dot_dimension_numbers<[1], [0], [0], [1], [0, 0, 1, 1], [], []>} : vector<32x64xbf16>, vector<64x128xbf16>, vector<32x128xf32> -> vector<32x128xf32>
    %103 = arith.truncf %95 : vector<32x64xf32> to vector<32x64xbf16>
    %c64 = arith.constant 64 : index
    %c0_43 = arith.constant 0 : index
    %104 = vector.load %arg9[%c64, %c0_43] : memref<128x128xbf16, #tpu.memory_space<vmem>>, vector<64x128xbf16>
    %cst_44 = arith.constant dense<0.000000e+00> : vector<32x128xf32>
    %105 = tpu.matmul %103, %104, %cst_44 {dimension_numbers = #tpu.dot_dimension_numbers<[1], [0], [0], [1], [0, 0, 1, 1], [], []>} : vector<32x64xbf16>, vector<64x128xbf16>, vector<32x128xf32> -> vector<32x128xf32>
    %106 = arith.addf %102, %105 : vector<32x128xf32>
    %107 = vector.broadcast %97 : vector<1x128xf32> to vector<32x128xf32>
    %108 = arith.addf %106, %107 : vector<32x128xf32>
    %cst_45 = arith.constant dense<0.000000e+00> : vector<32xf32>
    %109 = vector.multi_reduction <add>, %108, %cst_45 [1] : vector<32x128xf32> to vector<32xf32>
    %110 = vector.shape_cast %109 : vector<32xf32> to vector<32x1xf32>
    %cst_46 = arith.constant 1.280000e+02 : f32
    %111 = vector.broadcast %cst_46 : f32 to vector<32x1xf32>
    %112 = arith.divf %110, %111 : vector<32x1xf32>
    %113 = arith.mulf %108, %108 : vector<32x128xf32>
    %cst_47 = arith.constant dense<0.000000e+00> : vector<32xf32>
    %114 = vector.multi_reduction <add>, %113, %cst_47 [1] : vector<32x128xf32> to vector<32xf32>
    %115 = vector.shape_cast %114 : vector<32xf32> to vector<32x1xf32>
    %cst_48 = arith.constant 1.280000e+02 : f32
    %116 = vector.broadcast %cst_48 : f32 to vector<32x1xf32>
    %117 = arith.divf %115, %116 : vector<32x1xf32>
    %118 = arith.mulf %112, %112 : vector<32x1xf32>
    %119 = arith.subf %117, %118 : vector<32x1xf32>
    %cst_49 = arith.constant 0.000000e+00 : f32
    %120 = vector.broadcast %cst_49 : f32 to vector<32x1xf32>
    %121 = arith.maximumf %119, %120 : vector<32x1xf32>
    %122 = vector.broadcast %112 : vector<32x1xf32> to vector<32x128xf32>
    %123 = arith.subf %108, %122 : vector<32x128xf32>
    %cst_50 = arith.constant 9.99999974E-6 : f32
    %124 = vector.broadcast %cst_50 : f32 to vector<32x1xf32>
    %125 = arith.addf %121, %124 : vector<32x1xf32>
    %126 = math.rsqrt %125 : vector<32x1xf32>
    %127 = vector.broadcast %126 : vector<32x1xf32> to vector<32x128xf32>
    %128 = arith.mulf %123, %127 : vector<32x128xf32>
    %129 = vector.broadcast %98 : vector<1x128xf32> to vector<32x128xf32>
    %130 = arith.mulf %128, %129 : vector<32x128xf32>
    %131 = vector.broadcast %99 : vector<1x128xf32> to vector<32x128xf32>
    %132 = arith.addf %130, %131 : vector<32x128xf32>
    %c0_51 = arith.constant 0 : index
    %c0_52 = arith.constant 0 : index
    %133 = vector.load %arg11[%c0_51, %c0_52] : memref<32x128xf32, #tpu.memory_space<vmem>>, vector<32x128xf32>
    tpu.vector_store %arg11[%c0_51, %c0_52], %132 {strides = array<i32>} : memref<32x128xf32, #tpu.memory_space<vmem>>, vector<32x128xf32>,
    return
  }
  func.func @transform_0(%arg0: i32) -> (i32, i32) {
    %c0_i32 = arith.constant 0 : i32
    %c0_i32_0 = arith.constant 0 : i32
    return %arg0, %c0_i32 : i32, i32
  }
  func.func @transform_1(%arg0: i32) -> (i32, i32) {
    %c0_i32 = arith.constant 0 : i32
    %c0_i32_0 = arith.constant 0 : i32
    %c0_i32_1 = arith.constant 0 : i32
    return %c0_i32, %c0_i32_0 : i32, i32
  }
  func.func @transform_2(%arg0: i32) -> (i32, i32) {
    %c0_i32 = arith.constant 0 : i32
    %c0_i32_0 = arith.constant 0 : i32
    %c0_i32_1 = arith.constant 0 : i32
    return %c0_i32, %c0_i32_0 : i32, i32
  }
  func.func @transform_3(%arg0: i32) -> (i32, i32) {
    %c0_i32 = arith.constant 0 : i32
    %c0_i32_0 = arith.constant 0 : i32
    %c0_i32_1 = arith.constant 0 : i32
    return %c0_i32, %c0_i32_0 : i32, i32
  }
  func.func @transform_4(%arg0: i32) -> (i32, i32) {
    %c0_i32 = arith.constant 0 : i32
    %c0_i32_0 = arith.constant 0 : i32
    %c0_i32_1 = arith.constant 0 : i32
    return %c0_i32, %c0_i32_0 : i32, i32
  }
  func.func @transform_5(%arg0: i32) -> (i32, i32) {
    %c0_i32 = arith.constant 0 : i32
    %c0_i32_0 = arith.constant 0 : i32
    %c0_i32_1 = arith.constant 0 : i32
    return %c0_i32, %c0_i32_0 : i32, i32
  }
  func.func @transform_6(%arg0: i32) -> (i32, i32) {
    %c0_i32 = arith.constant 0 : i32
    %c0_i32_0 = arith.constant 0 : i32
    %c0_i32_1 = arith.constant 0 : i32
    return %c0_i32, %c0_i32_0 : i32, i32
  }
  func.func @transform_7(%arg0: i32) -> (i32, i32) {
    %c0_i32 = arith.constant 0 : i32
    %c0_i32_0 = arith.constant 0 : i32
    %c0_i32_1 = arith.constant 0 : i32
    return %c0_i32, %c0_i32_0 : i32, i32
  }
  func.func @transform_8(%arg0: i32) -> (i32, i32) {
    %c0_i32 = arith.constant 0 : i32
    %c0_i32_0 = arith.constant 0 : i32
    %c0_i32_1 = arith.constant 0 : i32
    return %c0_i32, %c0_i32_0 : i32, i32
  }
  func.func @transform_9(%arg0: i32) -> (i32, i32) {
    %c0_i32 = arith.constant 0 : i32
    %c0_i32_0 = arith.constant 0 : i32
    %c0_i32_1 = arith.constant 0 : i32
    return %c0_i32, %c0_i32_0 : i32, i32
  }
  func.func @transform_10(%arg0: i32) -> (i32, i32) {
    %c0_i32 = arith.constant 0 : i32
    %c0_i32_0 = arith.constant 0 : i32
    return %arg0, %c0_i32 : i32, i32
  }
}

</mosaic_0001>

<bundles_post_ra>
// kernel: pgn_forward.1
= control target key start
LH: loop header
LB: loop body
LE: loop exit
PB: predicated region body
PF: predicated region fallthrough
CT: control target
= control target key end

     0   :  { %15 = vsyncpa [#allocation3], 0  ;;  %s7923_s0 = inlined_call_operand.hbm [shape: f32[256,32], index: 0, kind: input, shape index: {}]   ;;  %s7924_s1 = inlined_call_operand.hbm [shape: bf16[256,256], index: 1, kind: input, shape index: {}]   ;;  %s7925_s2 = inlined_call_operand.hbm [shape: bf16[32,32], index: 2, kind: input, shape index: {}]   ;;  %s7926_s3 = inlined_call_operand.vmem [shape: f32[4,32], index: 3, kind: input, shape index: {}]   ;;  %s7927_s4 = inlined_call_operand.hbm [shape: bf16[32,32], index: 4, kind: input, shape index: {}]   ;;  %s7928_s5 = inlined_call_operand.hbm [shape: bf16[64,64], index: 5, kind: input, shape index: {}]   ;;  %s7929_s6 = inlined_call_operand.hbm [shape: f32[4,64], index: 6, kind: input, shape index: {}]   ;;  %s7930_s7 = inlined_call_operand.hbm [shape: bf16[64,64], index: 7, kind: input, shape index: {}]   ;;  %s7931_s8 = inlined_call_operand.hbm [shape: bf16[128,128], index: 8, kind: input, shape index: {}]   ;;  %s7932_s9 = inlined_call_operand.hbm [shape: f32[3,128], index: 9, kind: input, shape index: {}]   ;;  %s7933_s10 = inlined_call_operand.hbm [shape: f32[32,128], index: 10, kind: output, shape index: {}]  }
   0x1   :  { %16 = vsyncpa [#allocation6], 0 }
   0x2   :  { %17 = vsyncpa [#allocation9], 0 }
   0x3   :  { %18 = vsyncpa [#allocation12], 0 }
   0x4   :  { %19 = vsyncpa [#allocation15], 0 }
   0x5   :  { %20 = vsyncpa [#allocation4], 0  ;;  %s38_s15 = sshll.u32 %s7924_s1, 4  ;;  %s5204_s16 = smov [#allocation5]   ;;  %s39_s15 = int_to_ptr.hbm [resolvable:$true] %s38_s15 }
   0x6   :  { %s40_s17 = sshll.u32 %s5204_s16, 4  ;;  %s5205_s18 = smov 128   ;;  %s41_s17 = int_to_ptr.vmem [resolvable:$true] %s40_s17 }
   0x7   :  { %s5206_s19 = smov 8   ;;  %s66_s22 = sshll.u32 %s7927_s4, 4  ;;  %s67_s22 = int_to_ptr.hbm [resolvable:$true] %s66_s22 }
   0x8   :  { %46 = dma.hbm_to_vmem [thread:$0]  %s39_s15, 4096, %s41_s17, [#allocation6], %s5205_s18, %s5205_s18, %s5206_s19  }
   0x9   :  { %s5207_s23 = smov [#allocation8]   ;;  %s93_s1 = sshll.u32 %s7929_s6, 4  ;;  %s94_s1 = int_to_ptr.hbm [resolvable:$true] %s93_s1 }
   0xa   :  { %s68_s24 = sshll.u32 %s5207_s23, 4  ;;  %s5208_s27 = smov 64   ;;  %s69_s24 = int_to_ptr.vmem [resolvable:$true] %s68_s24 }
   0xb   :  { %s5209_s28 = smov 4   ;;  %s116_s11 = sshll.u32 %s7931_s8, 4  ;;  %s117_s11 = int_to_ptr.hbm [resolvable:$true] %s116_s11 }
   0xc   :  { %74 = dma.hbm_to_vmem [thread:$0]  %s67_s22, 256, %s69_s24, [#allocation9], %s5208_s27, %s5208_s27, %s5209_s28  }
   0xd   :  { %s5210_s4 = smov [#allocation11]   ;;  %s5211_s13 = smov [#allocation14]  }
   0xe   :  { %s95_s12 = sshll.u32 %s5210_s4, 4  ;;  %s118_s14 = sshll.u32 %s5211_s13, 4  ;;  %s96_s12 = int_to_ptr.vmem [resolvable:$true] %s95_s12  ;;  %s119_s14 = int_to_ptr.vmem [resolvable:$true] %s118_s14 }
   0xf   :  { %98 = dma.hbm_to_vmem [thread:$0]  %s94_s1, 64, %s96_s12, [#allocation12]  }
  0x10   :  { %s25_s16 = sshll.u32 %s7923_s0, 4  ;;  %s51_s8 = sshll.u32 %s7925_s2, 4  ;;  %s26_s16 = int_to_ptr.hbm [resolvable:$true] %s25_s16  ;;  %s52_s8 = int_to_ptr.hbm [resolvable:$true] %s51_s8 }
  0x11   :  { %124 = dma.hbm_to_vmem [thread:$0]  %s117_s11, 1024, %s119_s14, [#allocation15], %s5208_s27, %s5208_s27, %s5209_s28  }
  0x12   :  { %s5212_s21 = smov [#allocation2]   ;;  %s5213_s23 = smov [#allocation7]  }
  0x13   :  { %s27_s22 = sshll.u32 %s5212_s21, 4  ;;  %s53_s0 = sshll.u32 %s5213_s23, 4  ;;  %s28_s22 = int_to_ptr.vmem [resolvable:$true] %s27_s22  ;;  %s54_s0 = int_to_ptr.vmem [resolvable:$true] %s53_s0 }
  0x14   :  { %33 = dma.hbm_to_vmem [thread:$0]  %s26_s16, 4096, %s28_s22, [#allocation3], %s5205_s18, %s5205_s18, %s5206_s19  }
  0x15   :  { %s79_s26 = sshll.u32 %s7928_s5, 4  ;;  %s103_s29 = sshll.u32 %s7930_s7, 4  ;;  %s80_s26 = int_to_ptr.hbm [resolvable:$true] %s79_s26  ;;  %s104_s29 = int_to_ptr.hbm [resolvable:$true] %s103_s29 }
  0x16   :  { %59 = dma.hbm_to_vmem [thread:$0]  %s52_s8, 256, %s54_s0, [#allocation6], %s5208_s27, %s5208_s27, %s5209_s28  }
  0x17   :  { %s5214_s30 = smov [#allocation10]   ;;  %s5215_s4 = smov [#allocation13]  }
  0x18   :  { %s81_s11 = sshll.u32 %s5214_s30, 4  ;;  %s105_s5 = sshll.u32 %s5215_s4, 4  ;;  %s82_s11 = int_to_ptr.vmem [resolvable:$true] %s81_s11  ;;  %s106_s5 = int_to_ptr.vmem [resolvable:$true] %s105_s5 }
  0x19   :  { %87 = dma.hbm_to_vmem [thread:$0]  %s80_s26, 512, %s82_s11, [#allocation9], %s5208_s27, %s5208_s27, %s5209_s28  }
  0x1a   :  { %s130_s14 = sshll.u32 %s7932_s9, 4  ;;  %s5216_s7 = smov [#allocation16]   ;;  %s131_s14 = int_to_ptr.hbm [resolvable:$true] %s130_s14 }
  0x1b   :  { %111 = dma.hbm_to_vmem [thread:$0]  %s104_s29, 512, %s106_s5, [#allocation12], %s5208_s27, %s5208_s27, %s5209_s28  }
  0x1c   :  { %s132_s6 = sshll.u32 %s5216_s7, 4  ;;  %s133_s6 = int_to_ptr.vmem [resolvable:$true] %s132_s6 }
  0x1d   :  { %135 = dma.hbm_to_vmem [thread:$0]  %s131_s14, 64, %s133_s6, [#allocation15]  }
  0x1e   :  { %5192 = dma.done.wait [#allocation3], 4096  }
  0x1f   :  { %5193 = vsyncadd [#allocation3], 4294963200 }
  0x20   :  { %5194 = dma.done.wait [#allocation6], 4352  }
  0x21   :  { %5195 = vsyncadd [#allocation6], 4294962944 }
  0x22   :  { %5196 = dma.done.wait [#allocation9], 768  }
  0x23   :  { %5197 = vsyncadd [#allocation9], 4294966528 }
  0x24   :  { %5198 = dma.done.wait [#allocation12], 576  }
  0x25   :  { %5199 = vsyncadd [#allocation12], 4294966720 }
  0x26   :  { %5200 = dma.done.wait [#allocation15], 1088  }
  0x27   :  { %5201 = vsyncadd [#allocation15], 4294966208  ;;  %v4768_v0 = vld [vmem:[#allocation7 + $0x8] sm:$0xff]  ;;  %v4767_v1 = vld [vmem:[#allocation7] sm:$0xff]  ;;  %vm271_vm0 = vcmask 261120   ;;  %s4426_s8 = sshll.u32 %s7933_s10, 4  ;;  %s4427_s8 = int_to_ptr.hbm [resolvable:$true] %s4426_s8 }
  0x28   :  { %326 = vmatpush.bf16.msra.mxu0 %v4768_v0  ;;  %v205_v2 = vld [vmem:[#allocation2] sm:$0xff]  ;;  %v206_v3 = vld [vmem:[#allocation2 + $0x8] sm:$0xff]  ;;  %4787 = vmatpush.bf16.msra.mxu1 %v4768_v0  ;;  %v207_v5 = vld [vmem:[#allocation2 + $0x10] sm:$0xff] }
  0x29   :  { %4788 = vmatpush.bf16.msra.mxu3 %v4768_v0  ;;  %v238_v4 = vpack.c.bf16 %v206_v3, %v205_v2  ;;  %v208_v6 = vld [vmem:[#allocation2 + $0x18] sm:$0xff]  ;;  %v209_v8 = vld [vmem:[#allocation2 + $0x20] sm:$0xff]  ;;  %v210_v9 = vld [vmem:[#allocation2 + $0x28] sm:$0xff] }
  0x2a   :  { %v239_v7 = vpack.c.bf16 %v208_v6, %v207_v5  ;;  %v240_v10 = vpack.c.bf16 %v210_v9, %v209_v8  ;;  %v217_v11 = vld [vmem:[#allocation2 + $0x60] sm:$0xff]  ;;  %v218_v12 = vld [vmem:[#allocation2 + $0x68] sm:$0xff]  ;;  %v211_v14 = vld [vmem:[#allocation2 + $0x30] sm:$0xff] }
  0x2b   :  { %v244_v13 = vpack.c.bf16 %v218_v12, %v217_v11  ;;  %v212_v15 = vld [vmem:[#allocation2 + $0x38] sm:$0xff]  ;;  %v219_v17 = vld [vmem:[#allocation2 + $0x70] sm:$0xff]  ;;  %v225_v20 = vld [vmem:[#allocation2 + $0xa0] sm:$0xff] }
  0x2c   :  { %327 = vmatpush.bf16.msra.mxu0 %v4767_v1  ;;  %4789 = vmatpush.bf16.msra.mxu1 %v4767_v1  ;;  %v241_v16 = vpack.c.bf16 %v212_v15, %v211_v14  ;;  %v220_v18 = vld [vmem:[#allocation2 + $0x78] sm:$0xff]  ;;  %v226_v21 = vld [vmem:[#allocation2 + $0xa8] sm:$0xff]  ;;  %v213_v23 = vld [vmem:[#allocation2 + $0x40] sm:$0xff] }
  0x2d   :  { %4790 = vmatpush.bf16.msra.mxu3 %v4767_v1  ;;  %v245_v19 = vpack.c.bf16 %v220_v18, %v219_v17  ;;  %v248_v22 = vpack.c.bf16 %v226_v21, %v225_v20  ;;  %v214_v24 = vld [vmem:[#allocation2 + $0x48] sm:$0xff]  ;;  %v221_v25 = vld [vmem:[#allocation2 + $0x80] sm:$0xff]  ;;  %v227_v28 = vld [vmem:[#allocation2 + $0xb0] sm:$0xff] }
  0x2e   :  { %v222_v26 = vld [vmem:[#allocation2 + $0x88] sm:$0xff]  ;;  %v242_v27 = vpack.c.bf16 %v214_v24, %v213_v23  ;;  %v228_v29 = vld [vmem:[#allocation2 + $0xb8] sm:$0xff]  ;;  %v215_v32 = vld [vmem:[#allocation2 + $0x50] sm:$0xff] }
  0x2f   :  { %4451 = vmatmul.msk.bf16.vlgmr.msra.gmra.mxu0 %vm271_vm0, %v238_v4  ;;  %4457 = vmatmul.msk.bf16.vlgmr.msra.gmra.mxu1 %vm271_vm0, %v244_v13  ;;  %v246_v30 = vpack.c.bf16 %v222_v26, %v221_v25  ;;  %v249_v31 = vpack.c.bf16 %v228_v29, %v227_v28  ;;  %v216_v33 = vld [vmem:[#allocation2 + $0x58] sm:$0xff]  ;;  %v223_v34 = vld [vmem:[#allocation2 + $0x90] sm:$0xff]  ;;  %v229_v37 = vld [vmem:[#allocation2 + $0xc0] sm:$0xff] }
  0x30   :  { %4461 = vmatmul.msk.bf16.vlgmr.msra.gmra.mxu3 %vm271_vm0, %v248_v22  ;;  %v224_v35 = vld [vmem:[#allocation2 + $0x98] sm:$0xff]  ;;  %v243_v36 = vpack.c.bf16 %v216_v33, %v215_v32  ;;  %v230_v38 = vld [vmem:[#allocation2 + $0xc8] sm:$0xff]  ;;  %v231_v41 = vld [vmem:[#allocation2 + $0xd0] sm:$0xff] }
  0x31   :  { %v247_v39 = vpack.c.bf16 %v224_v35, %v223_v34  ;;  %v250_v40 = vpack.c.bf16 %v230_v38, %v229_v37  ;;  %v232_v42 = vld [vmem:[#allocation2 + $0xd8] sm:$0xff]  ;;  %v5341_v44 = vld [vmem:[%s7926_s3] sm:$0xf]  ;;  %v234_v46 = vld [vmem:[#allocation2 + $0xe8] sm:$0xff] }
  0x32   :  { %v251_v43 = vpack.c.bf16 %v232_v42, %v231_v41  ;;  %v233_v45 = vld [vmem:[#allocation2 + $0xe0] sm:$0xff]  ;;  %v5344_v47 = vperm.slane %v5341_v44, 0  ;;  %v235_v58 = vld [vmem:[#allocation2 + $0xf0] sm:$0xff]  ;;  %v236_v59 = vld [vmem:[#allocation2 + $0xf8] sm:$0xff] }
  0x33   :  { %v252_v48 = vpack.c.bf16 %v234_v46, %v233_v45  ;;  %v253_v61 = vpack.c.bf16 %v236_v59, %v235_v58 }
  0x3f   :  { %4452 = vmatmul.msk.bf16.gmra.mxu0 %vm271_vm0, %v239_v7  ;;  %4458 = vmatmul.msk.bf16.gmra.mxu1 %vm271_vm0, %v245_v19 }
  0x40   :  { %4462 = vmatmul.msk.bf16.gmra.mxu3 %vm271_vm0, %v249_v31 }
  0x4f   :  { %4453 = vmatmul.msk.bf16.gmra.mxu0 %vm271_vm0, %v240_v10  ;;  %4459 = vmatmul.msk.bf16.gmra.mxu1 %vm271_vm0, %v246_v30 }
  0x50   :  { %4463 = vmatmul.msk.bf16.gmra.mxu3 %vm271_vm0, %v250_v40 }
  0x5f   :  { %4454 = vmatmul.msk.bf16.gmra.mxu0 %vm271_vm0, %v241_v16  ;;  %4460 = vmatmul.msk.bf16.gmra.mxu1 %vm271_vm0, %v247_v39 }
  0x60   :  { %4464 = vmatmul.msk.bf16.gmra.mxu3 %vm271_vm0, %v251_v43 }
  0x6f   :  { %4455 = vmatmul.msk.bf16.gmra.mxu0 %vm271_vm0, %v242_v27 }
  0x70   :  { %4465 = vmatmul.msk.bf16.gmra.mxu3 %vm271_vm0, %v252_v48 }
  0x7f   :  { %4456 = vmatmul.msk.bf16.gmra.mxu0 %vm271_vm0, %v243_v36 }
  0x80   :  { %4466 = vmatmul.msk.bf16.gmra.mxu3 %vm271_vm0, %v253_v61 }
  0xac   :  { %v329_v49 = vpop.f32.mrf.mxu0  ;;  %v359_v18 = vpop.f32.mrf.mxu1 }
  0xad   :  { %v5348_v50 = vadd.f32 %v329_v49, %v5344_v47  ;;  %v5449_v58 = vadd.f32 %v359_v18, %v5344_v47 }
  0xaf   :  { %v409_v51 = vsel %vm271_vm0, %v5348_v50, 0.0  ;;  %v544_v52 = vmul.f32 %v5348_v50, %v5348_v50 }
  0xb0   :  { %410 = vadd.xlane.f32.xlu0 %v409_v51 }
  0xb1   :  { %v576_v53 = vsel %vm271_vm0, %v544_v52, 0.0 }
  0xb2   :  { %577 = vadd.xlane.f32.xlu1 %v576_v53 }
  0xb3   :  { %v5419_v35 = vpop.f32.mrf.mxu3 }
  0xb4   :  { %v331_v54 = vpop.f32.mrf.mxu0  ;;  %v361_v25 = vpop.f32.mrf.mxu1 }
  0xb5   :  { %v5356_v55 = vadd.f32 %v331_v54, %v5344_v47  ;;  %v5441_v53 = vadd.f32 %v361_v25, %v5344_v47 }
  0xb7   :  { %v412_v56 = vsel %vm271_vm0, %v5356_v55, 0.0  ;;  %v545_v57 = vmul.f32 %v5356_v55, %v5356_v55  ;;  %v448_v61 = vsel %vm271_vm0, %v5441_v53, 0.0 }
  0xb8   :  { %413 = vadd.xlane.f32.xlu0 %v412_v56 }
  0xb9   :  { %v579_v60 = vsel %vm271_vm0, %v545_v57, 0.0 }
  0xba   :  { %580 = vadd.xlane.f32.xlu1 %v579_v60 }
  0xbb   :  { %v5430_v43 = vpop.f32.mrf.mxu3 }
  0xbc   :  { %v334_v62 = vpop.f32.mrf.mxu0  ;;  %v364_v32 = vpop.f32.mrf.mxu1 }
  0xbd   :  { %v5365_v63 = vadd.f32 %v334_v62, %v5344_v47  ;;  %v5217_v62 = vmov 32.0  }
  0xbe   :  { %4808 = vrcp.f32 %v5217_v62 }
  0xbf   :  { %v415_v0 = vsel %vm271_vm0, %v5365_v63, 0.0  ;;  %v546_v1 = vmul.f32 %v5365_v63, %v5365_v63 }
  0xc0   :  { %416 = vadd.xlane.f32.xlu2 %v415_v0 }
  0xc1   :  { %v582_v2 = vsel %vm271_vm0, %v546_v1, 0.0  ;;  %v5459_v1 = vadd.f32 %v364_v32, %v5344_v47 }
  0xc2   :  { %583 = vadd.xlane.f32.xlu0 %v582_v2  ;;  %v556_v2 = vmul.f32 %v5449_v58, %v5449_v58 }
  0xc3   :  { %v5443_v54 = vpop.f32.mrf.mxu3 }
  0xc4   :  { %v336_v3 = vpop.f32.mrf.mxu0  ;;  %v366_v41 = vpop.f32.mrf.mxu1 }
  0xc5   :  { %v5373_v4 = vadd.f32 %v336_v3, %v5344_v47 }
  0xc7   :  { %v418_v5 = vsel %vm271_vm0, %v5373_v4, 0.0  ;;  %v547_v6 = vmul.f32 %v5373_v4, %v5373_v4 }
  0xc8   :  { %419 = vadd.xlane.f32.xlu2 %v418_v5  ;;  %v445_v5 = vsel %vm271_vm0, %v5449_v58, 0.0 }
  0xc9   :  { %v585_v7 = vsel %vm271_vm0, %v547_v6, 0.0 }
  0xca   :  { %586 = vadd.xlane.f32.xlu1 %v585_v7  ;;  %v4809_v7 = vpop.eup %4808 }
  0xcb   :  { %v5465_v6 = vpop.f32.mrf.mxu3  ;;  %vm510_vm1 = vweird.f32 %v4809_v7 }
  0xcc   :  { %v339_v8 = vpop.f32.mrf.mxu0  ;;  %v369_v52 = vpop.f32.mrf.mxu1 }
  0xcd   :  { %v5381_v9 = vadd.f32 %v339_v8, %v5344_v47  ;;  %v5468_v8 = vadd.f32 %v366_v41, %v5344_v47  ;;  %v5478_v18 = vadd.f32 %v369_v52, %v5344_v47 }
  0xcf   :  { %v421_v10 = vsel %vm271_vm0, %v5381_v9, 0.0  ;;  %v548_v11 = vmul.f32 %v5381_v9, %v5381_v9  ;;  %v457_v32 = vsel %vm271_vm0, %v5478_v18, 0.0 }
  0xd0   :  { %422 = vadd.xlane.f32.xlu2 %v421_v10  ;;  %v612_v10 = vsel %vm271_vm0, %v556_v2, 0.0 }
  0xd1   :  { %v588_v12 = vsel %vm271_vm0, %v548_v11, 0.0  ;;  %v451_v11 = vsel %vm271_vm0, %v5459_v1, 0.0 }
  0xd2   :  { %589 = vadd.xlane.f32.xlu1 %v588_v12  ;;  %v506_v12 = vmul.f32 32.0, %v4809_v7 }
  0xd4   :  { %v341_v13 = vpop.f32.mrf.mxu0  ;;  %v371_v3 = vpop.f32.mrf.mxu1 }
  0xd5   :  { %v5389_v14 = vadd.f32 %v341_v13, %v5344_v47  ;;  %v557_v13 = vmul.f32 %v5441_v53, %v5441_v53 }
  0xd7   :  { %v424_v15 = vsel %vm271_vm0, %v5389_v14, 0.0  ;;  %v549_v16 = vmul.f32 %v5389_v14, %v5389_v14 }
  0xd8   :  { %425 = vadd.xlane.f32.xlu0 %v424_v15  ;;  %v559_v15 = vmul.f32 %v5468_v8, %v5468_v8 }
  0xd9   :  { %v591_v17 = vsel %vm271_vm0, %v549_v16, 0.0  ;;  %v507_v16 = vsub.f32 1.0, %v506_v12 }
  0xda   :  { %592 = vadd.xlane.f32.xlu2 %v591_v17 }
  0xdb   :  { %v508_v25 = vmul.f32 %v4809_v7, %v507_v16 }
  0xdc   :  { %v344_v19 = vpop.f32.mrf.mxu0  ;;  %v374_v17 = vpop.f32.mrf.mxu1 }
  0xdd   :  { %v5397_v20 = vadd.f32 %v344_v19, %v5344_v47  ;;  %v615_v19 = vsel %vm271_vm0, %v557_v13, 0.0  ;;  %v5515_v52 = vadd.f32 %v374_v17, %v5344_v47 }
  0xdf   :  { %v427_v21 = vsel %vm271_vm0, %v5397_v20, 0.0  ;;  %v550_v22 = vmul.f32 %v5397_v20, %v5397_v20  ;;  %v463_v13 = vsel %vm271_vm0, %v5515_v52, 0.0 }
  0xe0   :  { %428 = vadd.xlane.f32.xlu0 %v427_v21  ;;  %v454_v21 = vsel %vm271_vm0, %v5468_v8, 0.0 }
  0xe1   :  { %v594_v23 = vsel %vm271_vm0, %v550_v22, 0.0  ;;  %v621_v22 = vsel %vm271_vm0, %v559_v15, 0.0  ;;  %v5537_v15 = vadd.f32 %v5430_v43, %v5344_v47 }
  0xe2   :  { %595 = vadd.xlane.f32.xlu2 %v594_v23  ;;  %v5484_v23 = vpop.f32.mrf.mxu3 }
  0xe3   :  { %v565_v43 = vmul.f32 %v5537_v15, %v5537_v15 }
  0xe4   :  { %v346_v24 = vpop.f32.mrf.mxu0 }
  0xe5   :  { %v5405_v26 = vadd.f32 %v346_v24, %v5344_v47  ;;  %v558_v24 = vmul.f32 %v5459_v1, %v5459_v1 }
  0xe7   :  { %v430_v27 = vsel %vm271_vm0, %v5405_v26, 0.0  ;;  %v551_v28 = vmul.f32 %v5405_v26, %v5405_v26 }
  0xe8   :  { %431 = vadd.xlane.f32.xlu1 %v430_v27  ;;  %v560_v27 = vmul.f32 %v5478_v18, %v5478_v18 }
  0xe9   :  { %v597_v29 = vsel %vm271_vm0, %v551_v28, 0.0  ;;  %v618_v28 = vsel %vm271_vm0, %v558_v24, 0.0 }
  0xea   :  { %598 = vadd.xlane.f32.xlu0 %v597_v29  ;;  %v509_v29 = vadd.f32 %v4809_v7, %v508_v25 }
  0xec   :  { %v349_v30 = vpop.f32.mrf.mxu0 }
  0xed   :  { %v5413_v31 = vadd.f32 %v349_v30, %v5344_v47  ;;  %v5492_v30 = vadd.f32 %v371_v3, %v5344_v47  ;;  %v562_v3 = vmul.f32 %v5515_v52, %v5515_v52 }
  0xef   :  { %v433_v33 = vsel %vm271_vm0, %v5413_v31, 0.0  ;;  %v552_v34 = vmul.f32 %v5413_v31, %v5413_v31  ;;  %v561_v41 = vmul.f32 %v5492_v30, %v5492_v30  ;;  %v630_v17 = vsel %vm271_vm0, %v562_v3, 0.0 }
  0xf0   :  { %434 = vadd.xlane.f32.xlu1 %v433_v33  ;;  %v624_v33 = vsel %vm271_vm0, %v560_v27, 0.0 }
  0xf1   :  { %v600_v36 = vsel %vm271_vm0, %v552_v34, 0.0  ;;  %v376_v34 = vpop.f32.mrf.mxu1 }
  0xf2   :  { %601 = vadd.xlane.f32.xlu0 %v600_v36  ;;  %v5497_v36 = vsel %vm510_vm1, %v4809_v7, %v509_v29 }
  0xf4   :  { %v351_v37 = vpop.f32.mrf.mxu0 }
  0xf5   :  { %v5423_v38 = vadd.f32 %v351_v37, %v5344_v47  ;;  %v5499_v37 = vpop.f32.mrf.mxu3 }
  0xf7   :  { %v436_v39 = vsel %vm271_vm0, %v5423_v38, 0.0  ;;  %v553_v40 = vmul.f32 %v5423_v38, %v5423_v38 }
  0xf8   :  { %437 = vadd.xlane.f32.xlu2 %v436_v39 }
  0xf9   :  { %v603_v42 = vsel %vm271_vm0, %v553_v40, 0.0  ;;  %v5502_v40 = vadd.f32 %v376_v34, %v5344_v47 }
  0xfa   :  { %604 = vadd.xlane.f32.xlu1 %v603_v42 }
  0xfc   :  { %v354_v45 = vpop.f32.mrf.mxu0 }
  0xfd   :  { %v5433_v46 = vadd.f32 %v354_v45, %v5344_v47 }
  0xff   :  { %v439_v48 = vsel %vm271_vm0, %v5433_v46, 0.0  ;;  %v554_v49 = vmul.f32 %v5433_v46, %v5433_v46 }
 0x100   :  { %440 = vadd.xlane.f32.xlu2 %v439_v48  ;;  %v460_v48 = vsel %vm271_vm0, %v5492_v30, 0.0 }
 0x101   :  { %v606_v51 = vsel %vm271_vm0, %v554_v49, 0.0 }
 0x102   :  { %607 = vadd.xlane.f32.xlu1 %v606_v51 }
 0x104   :  { %v356_v56 = vpop.f32.mrf.mxu0 }
 0x105   :  { %v5446_v57 = vadd.f32 %v356_v56, %v5344_v47  ;;  %v627_v56 = vsel %vm271_vm0, %v561_v41, 0.0  ;;  %v5557_v41 = vadd.f32 %v5443_v54, %v5344_v47 }
 0x107   :  { %v442_v59 = vsel %vm271_vm0, %v5446_v57, 0.0  ;;  %v555_v60 = vmul.f32 %v5446_v57, %v5446_v57  ;;  %v566_v3 = vmul.f32 %v5557_v41, %v5557_v41 }
 0x108   :  { %443 = vadd.xlane.f32.xlu0 %v442_v59  ;;  %v466_v59 = vsel %vm271_vm0, %v5502_v40, 0.0 }
 0x109   :  { %v609_v0 = vsel %vm271_vm0, %v555_v60, 0.0 }
 0x10a   :  { %610 = vadd.xlane.f32.xlu2 %v609_v0  ;;  %449 = vadd.xlane.f32.xlu1 %v448_v61  ;;  %v4770_v61 = vld [vmem:[#allocation8 + $0x8] sm:$0xff]  ;;  %v5522_v0 = vadd.f32 %v5419_v35, %v5344_v47 }
 0x10b   :  { %1369 = vmatpush.bf16.msrb.mxu1 %v4770_v61 }
 0x10c   :  { %v564_v54 = vmul.f32 %v5522_v0, %v5522_v0 }
 0x110   :  { %446 = vadd.xlane.f32.xlu0 %v445_v5  ;;  %v5526_v5 = vpop.f32.mrf.mxu3 }
 0x112   :  { %613 = vadd.xlane.f32.xlu2 %v612_v10  ;;  %452 = vadd.xlane.f32.xlu1 %v451_v11  ;;  %v4769_v11 = vld [vmem:[#allocation8] sm:$0xff] }
 0x113   :  { %1370 = vmatpush.bf16.msrb.mxu1 %v4769_v11 }
 0x118   :  { %616 = vadd.xlane.f32.xlu0 %v615_v19  ;;  %v469_v19 = vsel %vm271_vm0, %v5522_v0, 0.0 }
 0x11a   :  { %455 = vadd.xlane.f32.xlu2 %v454_v21  ;;  %622 = vadd.xlane.f32.xlu1 %v621_v22  ;;  %v563_v22 = vmul.f32 %v5502_v40, %v5502_v40 }
 0x11c   :  { %v633_v34 = vsel %vm271_vm0, %v563_v22, 0.0 }
 0x120   :  { %619 = vadd.xlane.f32.xlu0 %v618_v28 }
 0x122   :  { %458 = vadd.xlane.f32.xlu2 %v457_v32  ;;  %625 = vadd.xlane.f32.xlu1 %v624_v33 }
 0x123   :  { %v411_v39 = vpop.xlane.xlu0 %410 }
 0x124   :  { %v5507_v42 = vmul.f32 %v5497_v36, %v411_v39  ;;  %v5553_v39 = vpop.f32.mrf.mxu3 }
 0x125   :  { %v578_v45 = vpop.xlane.xlu1 %577 }
 0x126   :  { %v704_v49 = vmul.f32 %v5507_v42, %v5507_v42  ;;  %v672_v51 = vmul.f32 %v578_v45, %v5497_v36 }
 0x128   :  { %v736_v60 = vsub.f32 %v672_v51, %v704_v49  ;;  %461 = vadd.xlane.f32.xlu0 %v460_v48  ;;  %v472_v51 = vsel %vm271_vm0, %v5537_v15, 0.0 }
 0x12a   :  { %v768_v62 = vmax.f32 %v736_v60, 0.0  ;;  %628 = vadd.xlane.f32.xlu2 %v627_v56  ;;  %467 = vadd.xlane.f32.xlu1 %v466_v59  ;;  %v639_v56 = vsel %vm271_vm0, %v565_v43, 0.0 }
 0x12b   :  { %v414_v2 = vpop.xlane.xlu0 %413 }
 0x12c   :  { %v832_v7 = vadd.f32 1e-05, %v768_v62  ;;  %v5529_v10 = vmul.f32 %v5497_v36, %v414_v2  ;;  %v5588_v43 = vpop.f32.mrf.mxu3 }
 0x12d   :  { %v581_v12 = vpop.xlane.xlu1 %580 }
 0x12e   :  { %4810 = vrsqrt.f32 %v832_v7  ;;  %v705_v35 = vmul.f32 %v5529_v10, %v5529_v10  ;;  %v673_v16 = vmul.f32 %v581_v12, %v5497_v36  ;;  %vm870_vm3 = vweird.f32 %v832_v7 }
 0x130   :  { %464 = vadd.xlane.f32.xlu0 %v463_v13  ;;  %v737_v21 = vsub.f32 %v673_v16, %v705_v35  ;;  %v5577_v35 = vadd.f32 %v5465_v6, %v5344_v47  ;;  %v642_v6 = vsel %vm271_vm0, %v566_v3, 0.0 }
 0x132   :  { %631 = vadd.xlane.f32.xlu2 %v630_v17  ;;  %470 = vadd.xlane.f32.xlu1 %v469_v19  ;;  %v769_v24 = vmax.f32 %v737_v21, 0.0  ;;  %v636_v17 = vsel %vm271_vm0, %v564_v54, 0.0  ;;  %v478_v54 = vsel %vm271_vm0, %v5577_v35, 0.0 }
 0x133   :  { %v417_v25 = vpop.xlane.xlu2 %416 }
 0x134   :  { %v4811_v27 = vpop.eup %4810  ;;  %v5548_v28 = vmul.f32 %v5497_v36, %v417_v25  ;;  %v5550_v32 = vadd.f32 1e-05, %v769_v24  ;;  %v475_v25 = vsel %vm271_vm0, %v5557_v41, 0.0 }
 0x135   :  { %v865_v29 = vmul.f32 %v4811_v27, %v832_v7  ;;  %v584_v33 = vpop.xlane.xlu0 %583  ;;  %vm871_vm2 = vweird.f32 %v4811_v27  ;;  %v800_v7 = vsub.f32 %v5348_v50, %v5507_v42 }
 0x136   :  { %v706_v45 = vmul.f32 %v5548_v28, %v5548_v28  ;;  %v674_v48 = vmul.f32 %v584_v33, %v5497_v36  ;;  %4812 = vrsqrt.f32 %v5550_v32  ;;  %vm5590_vm4 = vmor %vm870_vm3, %vm871_vm2  ;;  %vm880_vm6 = vweird.f32 %v5550_v32 }
 0x137   :  { %v866_v49 = vmul.f32 %v4811_v27, %v865_v29 }
 0x138   :  { %v738_v59 = vsub.f32 %v674_v48, %v706_v45  ;;  %634 = vadd.xlane.f32.xlu0 %v633_v34  ;;  %v567_v45 = vmul.f32 %v5577_v35, %v5577_v35 }
 0x139   :  { %v867_v60 = vmul.f32 0.5, %v866_v49 }
 0x13a   :  { %v770_v61 = vmax.f32 %v738_v59, 0.0  ;;  %473 = vadd.xlane.f32.xlu2 %v472_v51  ;;  %640 = vadd.xlane.f32.xlu1 %v639_v56  ;;  %v5599_v51 = vperm.slane %v5341_v44, 1  ;;  %v5605_v56 = vadd.f32 %v5499_v37, %v5344_v47 }
 0x13b   :  { %v868_v62 = vsub.f32 1.5, %v867_v60  ;;  %v420_v2 = vpop.xlane.xlu2 %419 }
 0x13c   :  { %v5570_v11 = vadd.f32 1e-05, %v770_v61  ;;  %v5573_v12 = vmul.f32 %v5497_v36, %v420_v2  ;;  %v4813_v13 = vpop.eup %4812 }
 0x13d   :  { %v587_v16 = vpop.xlane.xlu1 %586  ;;  %v869_v19 = vmul.f32 %v4811_v27, %v868_v62  ;;  %v875_v21 = vmul.f32 %v4813_v13, %v5550_v32  ;;  %vm881_vm5 = vweird.f32 %v4813_v13  ;;  %v5613_v62 = vadd.f32 %v5484_v23, %v5344_v47 }
 0x13e   :  { %4814 = vrsqrt.f32 %v5570_v11  ;;  %v707_v22 = vmul.f32 %v5573_v12, %v5573_v12  ;;  %v675_v24 = vmul.f32 %v587_v16, %v5497_v36  ;;  %v645_v16 = vsel %vm271_vm0, %v567_v45, 0.0  ;;  %vm882_vm7 = vmor %vm880_vm6, %vm881_vm5  ;;  %v5643_v45 = vpop.f32.mrf.mxu3 }
 0x13f   :  { %v876_v29 = vmul.f32 %v4813_v13, %v875_v21  ;;  %v873_v48 = vsel %vm5590_vm4, %v4811_v27, %v869_v19  ;;  %v801_v21 = vsub.f32 %v5356_v55, %v5529_v10  ;;  %v5634_v32 = vperm.slane %v5341_v44, 2 }
 0x140   :  { %637 = vadd.xlane.f32.xlu0 %v636_v17  ;;  %v739_v34 = vsub.f32 %v675_v24, %v707_v22  ;;  %v1184_v50 = vmul.f32 %v873_v48, %v800_v7  ;;  %v484_v24 = vsel %vm271_vm0, %v5605_v56, 0.0  ;;  %v5640_v55 = vadd.f32 %v5526_v5, %v5344_v47 }
 0x141   :  { %v877_v49 = vmul.f32 0.5, %v876_v29  ;;  %v568_v29 = vmul.f32 %v5613_v62, %v5613_v62  ;;  %v481_v5 = vsel %vm271_vm0, %v5613_v62, 0.0  ;;  %vm890_vm9 = vweird.f32 %v5570_v11 }
 0x142   :  { %476 = vadd.xlane.f32.xlu2 %v475_v25  ;;  %643 = vadd.xlane.f32.xlu1 %v642_v6  ;;  %v771_v59 = vmax.f32 %v739_v34, 0.0  ;;  %v1217_v10 = vmul.f32 %v5599_v51, %v1184_v50 }
 0x143   :  { %v423_v60 = vpop.xlane.xlu2 %422  ;;  %v878_v27 = vsub.f32 1.5, %v877_v49 }
 0x144   :  { %v5609_v61 = vpop.eup %4814  ;;  %v5616_v2 = vmul.f32 %v5497_v36, %v423_v60  ;;  %v5620_v42 = vadd.f32 1e-05, %v771_v59  ;;  %v648_v60 = vsel %vm271_vm0, %v568_v29, 0.0 }
 0x145   :  { %v885_v37 = vmul.f32 %v5609_v61, %v5570_v11  ;;  %v590_v3 = vpop.xlane.xlu1 %589  ;;  %v879_v17 = vmul.f32 %v4813_v13, %v878_v27  ;;  %v5656_v27 = vadd.f32 %v5553_v39, %v5344_v47  ;;  %vm891_vm8 = vweird.f32 %v5609_v61 }
 0x146   :  { %v708_v19 = vmul.f32 %v5616_v2, %v5616_v2  ;;  %v676_v23 = vmul.f32 %v590_v3, %v5497_v36  ;;  %4816 = vrsqrt.f32 %v5620_v42  ;;  %vm5672_vm10 = vmor %vm890_vm9, %vm891_vm8  ;;  %vm900_vm12 = vweird.f32 %v5620_v42 }
 0x147   :  { %v886_v22 = vmul.f32 %v5609_v61, %v885_v37  ;;  %v883_v25 = vsel %vm882_vm7, %v4813_v13, %v879_v17  ;;  %v1250_v37 = vadd.f32 %v5634_v32, %v1217_v10 }
 0x148   :  { %v740_v6 = vsub.f32 %v676_v23, %v708_v19  ;;  %479 = vadd.xlane.f32.xlu0 %v478_v54  ;;  %v1185_v33 = vmul.f32 %v883_v25, %v801_v21 }
 0x149   :  { %v887_v34 = vmul.f32 0.5, %v886_v22  ;;  %v569_v22 = vmul.f32 %v5605_v56, %v5605_v56 }
 0x14a   :  { %v772_v48 = vmax.f32 %v740_v6, 0.0  ;;  %646 = vadd.xlane.f32.xlu2 %v645_v16  ;;  %485 = vadd.xlane.f32.xlu1 %v484_v24  ;;  %v1218_v44 = vmul.f32 %v5599_v51, %v1185_v33  ;;  %v487_v16 = vsel %vm271_vm0, %v5640_v55, 0.0 }
 0x14b   :  { %v888_v13 = vsub.f32 1.5, %v887_v34  ;;  %v426_v49 = vpop.xlane.xlu0 %425  ;;  %v802_v34 = vsub.f32 %v5365_v63, %v5548_v28 }
 0x14c   :  { %v5646_v7 = vadd.f32 1e-05, %v772_v48  ;;  %v5649_v59 = vmul.f32 %v5497_v36, %v426_v49  ;;  %v4817_v54 = vpop.eup %4816  ;;  %v1251_v3 = vadd.f32 %v5634_v32, %v1218_v44  ;;  %v651_v48 = vsel %vm271_vm0, %v569_v22, 0.0  ;;  %v5685_v49 = vpop.f32.mrf.mxu3 }
 0x14d   :  { %v593_v50 = vpop.xlane.xlu2 %592  ;;  %v889_v17 = vmul.f32 %v5609_v61, %v888_v13  ;;  %v895_v19 = vmul.f32 %v4817_v54, %v5620_v42  ;;  %v571_v13 = vmul.f32 %v5656_v27, %v5656_v27  ;;  %vm901_vm11 = vweird.f32 %v4817_v54 }
 0x14e   :  { %4818 = vrsqrt.f32 %v5646_v7  ;;  %v709_v39 = vmul.f32 %v5649_v59, %v5649_v59  ;;  %v677_v23 = vmul.f32 %v593_v50, %v5497_v36  ;;  %v1282_v21 = vpack.c.bf16 %v1251_v3, %v1250_v37  ;;  %vm902_vm13 = vmor %vm900_vm12, %vm901_vm11 }
 0x14f   :  { %v896_v24 = vmul.f32 %v4817_v54, %v895_v19  ;;  %v893_v33 = vsel %vm5672_vm10, %v5609_v61, %v889_v17  ;;  %v490_v61 = vsel %vm271_vm0, %v5656_v27, 0.0  ;;  %v5700_v50 = vadd.f32 %v5588_v43, %v5344_v47 }
 0x150   :  { %482 = vadd.xlane.f32.xlu0 %v481_v5  ;;  %v741_v6 = vsub.f32 %v677_v23, %v709_v39  ;;  %4475 = vmatmul.msk.bf16.vlgmr.msrb.gmra.mxu1 %vm271_vm0, %v1282_v21  ;;  %v1186_v3 = vmul.f32 %v893_v33, %v802_v34  ;;  %v803_v39 = vsub.f32 %v5373_v4, %v5573_v12  ;;  %v657_v43 = vsel %vm271_vm0, %v571_v13, 0.0 }
 0x151   :  { %v897_v29 = vmul.f32 0.5, %v896_v24  ;;  %v570_v42 = vmul.f32 %v5640_v55, %v5640_v55  ;;  %v572_v4 = vmul.f32 %v5700_v50, %v5700_v50  ;;  %vm910_vm15 = vweird.f32 %v5646_v7 }
 0x152   :  { %649 = vadd.xlane.f32.xlu2 %v648_v60  ;;  %488 = vadd.xlane.f32.xlu1 %v487_v16  ;;  %v773_v11 = vmax.f32 %v741_v6, 0.0  ;;  %v1219_v6 = vmul.f32 %v5599_v51, %v1186_v3 }
 0x153   :  { %v429_v10 = vpop.xlane.xlu0 %428  ;;  %v898_v5 = vsub.f32 1.5, %v897_v29 }
 0x154   :  { %v5687_v44 = vpop.eup %4818  ;;  %v5690_v60 = vmul.f32 %v5497_v36, %v429_v10  ;;  %v5696_v28 = vadd.f32 1e-05, %v773_v11  ;;  %v406_v3 = vpop.f32.mrf.mxu3 }
 0x155   :  { %v905_v63 = vmul.f32 %v5687_v44, %v5646_v7  ;;  %v596_v37 = vpop.xlane.xlu2 %595  ;;  %v899_v16 = vmul.f32 %v4817_v54, %v898_v5  ;;  %v1252_v5 = vadd.f32 %v5634_v32, %v1219_v6  ;;  %vm911_vm14 = vweird.f32 %v5687_v44 }
 0x156   :  { %v710_v17 = vmul.f32 %v5690_v60, %v5690_v60  ;;  %v678_v19 = vmul.f32 %v596_v37, %v5497_v36  ;;  %4820 = vrsqrt.f32 %v5696_v28  ;;  %v660_v37 = vsel %vm271_vm0, %v572_v4, 0.0  ;;  %vm5743_vm1 = vmor %vm910_vm15, %vm911_vm14 }
 0x157   :  { %v906_v23 = vmul.f32 %v5687_v44, %v905_v63  ;;  %v903_v22 = vsel %vm902_vm13, %v4817_v54, %v899_v16  ;;  %v654_v54 = vsel %vm271_vm0, %v570_v42, 0.0  ;;  %v5741_v42 = vadd.f32 %v406_v3, %v5344_v47 }
 0x158   :  { %v742_v21 = vsub.f32 %v678_v19, %v710_v17  ;;  %652 = vadd.xlane.f32.xlu0 %v651_v48  ;;  %v1187_v25 = vmul.f32 %v903_v22, %v803_v39  ;;  %v5734_v19 = vadd.f32 %v5643_v45, %v5344_v47  ;;  %v804_v7 = vsub.f32 %v5381_v9, %v5616_v2 }
 0x159   :  { %v907_v24 = vmul.f32 0.5, %v906_v23  ;;  %vm920_vm3 = vweird.f32 %v5696_v28 }
 0x15a   :  { %v774_v12 = vmax.f32 %v742_v21, 0.0  ;;  %491 = vadd.xlane.f32.xlu2 %v490_v61  ;;  %658 = vadd.xlane.f32.xlu1 %v657_v43  ;;  %v1220_v34 = vmul.f32 %v5599_v51, %v1187_v25  ;;  %v493_v61 = vsel %vm271_vm0, %v5700_v50, 0.0 }
 0x15b   :  { %v908_v29 = vsub.f32 1.5, %v907_v24  ;;  %v432_v33 = vpop.xlane.xlu1 %431 }
 0x15c   :  { %v5717_v11 = vadd.f32 1e-05, %v774_v12  ;;  %v5720_v10 = vmul.f32 %v5497_v36, %v432_v33  ;;  %v4821_v48 = vpop.eup %4820  ;;  %v1253_v63 = vadd.f32 %v5634_v32, %v1220_v34  ;;  %v496_v12 = vsel %vm271_vm0, %v5734_v19, 0.0 }
 0x15d   :  { %v599_v13 = vpop.xlane.xlu0 %598  ;;  %v909_v16 = vmul.f32 %v5687_v44, %v908_v29  ;;  %v915_v17 = vmul.f32 %v4821_v48, %v5696_v28  ;;  %v573_v29 = vmul.f32 %v5734_v19, %v5734_v19  ;;  %vm921_vm2 = vweird.f32 %v4821_v48 }
 0x15e   :  { %4822 = vrsqrt.f32 %v5717_v11  ;;  %v711_v39 = vmul.f32 %v5720_v10, %v5720_v10  ;;  %v679_v23 = vmul.f32 %v599_v13, %v5497_v36  ;;  %v1283_v43 = vpack.c.bf16 %v1253_v63, %v1252_v5  ;;  %vm922_vm4 = vmor %vm920_vm3, %vm921_vm2 }
 0x15f   :  { %v916_v21 = vmul.f32 %v4821_v48, %v915_v17  ;;  %v913_v25 = vsel %vm5743_vm1, %v5687_v44, %v909_v16  ;;  %v502_v44 = vsel %vm271_vm0, %v5741_v42, 0.0  ;;  %v5770_v13 = vadd.f32 %v5685_v49, %v5344_v47 }
 0x160   :  { %655 = vadd.xlane.f32.xlu0 %v654_v54  ;;  %v743_v24 = vsub.f32 %v679_v23, %v711_v39  ;;  %4476 = vmatmul.msk.bf16.gmra.mxu1 %vm271_vm0, %v1283_v43  ;;  %v1188_v63 = vmul.f32 %v913_v25, %v804_v7  ;;  %v805_v16 = vsub.f32 %v5389_v14, %v5649_v59  ;;  %v663_v47 = vsel %vm271_vm0, %v573_v29, 0.0 }
 0x161   :  { %v917_v45 = vmul.f32 0.5, %v916_v21  ;;  %v574_v14 = vmul.f32 %v5770_v13, %v5770_v13  ;;  %vm930_vm6 = vweird.f32 %v5717_v11 }
 0x162   :  { %494 = vadd.xlane.f32.xlu2 %v493_v61  ;;  %661 = vadd.xlane.f32.xlu1 %v660_v37  ;;  %v775_v6 = vmax.f32 %v743_v24, 0.0  ;;  %v1221_v43 = vmul.f32 %v5599_v51, %v1188_v63 }
 0x163   :  { %v435_v4 = vpop.xlane.xlu1 %434  ;;  %v918_v34 = vsub.f32 1.5, %v917_v45 }
 0x164   :  { %v5757_v33 = vpop.eup %4822  ;;  %v5760_v54 = vmul.f32 %v5497_v36, %v435_v4  ;;  %v5766_v2 = vadd.f32 1e-05, %v775_v6  ;;  %v499_v6 = vsel %vm271_vm0, %v5770_v13, 0.0  ;;  %v1254_v4 = vadd.f32 %v5634_v32, %v1221_v43 }
 0x165   :  { %v925_v9 = vmul.f32 %v5757_v33, %v5717_v11  ;;  %v602_v5 = vpop.xlane.xlu0 %601  ;;  %v919_v61 = vmul.f32 %v4821_v48, %v918_v34  ;;  %vm931_vm5 = vweird.f32 %v5757_v33  ;;  %v666_v34 = vsel %vm271_vm0, %v574_v14, 0.0 }
 0x166   :  { %v712_v37 = vmul.f32 %v5760_v54, %v5760_v54  ;;  %v680_v3 = vmul.f32 %v602_v5, %v5497_v36  ;;  %4824 = vrsqrt.f32 %v5766_v2  ;;  %vm5806_vm7 = vmor %vm930_vm6, %vm931_vm5  ;;  %v806_v11 = vsub.f32 %v5397_v20, %v5690_v60 }
 0x167   :  { %v926_v17 = vmul.f32 %v5757_v33, %v925_v9  ;;  %v923_v39 = vsel %vm922_vm4, %v4821_v48, %v919_v61  ;;  %vm940_vm9 = vweird.f32 %v5766_v2  ;;  %v807_v60 = vsub.f32 %v5405_v26, %v5720_v10 }
 0x168   :  { %v744_v49 = vsub.f32 %v680_v3, %v712_v37  ;;  %497 = vadd.xlane.f32.xlu0 %v496_v12  ;;  %v1189_v28 = vmul.f32 %v923_v39, %v805_v16  ;;  %v575_v3 = vmul.f32 %v5741_v42, %v5741_v42 }
 0x169   :  { %v927_v23 = vmul.f32 0.5, %v926_v17 }
 0x16a   :  { %v776_v21 = vmax.f32 %v744_v49, 0.0  ;;  %664 = vadd.xlane.f32.xlu2 %v663_v47  ;;  %503 = vadd.xlane.f32.xlu1 %v502_v44  ;;  %v1222_v24 = vmul.f32 %v5599_v51, %v1189_v28 }
 0x16b   :  { %v928_v59 = vsub.f32 1.5, %v927_v23  ;;  %v438_v22 = vpop.xlane.xlu2 %437 }
 0x16c   :  { %v5785_v45 = vadd.f32 1e-05, %v776_v21  ;;  %v5788_v25 = vmul.f32 %v5497_v36, %v438_v22  ;;  %v4825_v48 = vpop.eup %4824  ;;  %v1255_v12 = vadd.f32 %v5634_v32, %v1222_v24  ;;  %v669_v22 = vsel %vm271_vm0, %v575_v3, 0.0 }
 0x16d   :  { %v605_v7 = vpop.xlane.xlu1 %604  ;;  %v935_v29 = vmul.f32 %v4825_v48, %v5766_v2  ;;  %v929_v44 = vmul.f32 %v5757_v33, %v928_v59  ;;  %vm941_vm8 = vweird.f32 %v4825_v48 }
 0x16e   :  { %4826 = vrsqrt.f32 %v5785_v45  ;;  %v713_v9 = vmul.f32 %v5788_v25, %v5788_v25  ;;  %v681_v5 = vmul.f32 %v605_v7, %v5497_v36  ;;  %v1284_v63 = vpack.c.bf16 %v1255_v12, %v1254_v4  ;;  %vm942_vm10 = vmor %vm940_vm9, %vm941_vm8 }
 0x16f   :  { %v936_v61 = vmul.f32 %v4825_v48, %v935_v29  ;;  %v933_v39 = vsel %vm5806_vm7, %v5757_v33, %v929_v44  ;;  %vm950_vm12 = vweird.f32 %v5785_v45 }
 0x170   :  { %500 = vadd.xlane.f32.xlu0 %v499_v6  ;;  %v745_v37 = vsub.f32 %v681_v5, %v713_v9  ;;  %4477 = vmatmul.msk.bf16.gmra.mxu1 %vm271_vm0, %v1284_v63  ;;  %v1190_v20 = vmul.f32 %v933_v39, %v806_v11 }
 0x171   :  { %v937_v17 = vmul.f32 0.5, %v936_v61 }
 0x172   :  { %667 = vadd.xlane.f32.xlu2 %v666_v34  ;;  %v777_v47 = vmax.f32 %v745_v37, 0.0  ;;  %v1223_v44 = vmul.f32 %v5599_v51, %v1190_v20 }
 0x173   :  { %v441_v49 = vpop.xlane.xlu2 %440  ;;  %v938_v28 = vsub.f32 1.5, %v937_v17 }
 0x174   :  { %v4827_v23 = vpop.eup %4826  ;;  %v5816_v43 = vmul.f32 %v5497_v36, %v441_v49  ;;  %v841_v14 = vadd.f32 1e-05, %v777_v47  ;;  %v1256_v47 = vadd.f32 %v5634_v32, %v1223_v44  ;;  %v809_v44 = vsub.f32 %v5423_v38, %v5788_v25 }
 0x175   :  { %v945_v21 = vmul.f32 %v4827_v23, %v5785_v45  ;;  %v608_v59 = vpop.xlane.xlu1 %607  ;;  %v939_v24 = vmul.f32 %v4825_v48, %v938_v28  ;;  %vm951_vm11 = vweird.f32 %v4827_v23 }
 0x176   :  { %v714_v33 = vmul.f32 %v5816_v43, %v5816_v43  ;;  %v682_v7 = vmul.f32 %v608_v59, %v5497_v36  ;;  %4828 = vrsqrt.f32 %v841_v14  ;;  %vm5840_vm13 = vmor %vm950_vm12, %vm951_vm11  ;;  %vm960_vm15 = vweird.f32 %v841_v14 }
 0x177   :  { %v946_v6 = vmul.f32 %v4827_v23, %v945_v21  ;;  %v943_v4 = vsel %vm942_vm10, %v4825_v48, %v939_v24 }
 0x178   :  { %v746_v2 = vsub.f32 %v682_v7, %v714_v33  ;;  %670 = vadd.xlane.f32.xlu0 %v669_v22  ;;  %v1191_v29 = vmul.f32 %v943_v4, %v807_v60  ;;  %v808_v33 = vsub.f32 %v5413_v31, %v5760_v54 }
 0x179   :  { %v947_v12 = vmul.f32 0.5, %v946_v6 }
 0x17a   :  { %v778_v34 = vmax.f32 %v746_v2, 0.0  ;;  %v1224_v63 = vmul.f32 %v5599_v51, %v1191_v29 }
 0x17b   :  { %v948_v9 = vsub.f32 1.5, %v947_v12  ;;  %v444_v5 = vpop.xlane.xlu0 %443 }
 0x17c   :  { %v5828_v61 = vadd.f32 1e-05, %v778_v34  ;;  %v5831_v37 = vmul.f32 %v5497_v36, %v444_v5  ;;  %v4829_v26 = vpop.eup %4828  ;;  %v1257_v48 = vadd.f32 %v5634_v32, %v1224_v63 }
 0x17d   :  { %v611_v10 = vpop.xlane.xlu2 %610  ;;  %v450_v3 = vpop.xlane.xlu1 %449  ;;  %v949_v16 = vmul.f32 %v4827_v23, %v948_v9  ;;  %v955_v17 = vmul.f32 %v4829_v26, %v841_v14  ;;  %vm961_vm14 = vweird.f32 %v4829_v26 }
 0x17e   :  { %4830 = vrsqrt.f32 %v5828_v61  ;;  %v715_v49 = vmul.f32 %v5831_v37, %v5831_v37  ;;  %v683_v39 = vmul.f32 %v611_v10, %v5497_v36  ;;  %v1285_v28 = vpack.c.bf16 %v1257_v48, %v1256_v47  ;;  %vm962_vm1 = vmor %vm960_vm15, %vm961_vm14 }
 0x17f   :  { %v956_v11 = vmul.f32 %v4829_v26, %v955_v17  ;;  %v953_v24 = vsel %vm5840_vm13, %v4827_v23, %v949_v16  ;;  %v5867_v17 = vmul.f32 %v5497_v36, %v450_v3  ;;  %vm970_vm3 = vweird.f32 %v5828_v61 }
 0x180   :  { %v747_v59 = vsub.f32 %v683_v39, %v715_v49  ;;  %4478 = vmatmul.msk.bf16.gmra.mxu1 %vm271_vm0, %v1285_v28  ;;  %v1192_v23 = vmul.f32 %v953_v24, %v808_v33 }
 0x181   :  { %v957_v22 = vmul.f32 0.5, %v956_v11 }
 0x182   :  { %v779_v7 = vmax.f32 %v747_v59, 0.0  ;;  %v1225_v16 = vmul.f32 %v5599_v51, %v1192_v23 }
 0x183   :  { %v447_v20 = vpop.xlane.xlu0 %446  ;;  %v958_v45 = vsub.f32 1.5, %v957_v22 }
 0x184   :  { %v5849_v60 = vpop.eup %4830  ;;  %v5852_v6 = vmul.f32 %v5497_v36, %v447_v20  ;;  %v5856_v4 = vadd.f32 1e-05, %v779_v7  ;;  %v1258_v21 = vadd.f32 %v5634_v32, %v1225_v16 }
 0x185   :  { %v965_v2 = vmul.f32 %v5849_v60, %v5828_v61  ;;  %v614_v12 = vpop.xlane.xlu2 %613  ;;  %v453_v29 = vpop.xlane.xlu1 %452  ;;  %v959_v34 = vmul.f32 %v4829_v26, %v958_v45  ;;  %vm971_vm2 = vweird.f32 %v5849_v60 }
 0x186   :  { %v716_v31 = vmul.f32 %v5852_v6, %v5852_v6  ;;  %v684_v54 = vmul.f32 %v614_v12, %v5497_v36  ;;  %4832 = vrsqrt.f32 %v5856_v4  ;;  %vm5900_vm4 = vmor %vm970_vm3, %vm971_vm2  ;;  %vm980_vm6 = vweird.f32 %v5856_v4 }
 0x187   :  { %v966_v9 = vmul.f32 %v5849_v60, %v965_v2  ;;  %v963_v63 = vsel %vm962_vm1, %v4829_v26, %v959_v34  ;;  %v717_v26 = vmul.f32 %v5867_v17, %v5867_v17  ;;  %v5884_v2 = vmul.f32 %v5497_v36, %v453_v29 }
 0x188   :  { %v748_v5 = vsub.f32 %v684_v54, %v716_v31  ;;  %v1193_v48 = vmul.f32 %v963_v63, %v809_v44  ;;  %v810_v63 = vsub.f32 %v5433_v46, %v5816_v43 }
 0x189   :  { %v967_v10 = vmul.f32 0.5, %v966_v9  ;;  %v718_v54 = vmul.f32 %v5884_v2, %v5884_v2 }
 0x18a   :  { %v780_v14 = vmax.f32 %v748_v5, 0.0  ;;  %v1226_v49 = vmul.f32 %v5599_v51, %v1193_v48 }
 0x18b   :  { %v617_v47 = vpop.xlane.xlu0 %616  ;;  %v968_v11 = vsub.f32 1.5, %v967_v10 }
 0x18c   :  { %v5870_v39 = vadd.f32 1e-05, %v780_v14  ;;  %v685_v38 = vmul.f32 %v617_v47, %v5497_v36  ;;  %v4833_v25 = vpop.eup %4832  ;;  %v1259_v59 = vadd.f32 %v5634_v32, %v1226_v49 }
 0x18d   :  { %v456_v28 = vpop.xlane.xlu2 %455  ;;  %v975_v3 = vmul.f32 %v4833_v25, %v5856_v4  ;;  %v623_v22 = vpop.xlane.xlu1 %622  ;;  %v969_v12 = vmul.f32 %v5849_v60, %v968_v11  ;;  %vm981_vm5 = vweird.f32 %v4833_v25 }
 0x18e   :  { %4834 = vrsqrt.f32 %v5870_v39  ;;  %v749_v24 = vsub.f32 %v685_v38, %v717_v26  ;;  %v5880_v33 = vmul.f32 %v5497_v36, %v456_v28  ;;  %v687_v7 = vmul.f32 %v623_v22, %v5497_v36  ;;  %vm982_vm7 = vmor %vm980_vm6, %vm981_vm5 }
 0x18f   :  { %v1286_v20 = vpack.c.bf16 %v1259_v59, %v1258_v21  ;;  %v976_v45 = vmul.f32 %v4833_v25, %v975_v3  ;;  %v973_v47 = vsel %vm5900_vm4, %v5849_v60, %v969_v12  ;;  %v811_v26 = vsub.f32 %v5446_v57, %v5831_v37 }
 0x190   :  { %v781_v23 = vmax.f32 %v749_v24, 0.0  ;;  %v719_v34 = vmul.f32 %v5880_v33, %v5880_v33  ;;  %v1194_v3 = vmul.f32 %v973_v47, %v810_v63  ;;  %vm990_vm10 = vweird.f32 %v5870_v39 }
 0x191   :  { %v977_v31 = vmul.f32 0.5, %v976_v45  ;;  %4479 = vmatmul.msk.bf16.gmra.mxu1 %vm271_vm0, %v1286_v20 }
 0x192   :  { %v5894_v44 = vadd.f32 1e-05, %v781_v23  ;;  %v751_v29 = vsub.f32 %v687_v7, %v719_v34  ;;  %v1227_v12 = vmul.f32 %v5599_v51, %v1194_v3 }
 0x193   :  { %v620_v9 = vpop.xlane.xlu0 %619  ;;  %v978_v48 = vsub.f32 1.5, %v977_v31 }
 0x194   :  { %v5896_v5 = vpop.eup %4834  ;;  %v686_v16 = vmul.f32 %v620_v9, %v5497_v36  ;;  %4836 = vrsqrt.f32 %v5894_v44  ;;  %v783_v46 = vmax.f32 %v751_v29, 0.0  ;;  %vm1000_vm12 = vweird.f32 %v5894_v44 }
 0x195   :  { %v985_v61 = vmul.f32 %v5896_v5, %v5870_v39  ;;  %v459_v14 = vpop.xlane.xlu2 %458  ;;  %v979_v49 = vmul.f32 %v4833_v25, %v978_v48  ;;  %v626_v59 = vpop.xlane.xlu1 %625  ;;  %vm991_vm8 = vweird.f32 %v5896_v5 }
 0x196   :  { %v750_v43 = vsub.f32 %v686_v16, %v718_v54  ;;  %v5912_v38 = vmul.f32 %v5497_v36, %v459_v14  ;;  %v5918_v28 = vadd.f32 1e-05, %v783_v46  ;;  %v688_v24 = vmul.f32 %v626_v59, %v5497_v36  ;;  %vm5955_vm11 = vmor %vm990_vm10, %vm991_vm8 }
 0x197   :  { %v986_v11 = vmul.f32 %v5896_v5, %v985_v61  ;;  %v983_v7 = vsel %vm982_vm7, %v4833_v25, %v979_v49  ;;  %v1260_v61 = vadd.f32 %v5634_v32, %v1227_v12 }
 0x198   :  { %v782_v21 = vmax.f32 %v750_v43, 0.0  ;;  %v720_v22 = vmul.f32 %v5912_v38, %v5912_v38  ;;  %4838 = vrsqrt.f32 %v5918_v28  ;;  %v1195_v57 = vmul.f32 %v983_v7, %v811_v26 }
 0x199   :  { %v987_v60 = vmul.f32 0.5, %v986_v11  ;;  %vm1020_vm15 = vweird.f32 %v5918_v28 }
 0x19a   :  { %v5924_v4 = vadd.f32 1e-05, %v782_v21  ;;  %v4837_v20 = vpop.eup %4836  ;;  %v752_v34 = vsub.f32 %v688_v24, %v720_v22  ;;  %v1228_v25 = vmul.f32 %v5599_v51, %v1195_v57 }
 0x19b   :  { %v462_v45 = vpop.xlane.xlu0 %461  ;;  %v995_v37 = vmul.f32 %v4837_v20, %v5894_v44  ;;  %v988_v23 = vsub.f32 1.5, %v987_v60  ;;  %vm1001_vm9 = vweird.f32 %v4837_v20  ;;  %v813_v44 = vsub.f32 %v5441_v53, %v5867_v17 }
 0x19c   :  { %4840 = vrsqrt.f32 %v5924_v4  ;;  %v5930_v31 = vmul.f32 %v5497_v36, %v462_v45  ;;  %v1261_v10 = vadd.f32 %v5634_v32, %v1228_v25  ;;  %v784_v47 = vmax.f32 %v752_v34, 0.0  ;;  %vm5963_vm13 = vmor %vm1000_vm12, %vm1001_vm9 }
 0x19d   :  { %v629_v54 = vpop.xlane.xlu2 %628  ;;  %v996_v29 = vmul.f32 %v4837_v20, %v995_v37  ;;  %v989_v14 = vmul.f32 %v5896_v5, %v988_v23  ;;  %v468_v59 = vpop.xlane.xlu1 %467  ;;  %vm1010_vm2 = vweird.f32 %v5924_v4 }
 0x19e   :  { %v689_v9 = vmul.f32 %v629_v54, %v5497_v36  ;;  %v721_v63 = vmul.f32 %v5930_v31, %v5930_v31  ;;  %v5937_v48 = vpop.eup %4838  ;;  %v1287_v26 = vpack.c.bf16 %v1261_v10, %v1260_v61  ;;  %v5961_v57 = vadd.f32 1e-05, %v784_v47 }
 0x19f   :  { %v997_v16 = vmul.f32 0.5, %v996_v29  ;;  %v1015_v43 = vmul.f32 %v5937_v48, %v5918_v28  ;;  %v993_v34 = vsel %vm5955_vm11, %v5896_v5, %v989_v14  ;;  %v812_v54 = vsub.f32 %v5449_v58, %v5852_v6 }
 0x1a0   :  { %v753_v11 = vsub.f32 %v689_v9, %v721_v63  ;;  %v5978_v25 = vmul.f32 %v5497_v36, %v468_v59  ;;  %vm1021_vm1 = vweird.f32 %v5937_v48  ;;  %vm1030_vm5 = vweird.f32 %v5961_v57 }
 0x1a1   :  { %v998_v46 = vsub.f32 1.5, %v997_v16  ;;  %4480 = vmatmul.msk.bf16.gmra.mxu1 %vm271_vm0, %v1287_v26  ;;  %v1016_v12 = vmul.f32 %v5937_v48, %v1015_v43  ;;  %v1196_v53 = vmul.f32 %v993_v34, %v812_v54  ;;  %vm6027_vm4 = vmor %vm1020_vm15, %vm1021_vm1 }
 0x1a2   :  { %v5942_v49 = vpop.eup %4840  ;;  %v785_v22 = vmax.f32 %v753_v11, 0.0  ;;  %v723_v58 = vmul.f32 %v5978_v25, %v5978_v25 }
 0x1a3   :  { %v1005_v21 = vmul.f32 %v5942_v49, %v5924_v4  ;;  %v465_v3 = vpop.xlane.xlu0 %464  ;;  %v999_v60 = vmul.f32 %v4837_v20, %v998_v46  ;;  %v1017_v17 = vmul.f32 0.5, %v1016_v12  ;;  %v1229_v47 = vmul.f32 %v5599_v51, %v1196_v53 }
 0x1a4   :  { %v5951_v24 = vmul.f32 %v5497_v36, %v465_v3  ;;  %v5968_v23 = vadd.f32 1e-05, %v785_v22  ;;  %vm1011_vm14 = vweird.f32 %v5942_v49  ;;  %v814_v53 = vsub.f32 %v5459_v1, %v5884_v2 }
 0x1a5   :  { %v1006_v45 = vmul.f32 %v5942_v49, %v1005_v21  ;;  %v632_v39 = vpop.xlane.xlu2 %631  ;;  %v1003_v29 = vsel %vm5963_vm13, %v4837_v20, %v999_v60  ;;  %v471_v14 = vpop.xlane.xlu1 %470  ;;  %v1018_v11 = vsub.f32 1.5, %v1017_v17  ;;  %vm6008_vm3 = vmor %vm1010_vm2, %vm1011_vm14 }
 0x1a6   :  { %4842 = vrsqrt.f32 %v5968_v23  ;;  %v722_v63 = vmul.f32 %v5951_v24, %v5951_v24  ;;  %v690_v5 = vmul.f32 %v632_v39, %v5497_v36  ;;  %v1197_v6 = vmul.f32 %v1003_v29, %v813_v44 }
 0x1a7   :  { %v1007_v9 = vmul.f32 0.5, %v1006_v45  ;;  %4844 = vrsqrt.f32 %v5961_v57  ;;  %v1262_v45 = vadd.f32 %v5634_v32, %v1229_v47  ;;  %v1019_v37 = vmul.f32 %v5937_v48, %v1018_v11 }
 0x1a8   :  { %v754_v61 = vsub.f32 %v690_v5, %v722_v63  ;;  %v1230_v46 = vmul.f32 %v5599_v51, %v1197_v6  ;;  %v815_v6 = vsub.f32 %v5468_v8, %v5880_v33  ;;  %vm1040_vm7 = vweird.f32 %v5968_v23 }
 0x1a9   :  { %v1008_v16 = vsub.f32 1.5, %v1007_v9  ;;  %v1023_v1 = vsel %vm6027_vm4, %v5937_v48, %v1019_v37 }
 0x1aa   :  { %v786_v22 = vmax.f32 %v754_v61, 0.0  ;;  %v1263_v39 = vadd.f32 %v5634_v32, %v1230_v46 }
 0x1ab   :  { %v635_v10 = vpop.xlane.xlu0 %634  ;;  %v1009_v3 = vmul.f32 %v5942_v49, %v1008_v16 }
 0x1ac   :  { %v691_v20 = vmul.f32 %v635_v10, %v5497_v36  ;;  %v5992_v43 = vpop.eup %4842  ;;  %v1288_v54 = vpack.c.bf16 %v1263_v39, %v1262_v45  ;;  %v6015_v9 = vadd.f32 1e-05, %v786_v22 }
 0x1ad   :  { %v5994_v21 = vpop.eup %4844  ;;  %v474_v59 = vpop.xlane.xlu2 %473  ;;  %v1035_v60 = vmul.f32 %v5992_v43, %v5968_v23  ;;  %v1013_v4 = vsel %vm6008_vm3, %v5942_v49, %v1009_v3  ;;  %vm1041_vm8 = vweird.f32 %v5992_v43 }
 0x1ae   :  { %v755_v26 = vsub.f32 %v691_v20, %v723_v58  ;;  %v1025_v12 = vmul.f32 %v5994_v21, %v5961_v57  ;;  %v6018_v63 = vmul.f32 %v5497_v36, %v474_v59  ;;  %v6032_v58 = vmul.f32 %v5497_v36, %v471_v14  ;;  %v641_v28 = vpop.xlane.xlu1 %640  ;;  %vm1042_vm10 = vmor %vm1040_vm7, %vm1041_vm8 }
 0x1af   :  { %v1036_v29 = vmul.f32 %v5992_v43, %v1035_v60  ;;  %v1198_v16 = vmul.f32 %v1013_v4, %v814_v53  ;;  %v693_v33 = vmul.f32 %v641_v28, %v5497_v36  ;;  %v1199_v14 = vmul.f32 %v1023_v1, %v815_v6 }
 0x1b0   :  { %v787_v7 = vmax.f32 %v755_v26, 0.0  ;;  %v1026_v10 = vmul.f32 %v5994_v21, %v1025_v12  ;;  %v724_v2 = vmul.f32 %v6032_v58, %v6032_v58  ;;  %v725_v8 = vmul.f32 %v6018_v63, %v6018_v63 }
 0x1b1   :  { %4481 = vmatmul.msk.bf16.gmra.mxu1 %vm271_vm0, %v1288_v54  ;;  %v1037_v61 = vmul.f32 0.5, %v1036_v29  ;;  %v1231_v46 = vmul.f32 %v5599_v51, %v1198_v16  ;;  %v1232_v3 = vmul.f32 %v5599_v51, %v1199_v14  ;;  %vm1031_vm6 = vweird.f32 %v5994_v21 }
 0x1b2   :  { %v6012_v44 = vadd.f32 1e-05, %v787_v7  ;;  %v1027_v48 = vmul.f32 0.5, %v1026_v10  ;;  %v757_v26 = vsub.f32 %v693_v33, %v725_v8  ;;  %vm6067_vm9 = vmor %vm1030_vm5, %vm1031_vm6  ;;  %v817_v28 = vsub.f32 %v5492_v30, %v5930_v31 }
 0x1b3   :  { %v638_v5 = vpop.xlane.xlu0 %637  ;;  %v1038_v11 = vsub.f32 1.5, %v1037_v61  ;;  %v1264_v39 = vadd.f32 %v5634_v32, %v1231_v46  ;;  %v1265_v57 = vadd.f32 %v5634_v32, %v1232_v3  ;;  %v816_v8 = vsub.f32 %v5478_v18, %v5912_v38 }
 0x1b4   :  { %4846 = vrsqrt.f32 %v6012_v44  ;;  %v692_v49 = vmul.f32 %v638_v5, %v5497_v36  ;;  %v1028_v22 = vsub.f32 1.5, %v1027_v48  ;;  %v789_v34 = vmax.f32 %v757_v26, 0.0 }
 0x1b5   :  { %4848 = vrsqrt.f32 %v6015_v9  ;;  %v477_v20 = vpop.xlane.xlu2 %476  ;;  %v1039_v37 = vmul.f32 %v5992_v43, %v1038_v11  ;;  %v1289_v17 = vpack.c.bf16 %v1265_v57, %v1264_v39  ;;  %vm1050_vm11 = vweird.f32 %v6015_v9 }
 0x1b6   :  { %v756_v47 = vsub.f32 %v692_v49, %v724_v2  ;;  %v1029_v29 = vmul.f32 %v5994_v21, %v1028_v22  ;;  %v6078_v1 = vadd.f32 1e-05, %v789_v34  ;;  %v6081_v2 = vmul.f32 %v5497_v36, %v477_v20  ;;  %v644_v30 = vpop.xlane.xlu1 %643 }
 0x1b7   :  { %v1043_v6 = vsel %vm1042_vm10, %v5992_v43, %v1039_v37  ;;  %vm1060_vm13 = vweird.f32 %v6012_v44 }
 0x1b8   :  { %v788_v7 = vmax.f32 %v756_v47, 0.0  ;;  %v1033_v16 = vsel %vm6067_vm9, %v5994_v21, %v1029_v29  ;;  %v1201_v33 = vmul.f32 %v1043_v6, %v817_v28  ;;  %v726_v20 = vmul.f32 %v6081_v2, %v6081_v2 }
 0x1b9   :  { %v694_v21 = vmul.f32 %v644_v30, %v5497_v36  ;;  %v1200_v14 = vmul.f32 %v1033_v16, %v816_v8  ;;  %vm1080_vm2 = vweird.f32 %v6078_v1 }
 0x1ba   :  { %v6050_v59 = vpop.eup %4846  ;;  %v6074_v4 = vadd.f32 1e-05, %v788_v7  ;;  %v1234_v11 = vmul.f32 %v5599_v51, %v1201_v33 }
 0x1bb   :  { %v6053_v60 = vpop.eup %4848  ;;  %v480_v45 = vpop.xlane.xlu0 %479  ;;  %v1055_v12 = vmul.f32 %v6050_v59, %v6012_v44  ;;  %v758_v18 = vsub.f32 %v694_v21, %v726_v20  ;;  %v1233_v22 = vmul.f32 %v5599_v51, %v1200_v14  ;;  %vm1061_vm14 = vweird.f32 %v6050_v59 }
 0x1bc   :  { %v1045_v54 = vmul.f32 %v6053_v60, %v6015_v9  ;;  %v6072_v5 = vmul.f32 %v5497_v36, %v480_v45  ;;  %4850 = vrsqrt.f32 %v6074_v4  ;;  %vm1051_vm12 = vweird.f32 %v6053_v60  ;;  %vm6129_vm1 = vmor %vm1060_vm13, %vm1061_vm14 }
 0x1bd   :  { %v647_v53 = vpop.xlane.xlu2 %646  ;;  %v1056_v10 = vmul.f32 %v6050_v59, %v1055_v12  ;;  %4852 = vrsqrt.f32 %v6078_v1  ;;  %v1267_v37 = vadd.f32 %v5634_v32, %v1234_v11  ;;  %v1266_v9 = vadd.f32 %v5634_v32, %v1233_v22  ;;  %vm6118_vm15 = vmor %vm1050_vm11, %vm1051_vm12 }
 0x1be   :  { %v1046_v49 = vmul.f32 %v6053_v60, %v1045_v54  ;;  %v727_v43 = vmul.f32 %v6072_v5, %v6072_v5  ;;  %v695_v61 = vmul.f32 %v647_v53, %v5497_v36  ;;  %v790_v54 = vmax.f32 %v758_v18, 0.0  ;;  %v486_v53 = vpop.xlane.xlu1 %485 }
 0x1bf   :  { %v1057_v31 = vmul.f32 0.5, %v1056_v10  ;;  %v1290_v28 = vpack.c.bf16 %v1267_v37, %v1266_v9  ;;  %vm1070_vm3 = vweird.f32 %v6074_v4 }
 0x1c0   :  { %v1047_v48 = vmul.f32 0.5, %v1046_v49  ;;  %v759_v47 = vsub.f32 %v695_v61, %v727_v43  ;;  %v819_v49 = vsub.f32 %v5502_v40, %v5978_v25  ;;  %v6139_v61 = vadd.f32 1e-05, %v790_v54 }
 0x1c1   :  { %4482 = vmatmul.msk.bf16.gmra.mxu1 %vm271_vm0, %v1289_v17  ;;  %v1058_v26 = vsub.f32 1.5, %v1057_v31  ;;  %v4950_v17 = vld [vmem:[%s7926_s3] sm:$0xf]  ;;  %v6146_v31 = vmul.f32 %v5497_v36, %v486_v53  ;;  %v818_v25 = vsub.f32 %v5515_v52, %v5951_v24  ;;  %s5220_s3 = smov [#allocation17]  }
 0x1c2   :  { %v6101_v38 = vpop.eup %4850  ;;  %v1048_v3 = vsub.f32 1.5, %v1047_v48  ;;  %v791_v45 = vmax.f32 %v759_v47, 0.0  ;;  %v6127_v6 = vperm.slane %v4950_v17, 3  ;;  %vm1090_vm10 = vweird.f32 %v6139_v61  ;;  %s4424_s16 = sshll.u32 %s5220_s3, 4  ;;  %s4425_s16 = int_to_ptr.vmem [resolvable:$true] %s4424_s16 }
 0x1c3   :  { %v483_v46 = vpop.xlane.xlu0 %482  ;;  %v6104_v7 = vpop.eup %4852  ;;  %v1059_v12 = vmul.f32 %v6050_v59, %v1058_v26  ;;  %v1065_v34 = vmul.f32 %v6101_v38, %v6074_v4  ;;  %v729_v14 = vmul.f32 %v6146_v31, %v6146_v31  ;;  %vm1071_vm4 = vweird.f32 %v6101_v38 }
 0x1c4   :  { %v1049_v57 = vmul.f32 %v6053_v60, %v1048_v3  ;;  %v1075_v29 = vmul.f32 %v6104_v7, %v6078_v1  ;;  %v6122_v44 = vadd.f32 1e-05, %v791_v45  ;;  %v6149_v40 = vmul.f32 %v5497_v36, %v483_v46  ;;  %vm6181_vm6 = vmor %vm1070_vm3, %vm1071_vm4 }
 0x1c5   :  { %v1063_v16 = vsel %vm6129_vm1, %v6050_v59, %v1059_v12  ;;  %v1066_v43 = vmul.f32 %v6101_v38, %v1065_v34  ;;  %v650_v59 = vpop.xlane.xlu2 %649  ;;  %vm1081_vm5 = vweird.f32 %v6104_v7 }
 0x1c6   :  { %v1053_v33 = vsel %vm6118_vm15, %v6053_v60, %v1049_v57  ;;  %v1076_v30 = vmul.f32 %v6104_v7, %v1075_v29  ;;  %4854 = vrsqrt.f32 %v6122_v44  ;;  %v1203_v60 = vmul.f32 %v1063_v16, %v819_v49  ;;  %v489_v9 = vpop.xlane.xlu1 %488  ;;  %vm6190_vm7 = vmor %vm1080_vm2, %vm1081_vm5 }
 0x1c7   :  { %v1202_v46 = vmul.f32 %v1053_v33, %v818_v25  ;;  %v1067_v11 = vmul.f32 0.5, %v1066_v43  ;;  %4856 = vrsqrt.f32 %v6139_v61  ;;  %v728_v52 = vmul.f32 %v6149_v40, %v6149_v40 }
 0x1c8   :  { %v1077_v26 = vmul.f32 0.5, %v1076_v30  ;;  %v696_v24 = vmul.f32 %v650_v59, %v5497_v36  ;;  %v1236_v45 = vmul.f32 %v5599_v51, %v1203_v60  ;;  %vm1100_vm8 = vweird.f32 %v6122_v44 }
 0x1c9   :  { %v1068_v37 = vsub.f32 1.5, %v1067_v11  ;;  %v1235_v57 = vmul.f32 %v5599_v51, %v1202_v46 }
 0x1ca   :  { %v1078_v34 = vsub.f32 1.5, %v1077_v26  ;;  %v760_v54 = vsub.f32 %v696_v24, %v728_v52  ;;  %v1269_v10 = vadd.f32 %v5634_v32, %v1236_v45 }
 0x1cb   :  { %v653_v8 = vpop.xlane.xlu0 %652  ;;  %v1268_v33 = vadd.f32 %v5634_v32, %v1235_v57 }
 0x1cc   :  { %v697_v48 = vmul.f32 %v653_v8, %v5497_v36  ;;  %v1079_v16 = vmul.f32 %v6104_v7, %v1078_v34  ;;  %v792_v8 = vmax.f32 %v760_v54, 0.0 }
 0x1cd   :  { %v1372_v39 = vpop.f32.mrf.mxu1  ;;  %v492_v49 = vpop.xlane.xlu2 %491 }
 0x1ce   :  { %v1373_v20 = vadd.f32 %v1372_v39, %v6127_v6  ;;  %v761_v22 = vsub.f32 %v697_v48, %v729_v14  ;;  %v6165_v39 = vpop.eup %4854  ;;  %v6203_v14 = vmul.f32 %v5497_v36, %v489_v9  ;;  %v1083_v48 = vsel %vm6190_vm7, %v6104_v7, %v1079_v16 }
 0x1cf   :  { %v6170_v29 = vpop.eup %4856  ;;  %v1095_v53 = vmul.f32 %v6165_v39, %v6122_v44  ;;  %v6209_v46 = vadd.f32 1e-05, %v792_v8  ;;  %v6212_v11 = vmul.f32 %v5497_v36, %v492_v49  ;;  %vm1101_vm9 = vweird.f32 %v6165_v39 }
 0x1d0   :  { %v1452_v3 = vmax.f32 %v1373_v20, 0.0  ;;  %v793_v17 = vmax.f32 %v761_v22, 0.0  ;;  %v1085_v4 = vmul.f32 %v6170_v29, %v6139_v61  ;;  %v1291_v20 = vpack.c.bf16 %v1269_v10, %v1268_v33  ;;  %vm6241_vm12 = vmor %vm1100_vm8, %vm1101_vm9 }
 0x1d1   :  { %4483 = vmatmul.msk.bf16.gmra.mxu1 %vm271_vm0, %v1290_v28  ;;  %v1069_v28 = vmul.f32 %v6101_v38, %v1068_v37  ;;  %v1096_v25 = vmul.f32 %v6165_v39, %v1095_v53  ;;  %vm1091_vm11 = vweird.f32 %v6170_v29  ;;  %vm1110_vm1 = vweird.f32 %v6209_v46 }
 0x1d2   :  { %v6195_v59 = vadd.f32 1e-05, %v793_v17  ;;  %vm6249_vm13 = vmor %vm1090_vm10, %vm1091_vm11 }
 0x1d3   :  { %v1073_v60 = vsel %vm6181_vm6, %v6101_v38, %v1069_v28  ;;  %v656_v1 = vpop.xlane.xlu0 %655  ;;  %v1097_v7 = vmul.f32 0.5, %v1096_v25 }
 0x1d4   :  { %4858 = vrsqrt.f32 %v6195_v59  ;;  %v698_v24 = vmul.f32 %v656_v1, %v5497_v36  ;;  %vm1120_vm14 = vweird.f32 %v6195_v59 }
 0x1d5   :  { %v1374_v21 = vpop.f32.mrf.mxu1  ;;  %4860 = vrsqrt.f32 %v6209_v46  ;;  %v495_v37 = vpop.xlane.xlu2 %494  ;;  %v1098_v57 = vsub.f32 1.5, %v1097_v7 }
 0x1d6   :  { %v1375_v47 = vadd.f32 %v1374_v21, %v6127_v6  ;;  %v820_v21 = vsub.f32 %v5522_v0, %v6032_v58  ;;  %v821_v0 = vsub.f32 %v5537_v15, %v6018_v63  ;;  %v730_v58 = vmul.f32 %v6203_v14, %v6203_v14 }
 0x1d7   :  { %v731_v15 = vmul.f32 %v6212_v11, %v6212_v11 }
 0x1d8   :  { %v1453_v18 = vmax.f32 %v1375_v47, 0.0  ;;  %v1086_v47 = vmul.f32 %v6170_v29, %v1085_v4  ;;  %v1204_v52 = vmul.f32 %v1073_v60, %v820_v21  ;;  %v762_v9 = vsub.f32 %v698_v24, %v730_v58 }
 0x1d9   :  { %v1099_v4 = vmul.f32 %v6165_v39, %v1098_v57 }
 0x1da   :  { %v6167_v12 = vpack.c.bf16 %v1453_v18, %v1452_v3  ;;  %v1205_v18 = vmul.f32 %v1083_v48, %v821_v0  ;;  %v659_v3 = vpop.xlane.xlu1 %658  ;;  %v1087_v45 = vmul.f32 0.5, %v1086_v47  ;;  %v6231_v17 = vpop.eup %4858  ;;  %v794_v44 = vmax.f32 %v762_v9, 0.0 }
 0x1db   :  { %v699_v63 = vmul.f32 %v659_v3, %v5497_v36  ;;  %v6236_v43 = vpop.eup %4860  ;;  %v1115_v30 = vmul.f32 %v6231_v17, %v6195_v59  ;;  %v498_v25 = vpop.xlane.xlu0 %497  ;;  %v1103_v48 = vsel %vm6241_vm12, %v6165_v39, %v1099_v4  ;;  %v6272_v39 = vmul.f32 %v5497_v36, %v495_v37 }
 0x1dc   :  { %v1088_v10 = vsub.f32 1.5, %v1087_v45  ;;  %v1238_v49 = vmul.f32 %v5599_v51, %v1205_v18  ;;  %v1105_v1 = vmul.f32 %v6236_v43, %v6209_v46  ;;  %v6258_v47 = vadd.f32 1e-05, %v794_v44 }
 0x1dd   :  { %v1377_v23 = vpop.f32.mrf.mxu1  ;;  %v763_v28 = vsub.f32 %v699_v63, %v731_v15  ;;  %v6261_v0 = vmul.f32 %v5497_v36, %v498_v25  ;;  %v822_v3 = vsub.f32 %v5557_v41, %v6081_v2  ;;  %v732_v41 = vmul.f32 %v6272_v39, %v6272_v39 }
 0x1de   :  { %v1378_v38 = vadd.f32 %v1377_v23, %v6127_v6  ;;  %v1237_v23 = vmul.f32 %v5599_v51, %v1204_v52  ;;  %v1089_v61 = vmul.f32 %v6170_v29, %v1088_v10  ;;  %v1271_v21 = vadd.f32 %v5634_v32, %v1238_v49  ;;  %v665_v52 = vpop.xlane.xlu2 %664 }
 0x1df   :  { %4862 = vrsqrt.f32 %v6258_v47  ;;  %v701_v15 = vmul.f32 %v665_v52, %v5497_v36  ;;  %vm1121_vm15 = vweird.f32 %v6231_v17  ;;  %vm1111_vm2 = vweird.f32 %v6236_v43 }
 0x1e0   :  { %v1454_v34 = vmax.f32 %v1378_v38, 0.0  ;;  %v1270_v8 = vadd.f32 %v5634_v32, %v1237_v23  ;;  %v823_v38 = vsub.f32 %v5577_v35, %v6072_v5  ;;  %v1093_v7 = vsel %vm6249_vm13, %v6170_v29, %v1089_v61  ;;  %vm6304_vm3 = vmor %vm1120_vm14, %vm1121_vm15 }
 0x1e1   :  { %4484 = vmatmul.msk.bf16.gmra.mxu1 %vm271_vm0, %v1291_v20  ;;  %v795_v20 = vmax.f32 %v763_v28, 0.0  ;;  %v1106_v5 = vmul.f32 %v6236_v43, %v1105_v1  ;;  %v733_v29 = vmul.f32 %v6261_v0, %v6261_v0  ;;  %v1206_v37 = vmul.f32 %v1093_v7, %v822_v3  ;;  %vm6312_vm4 = vmor %vm1110_vm1, %vm1111_vm2 }
 0x1e2   :  { %v1292_v58 = vpack.c.bf16 %v1271_v21, %v1270_v8  ;;  %v1207_v35 = vmul.f32 %v1103_v48, %v823_v38  ;;  %v662_v45 = vpop.xlane.xlu1 %661  ;;  %vm1130_vm5 = vweird.f32 %v6258_v47 }
 0x1e3   :  { %v6269_v24 = vadd.f32 1e-05, %v795_v20  ;;  %v1107_v9 = vmul.f32 0.5, %v1106_v5  ;;  %v501_v23 = vpop.xlane.xlu0 %500  ;;  %v765_v10 = vsub.f32 %v701_v15, %v733_v29  ;;  %v1239_v8 = vmul.f32 %v5599_v51, %v1206_v37 }
 0x1e4   :  { %v1240_v28 = vmul.f32 %v5599_v51, %v1207_v35  ;;  %v825_v5 = vsub.f32 %v5605_v56, %v6146_v31  ;;  %v6330_v29 = vmul.f32 %v5497_v36, %v501_v23  ;;  %v824_v15 = vsub.f32 %v5613_v62, %v6149_v40 }
 0x1e5   :  { %v1379_v26 = vpop.f32.mrf.mxu1  ;;  %4864 = vrsqrt.f32 %v6269_v24  ;;  %v6291_v4 = vpop.eup %4862  ;;  %v1108_v33 = vsub.f32 1.5, %v1107_v9  ;;  %v797_v25 = vmax.f32 %v765_v10, 0.0  ;;  %v1272_v48 = vadd.f32 %v5634_v32, %v1239_v8 }
 0x1e6   :  { %v1380_v22 = vadd.f32 %v1379_v26, %v6127_v6  ;;  %v1116_v26 = vmul.f32 %v6231_v17, %v1115_v30  ;;  %v1273_v20 = vadd.f32 %v5634_v32, %v1240_v28  ;;  %v1125_v60 = vmul.f32 %v6291_v4, %v6258_v47  ;;  %v668_v56 = vpop.xlane.xlu2 %667 }
 0x1e7   :  { %v6316_v52 = vadd.f32 1e-05, %v797_v25  ;;  %vm1131_vm6 = vweird.f32 %v6291_v4  ;;  %vm1140_vm7 = vweird.f32 %v6269_v24 }
 0x1e8   :  { %v1455_v54 = vmax.f32 %v1380_v22, 0.0  ;;  %v1293_v7 = vpack.c.bf16 %v1273_v20, %v1272_v48  ;;  %v1126_v3 = vmul.f32 %v6291_v4, %v1125_v60  ;;  %vm6365_vm9 = vmor %vm1130_vm5, %vm1131_vm6 }
 0x1e9   :  { %4866 = vrsqrt.f32 %v6316_v52  ;;  %vm1160_vm11 = vweird.f32 %v6316_v52 }
 0x1ea   :  { %v6229_v53 = vpack.c.bf16 %v1455_v54, %v1454_v34  ;;  %v1117_v34 = vmul.f32 0.5, %v1116_v26  ;;  %v700_v54 = vmul.f32 %v662_v45, %v5497_v36  ;;  %v504_v46 = vpop.xlane.xlu1 %503 }
 0x1eb   :  { %v6296_v30 = vpop.eup %4864  ;;  %v671_v35 = vpop.xlane.xlu0 %670  ;;  %v6327_v45 = vmul.f32 %v5497_v36, %v504_v46 }
 0x1ec   :  { %v764_v44 = vsub.f32 %v700_v54, %v732_v41  ;;  %v1135_v38 = vmul.f32 %v6296_v30, %v6269_v24  ;;  %v703_v54 = vmul.f32 %v671_v35, %v5497_v36  ;;  %vm1141_vm8 = vweird.f32 %v6296_v30 }
 0x1ed   :  { %v1382_v16 = vpop.f32.mrf.mxu1  ;;  %vm1142_vm10 = vmor %vm1140_vm7, %vm1141_vm8  ;;  %v826_v35 = vsub.f32 %v5640_v55, %v6203_v14  ;;  %vm2194_vm8 = vcmask 523264  }
 0x1ee   :  { %v1383_v18 = vadd.f32 %v1382_v16, %v6127_v6  ;;  %v1118_v16 = vsub.f32 1.5, %v1117_v34  ;;  %v796_v59 = vmax.f32 %v764_v44, 0.0  ;;  %v735_v34 = vmul.f32 %v6327_v45, %v6327_v45 }
 0x1f0   :  { %v1456_v2 = vmax.f32 %v1383_v18, 0.0  ;;  %v1119_v21 = vmul.f32 %v6231_v17, %v1118_v16  ;;  %v767_v28 = vsub.f32 %v703_v54, %v735_v34 }
 0x1f1   :  { %4485 = vmatmul.msk.bf16.gmra.mxu1 %vm271_vm0, %v1292_v58  ;;  %v1109_v58 = vmul.f32 %v6236_v43, %v1108_v33  ;;  %v6352_v33 = vpop.eup %4866 }
 0x1f2   :  { %v1123_v18 = vsel %vm6304_vm3, %v6231_v17, %v1119_v21  ;;  %v799_v21 = vmax.f32 %v767_v28, 0.0  ;;  %v1155_v48 = vmul.f32 %v6352_v33, %v6316_v52  ;;  %vm1161_vm12 = vweird.f32 %v6352_v33 }
 0x1f3   :  { %v1113_v17 = vsel %vm6312_vm4, %v6236_v43, %v1109_v58  ;;  %v1209_v37 = vmul.f32 %v1123_v18, %v825_v5  ;;  %v734_v43 = vmul.f32 %v6330_v29, %v6330_v29  ;;  %vm1162_vm15 = vmor %vm1160_vm11, %vm1161_vm12  ;;  %v829_v28 = vsub.f32 %v5734_v19, %v6261_v0  ;;  %v4772_v58 = vld [vmem:[#allocation10 + $0x8] sm:$0xff] }
 0x1f4   :  { %v1208_v40 = vmul.f32 %v1113_v17, %v824_v15  ;;  %v863_v24 = vadd.f32 1e-05, %v799_v21  ;;  %2078 = vmatpush.bf16.msra.mxu1 %v4772_v58 }
 0x1f5   :  { %v1384_v22 = vpop.f32.mrf.mxu1  ;;  %v1242_v16 = vmul.f32 %v5599_v51, %v1209_v37 }
 0x1f6   :  { %v1385_v63 = vadd.f32 %v1384_v22, %v6127_v6  ;;  %v6324_v22 = vadd.f32 1e-05, %v796_v59  ;;  %vm1180_vm2 = vweird.f32 %v863_v24 }
 0x1f7   :  { %v1275_v1 = vadd.f32 %v5634_v32, %v1242_v16 }
 0x1f8   :  { %v1457_v57 = vmax.f32 %v1385_v63, 0.0  ;;  %v1136_v63 = vmul.f32 %v6296_v30, %v1135_v38  ;;  %4868 = vrsqrt.f32 %v6324_v22  ;;  %vm1150_vm13 = vweird.f32 %v6324_v22 }
 0x1f9   :  { %4870 = vrsqrt.f32 %v863_v24 }
 0x1fa   :  { %v6289_v49 = vpack.c.bf16 %v1457_v57, %v1456_v2  ;;  %v1127_v2 = vmul.f32 0.5, %v1126_v3  ;;  %v702_v57 = vmul.f32 %v668_v56, %v5497_v36  ;;  %v1137_v9 = vmul.f32 0.5, %v1136_v63 }
 0x1fb   :  { %v1156_v3 = vmul.f32 %v6352_v33, %v1155_v48  ;;  %v827_v63 = vsub.f32 %v5656_v27, %v6212_v11 }
 0x1fc   :  { %v1128_v44 = vsub.f32 1.5, %v1127_v2  ;;  %v766_v25 = vsub.f32 %v702_v57, %v734_v43  ;;  %v1138_v20 = vsub.f32 1.5, %v1137_v9 }
 0x1fd   :  { %v1387_v61 = vpop.f32.mrf.mxu1  ;;  %v1157_v37 = vmul.f32 0.5, %v1156_v3 }
 0x1fe   :  { %v1388_v31 = vadd.f32 %v1387_v61, %v6127_v6  ;;  %v1241_v61 = vmul.f32 %v5599_v51, %v1208_v40  ;;  %v4869_v36 = vpop.eup %4868  ;;  %v1129_v59 = vmul.f32 %v6291_v4, %v1128_v44  ;;  %v798_v47 = vmax.f32 %v766_v25, 0.0 }
 0x1ff   :  { %v1139_v46 = vmul.f32 %v6296_v30, %v1138_v20  ;;  %v1145_v26 = vmul.f32 %v4869_v36, %v6324_v22  ;;  %v1158_v55 = vsub.f32 1.5, %v1157_v37  ;;  %v4871_v14 = vpop.eup %4870  ;;  %vm1151_vm14 = vweird.f32 %v4869_v36 }
 0x200   :  { %v1458_v23 = vmax.f32 %v1388_v31, 0.0  ;;  %v1274_v38 = vadd.f32 %v5634_v32, %v1241_v61  ;;  %v1133_v18 = vsel %vm6365_vm9, %v6291_v4, %v1129_v59  ;;  %v862_v5 = vadd.f32 1e-05, %v798_v47  ;;  %vm1152_vm1 = vmor %vm1150_vm13, %vm1151_vm14 }
 0x201   :  { %4486 = vmatmul.msk.bf16.gmra.mxu1 %vm271_vm0, %v1293_v7  ;;  %v1143_v15 = vsel %vm1142_vm10, %v6296_v30, %v1139_v46  ;;  %v1146_v17 = vmul.f32 %v4869_v36, %v1145_v26  ;;  %v1210_v56 = vmul.f32 %v1133_v18, %v826_v35  ;;  %v1159_v30 = vmul.f32 %v6352_v33, %v1158_v55 }
 0x202   :  { %v1294_v7 = vpack.c.bf16 %v1275_v1, %v1274_v38  ;;  %v1211_v4 = vmul.f32 %v1143_v15, %v827_v63  ;;  %4872 = vrsqrt.f32 %v862_v5  ;;  %v828_v44 = vsub.f32 %v5700_v50, %v6272_v39  ;;  %v4771_v38 = vld [vmem:[#allocation10] sm:$0xff] }
 0x203   :  { %v1147_v34 = vmul.f32 0.5, %v1146_v17  ;;  %v1243_v54 = vmul.f32 %v5599_v51, %v1210_v56  ;;  %vm1181_vm3 = vweird.f32 %v4871_v14  ;;  %vm1170_vm4 = vweird.f32 %v862_v5  ;;  %2079 = vmatpush.bf16.msra.mxu1 %v4771_v38 }
 0x204   :  { %vm1182_vm6 = vmor %vm1180_vm2, %vm1181_vm3  ;;  %v830_v18 = vsub.f32 %v5770_v13, %v6330_v29 }
 0x205   :  { %v1389_v41 = vpop.f32.mrf.mxu1  ;;  %v1148_v2 = vsub.f32 1.5, %v1147_v34  ;;  %v1276_v11 = vadd.f32 %v5634_v32, %v1243_v54 }
 0x206   :  { %v1390_v62 = vadd.f32 %v1389_v41, %v6127_v6  ;;  %v1244_v41 = vmul.f32 %v5599_v51, %v1211_v4 }
 0x207   :  { %v1149_v57 = vmul.f32 %v4869_v36, %v1148_v2 }
 0x208   :  { %v1459_v10 = vmax.f32 %v1390_v62, 0.0  ;;  %v4873_v27 = vpop.eup %4872  ;;  %v1175_v62 = vmul.f32 %v4871_v14, %v863_v24  ;;  %v1277_v43 = vadd.f32 %v5634_v32, %v1244_v41  ;;  %v831_v24 = vsub.f32 %v5741_v42, %v6327_v45 }
 0x209   :  { %v1165_v9 = vmul.f32 %v4873_v27, %v862_v5  ;;  %v1153_v22 = vsel %vm1152_vm1, %v4869_v36, %v1149_v57  ;;  %vm1171_vm5 = vweird.f32 %v4873_v27 }
 0x20a   :  { %v6350_v8 = vpack.c.bf16 %v1459_v10, %v1458_v23  ;;  %v1295_v52 = vpack.c.bf16 %v1277_v43, %v1276_v11  ;;  %v1163_v23 = vsel %vm1162_vm15, %v6352_v33, %v1159_v30  ;;  %v1176_v10 = vmul.f32 %v4871_v14, %v1175_v62  ;;  %vm1172_vm7 = vmor %vm1170_vm4, %vm1171_vm5 }
 0x20b   :  { %v1166_v16 = vmul.f32 %v4873_v27, %v1165_v9  ;;  %v1213_v25 = vmul.f32 %v1163_v23, %v829_v28  ;;  %v1212_v20 = vmul.f32 %v1153_v22, %v828_v44 }
 0x20c   :  { %v1177_v61 = vmul.f32 0.5, %v1176_v10 }
 0x20d   :  { %v1167_v1 = vmul.f32 0.5, %v1166_v16  ;;  %v1246_v59 = vmul.f32 %v5599_v51, %v1213_v25  ;;  %v1245_v33 = vmul.f32 %v5599_v51, %v1212_v20 }
 0x20e   :  { %v6357_v60 = vpop.f32.mrf.mxu1  ;;  %v1178_v48 = vsub.f32 1.5, %v1177_v61 }
 0x20f   :  { %v1168_v47 = vsub.f32 1.5, %v1167_v1  ;;  %v1279_v19 = vadd.f32 %v5634_v32, %v1246_v59  ;;  %v1278_v0 = vadd.f32 %v5634_v32, %v1245_v33  ;;  %v1393_v43 = vadd.f32 %v6357_v60, %v6127_v6 }
 0x210   :  { %v1179_v50 = vmul.f32 %v4871_v14, %v1178_v48 }
 0x211   :  { %4487 = vmatmul.msk.bf16.gmra.mxu1 %vm271_vm0, %v1294_v7  ;;  %v1169_v39 = vmul.f32 %v4873_v27, %v1168_v47  ;;  %v1296_v46 = vpack.c.bf16 %v1279_v19, %v1278_v0  ;;  %v1460_v23 = vmax.f32 %v1393_v43, 0.0 }
 0x212   :  { %v1183_v26 = vsel %vm1182_vm6, %v4871_v14, %v1179_v50 }
 0x213   :  { %v1173_v7 = vsel %vm1172_vm7, %v4873_v27, %v1169_v39  ;;  %v1215_v3 = vmul.f32 %v1183_v26, %v831_v24 }
 0x214   :  { %v1214_v35 = vmul.f32 %v1173_v7, %v830_v18 }
 0x215   :  { %v1248_v15 = vmul.f32 %v5599_v51, %v1215_v3 }
 0x216   :  { %v6382_v31 = vpop.f32.mrf.mxu1  ;;  %v1247_v17 = vmul.f32 %v5599_v51, %v1214_v35 }
 0x217   :  { %v1281_v63 = vadd.f32 %v5634_v32, %v1248_v15  ;;  %v1395_v11 = vadd.f32 %v6382_v31, %v6127_v6  ;;  %v4736_v15 = vld [vmem:[#allocation5 + $0x4] sm:$0xf0] }
 0x218   :  { %v1280_v56 = vadd.f32 %v5634_v32, %v1247_v17 }
 0x219   :  { %v1461_v9 = vmax.f32 %v1395_v11, 0.0  ;;  %v4501_v11 = vld [vmem:[#allocation5 + $0x10] sm:$0xf] }
 0x21a   :  { %v1297_v4 = vpack.c.bf16 %v1281_v63, %v1280_v56 }
 0x21b   :  { %v1488_v31 = vpack.c.bf16 %v1461_v9, %v1460_v23  ;;  %v4740_v23 = vld [vmem:[#allocation5 + $0x24] sm:$0xf0] }
 0x21e   :  { %v6391_v40 = vpop.f32.mrf.mxu1 }
 0x21f   :  { %v1398_v32 = vadd.f32 %v6391_v40, %v6127_v6 }
 0x221   :  { %4488 = vmatmul.msk.bf16.gmra.mxu1 %vm271_vm0, %v1295_v52  ;;  %v1462_v57 = vmax.f32 %v1398_v32, 0.0 }
 0x226   :  { %v1399_v21 = vpop.f32.mrf.mxu1 }
 0x227   :  { %v1400_v51 = vadd.f32 %v1399_v21, %v6127_v6 }
 0x229   :  { %v1463_v30 = vmax.f32 %v1400_v51, 0.0 }
 0x22b   :  { %v1489_v52 = vpack.c.bf16 %v1463_v30, %v1462_v57  ;;  %v4738_v30 = vld [vmem:[#allocation5 + $0x14] sm:$0xf0] }
 0x22e   :  { %v1402_v36 = vpop.f32.mrf.mxu1 }
 0x22f   :  { %v1403_v34 = vadd.f32 %v1402_v36, %v6127_v6 }
 0x231   :  { %4489 = vmatmul.msk.bf16.gmra.mxu1 %vm271_vm0, %v1296_v46  ;;  %v1464_v2 = vmax.f32 %v1403_v34, 0.0 }
 0x236   :  { %v1404_v5 = vpop.f32.mrf.mxu1 }
 0x237   :  { %v1405_v13 = vadd.f32 %v1404_v5, %v6127_v6  ;;  %v4493_v5 = vld [vmem:[#allocation5] sm:$0xf] }
 0x238   :  { %v6457_v17 = vor.u32 %v4736_v15, %v4493_v5  ;;  %v4750_v5 = vld [vmem:[#allocation5 + $0x74] sm:$0xf0] }
 0x239   :  { %v1465_v14 = vmax.f32 %v1405_v13, 0.0 }
 0x23b   :  { %v1490_v62 = vpack.c.bf16 %v1465_v14, %v1464_v2 }
 0x23e   :  { %v1407_v37 = vpop.f32.mrf.mxu1 }
 0x23f   :  { %v1408_v42 = vadd.f32 %v1407_v37, %v6127_v6 }
 0x241   :  { %4490 = vmatmul.msk.bf16.gmra.mxu1 %vm271_vm0, %v1297_v4  ;;  %v1466_v54 = vmax.f32 %v1408_v42, 0.0 }
 0x246   :  { %v1409_v45 = vpop.f32.mrf.mxu1 }
 0x247   :  { %v1410_v29 = vadd.f32 %v1409_v45, %v6127_v6 }
 0x249   :  { %v1467_v55 = vmax.f32 %v1410_v29, 0.0 }
 0x24b   :  { %v1491_v41 = vpack.c.bf16 %v1467_v55, %v1466_v54 }
 0x24d   :  { %1660 = vmatpush.bf16.msra.mxu2 %v1491_v41 }
 0x24e   :  { %v1412_v27 = vpop.f32.mrf.mxu1 }
 0x24f   :  { %v1413_v40 = vadd.f32 %v1412_v27, %v6127_v6 }
 0x251   :  { %1661 = vmatpush.bf16.msra.mxu2 %v1490_v62  ;;  %4651 = vmatmul.msk.bf16.vlgmr.msra.gmra.mxu1 %vm271_vm0, %v6167_v12  ;;  %v1468_v22 = vmax.f32 %v1413_v40, 0.0 }
 0x255   :  { %1662 = vmatpush.bf16.msra.mxu2 %v1489_v52 }
 0x256   :  { %v1414_v10 = vpop.f32.mrf.mxu1 }
 0x257   :  { %v1415_v28 = vadd.f32 %v1414_v10, %v6127_v6  ;;  %v4735_v10 = vld [vmem:[#allocation5 + $0x4] sm:$0xf] }
 0x259   :  { %v1469_v16 = vmax.f32 %v1415_v28, 0.0  ;;  %1663 = vmatpush.bf16.msra.mxu2 %v1488_v31  ;;  %v4495_v28 = vld [vmem:[#allocation5 + $0x8] sm:$0xf0] }
 0x25b   :  { %v6429_v44 = vpack.c.bf16 %v1469_v16, %v1468_v22  ;;  %v4517_v22 = vld [vmem:[#allocation5 + $0x30] sm:$0xf]  ;;  %v4742_v16 = vld [vmem:[#allocation5 + $0x34] sm:$0xf0] }
 0x25d   :  { %1664 = vmatpush.bf16.msra.mxu2 %v6350_v8 }
 0x25e   :  { %v1417_v60 = vpop.f32.mrf.mxu1 }
 0x25f   :  { %v1418_v25 = vadd.f32 %v1417_v60, %v6127_v6  ;;  %v6493_v60 = vor.u32 %v4742_v16, %v4517_v22  ;;  %v4559_v22 = vld [vmem:[#allocation5 + $0x88] sm:$0xf0] }
 0x261   :  { %1665 = vmatpush.bf16.msra.mxu2 %v6289_v49  ;;  %4652 = vmatmul.msk.bf16.gmra.mxu1 %vm271_vm0, %v6229_v53  ;;  %v1470_v21 = vmax.f32 %v1418_v25, 0.0  ;;  %v4737_v25 = vld [vmem:[#allocation5 + $0x14] sm:$0xf] }
 0x265   :  { %1666 = vmatpush.bf16.msra.mxu2 %v6229_v53 }
 0x266   :  { %v1419_v61 = vpop.f32.mrf.mxu1 }
 0x267   :  { %v1420_v20 = vadd.f32 %v1419_v61, %v6127_v6  ;;  %v4503_v61 = vld [vmem:[#allocation5 + $0x18] sm:$0xf0] }
 0x269   :  { %v1471_v1 = vmax.f32 %v1420_v20, 0.0  ;;  %1667 = vmatpush.bf16.msra.mxu2 %v6167_v12  ;;  %v6496_v20 = vor.u32 %v4737_v25, %v4503_v61 }
 0x26b   :  { %v6439_v59 = vpack.c.bf16 %v1471_v1, %v1470_v21  ;;  %v4744_v1 = vld [vmem:[#allocation5 + $0x44] sm:$0xf0] }
 0x26c   :  { %1668 = vmatmul.bf16.vlgmr.msra.gmra.mxu2 %v6457_v17 }
 0x26e   :  { %v1422_v48 = vpop.f32.mrf.mxu1 }
 0x26f   :  { %v1423_v33 = vadd.f32 %v1422_v48, %v6127_v6 }
 0x271   :  { %4653 = vmatmul.msk.bf16.gmra.mxu1 %vm271_vm0, %v6289_v49  ;;  %v1472_v19 = vmax.f32 %v1423_v33, 0.0  ;;  %v4739_v33 = vld [vmem:[#allocation5 + $0x24] sm:$0xf] }
 0x276   :  { %v1424_v58 = vpop.f32.mrf.mxu1 }
 0x277   :  { %v1425_v47 = vadd.f32 %v1424_v58, %v6127_v6  ;;  %v4511_v58 = vld [vmem:[#allocation5 + $0x28] sm:$0xf0] }
 0x279   :  { %v1473_v53 = vmax.f32 %v1425_v47, 0.0  ;;  %v6508_v47 = vor.u32 %v4739_v33, %v4511_v58  ;;  %v4758_v33 = vld [vmem:[#allocation5 + $0xb4] sm:$0xf0] }
 0x27b   :  { %v6445_v50 = vpack.c.bf16 %v1473_v53, %v1472_v19  ;;  %7993 = vst [vmem:[#allocation24_spill] sm:$0xff] %v6508_v47  ;;  %v4533_v53 = vld [vmem:[#allocation5 + $0x50] sm:$0xf] }
 0x27e   :  { %v1427_v0 = vpop.f32.mrf.mxu1 }
 0x27f   :  { %v1428_v12 = vadd.f32 %v1427_v0, %v6127_v6 }
 0x281   :  { %4654 = vmatmul.msk.bf16.gmra.mxu1 %vm271_vm0, %v6350_v8  ;;  %v1474_v38 = vmax.f32 %v1428_v12, 0.0  ;;  %v4741_v12 = vld [vmem:[#allocation5 + $0x34] sm:$0xf] }
 0x286   :  { %v1429_v39 = vpop.f32.mrf.mxu1 }
 0x287   :  { %v1430_v36 = vadd.f32 %v1429_v39, %v6127_v6  ;;  %v4519_v39 = vld [vmem:[#allocation5 + $0x38] sm:$0xf0] }
 0x289   :  { %v1475_v49 = vmax.f32 %v1430_v36, 0.0  ;;  %v6517_v36 = vor.u32 %v4741_v12, %v4519_v39 }
 0x28b   :  { %v6451_v46 = vpack.c.bf16 %v1475_v49, %v1474_v38  ;;  %7994 = vst [vmem:[#allocation25_spill] sm:$0xff] %v6517_v36  ;;  %v4541_v49 = vld [vmem:[#allocation5 + $0x60] sm:$0xf] }
 0x28e   :  { %v1432_v26 = vpop.f32.mrf.mxu1 }
 0x28f   :  { %v1433_v2 = vadd.f32 %v1432_v26, %v6127_v6 }
 0x291   :  { %4655 = vmatmul.msk.bf16.gmra.mxu1 %vm271_vm0, %v1488_v31  ;;  %v1476_v9 = vmax.f32 %v1433_v2, 0.0  ;;  %v6487_v31 = vor.u32 %v4735_v10, %v4495_v28  ;;  %v4754_v2 = vld [vmem:[#allocation5 + $0x94] sm:$0xf0]  ;;  %v4751_v28 = vld [vmem:[#allocation5 + $0x84] sm:$0xf] }
 0x292   :  { %v6562_v25 = vor.u32 %v4751_v28, %v4559_v22  ;;  %v4757_v28 = vld [vmem:[#allocation5 + $0xb4] sm:$0xf]  ;;  %v4583_v22 = vld [vmem:[#allocation5 + $0xb8] sm:$0xf0] }
 0x294   :  { %7999 = vst [vmem:[#allocation30_spill] sm:$0xff] %v6562_v25 }
 0x296   :  { %v1434_v24 = vpop.f32.mrf.mxu1 }
 0x297   :  { %v1435_v14 = vadd.f32 %v1434_v24, %v6127_v6 }
 0x299   :  { %v1477_v43 = vmax.f32 %v1435_v14, 0.0 }
 0x29e   :  { %v1437_v7 = vpop.f32.mrf.mxu1 }
 0x29f   :  { %v1438_v55 = vadd.f32 %v1437_v7, %v6127_v6  ;;  %v4743_v7 = vld [vmem:[#allocation5 + $0x44] sm:$0xf] }
 0x2a1   :  { %4656 = vmatmul.msk.bf16.gmra.mxu1 %vm271_vm0, %v1489_v52  ;;  %v1478_v27 = vmax.f32 %v1438_v55, 0.0  ;;  %v1496_v52 = vpack.c.bf16 %v1477_v43, %v1476_v9  ;;  %v4543_v55 = vld [vmem:[#allocation5 + $0x68] sm:$0xf0]  ;;  %v4773_v9 = vld [vmem:[#allocation10 + $0x10] sm:$0xff] }
 0x2a6   :  { %v1439_v18 = vpop.f32.mrf.mxu1 }
 0x2a7   :  { %v1440_v29 = vadd.f32 %v1439_v18, %v6127_v6  ;;  %v4527_v18 = vld [vmem:[#allocation5 + $0x48] sm:$0xf0] }
 0x2ae   :  { %v1442_v3 = vpop.f32.mrf.mxu1 }
 0x2af   :  { %v1443_v42 = vadd.f32 %v1442_v3, %v6127_v6  ;;  %v6528_v3 = vor.u32 %v4743_v7, %v4527_v18 }
 0x2b1   :  { %4657 = vmatmul.msk.bf16.gmra.mxu1 %vm271_vm0, %v1490_v62  ;;  %v1480_v51 = vmax.f32 %v1443_v42, 0.0  ;;  %v6476_v62 = vor.u32 %v4738_v30, %v4501_v11  ;;  %7995 = vst [vmem:[#allocation26_spill] sm:$0xff] %v6528_v3  ;;  %v4557_v42 = vld [vmem:[#allocation5 + $0x80] sm:$0xf]  ;;  %v4749_v30 = vld [vmem:[#allocation5 + $0x74] sm:$0xf] }
 0x2b3   :  { %1673 = vmatmul.bf16.gmra.mxu2 %v6476_v62 }
 0x2b6   :  { %v1444_v8 = vpop.f32.mrf.mxu1 }
 0x2b7   :  { %v1445_v37 = vadd.f32 %v1444_v8, %v6127_v6 }
 0x2b9   :  { %v1481_v34 = vmax.f32 %v1445_v37, 0.0 }
 0x2bb   :  { %v6470_v32 = vpack.c.bf16 %v1481_v34, %v1480_v51  ;;  %v4747_v34 = vld [vmem:[#allocation5 + $0x64] sm:$0xf] }
 0x2bc   :  { %v6550_v14 = vor.u32 %v4747_v34, %v4543_v55  ;;  %v4575_v34 = vld [vmem:[#allocation5 + $0xa8] sm:$0xf0] }
 0x2be   :  { %v1447_v35 = vpop.f32.mrf.mxu1  ;;  %7997 = vst [vmem:[#allocation28_spill] sm:$0xff] %v6550_v14 }
 0x2bf   :  { %v1448_v63 = vadd.f32 %v1447_v35, %v6127_v6  ;;  %v4549_v35 = vld [vmem:[#allocation5 + $0x70] sm:$0xf] }
 0x2c0   :  { %v6533_v15 = vor.u32 %v4750_v5, %v4549_v35 }
 0x2c1   :  { %4658 = vmatmul.msk.bf16.gmra.mxu1 %vm271_vm0, %v1491_v41  ;;  %v1482_v45 = vmax.f32 %v1448_v63, 0.0  ;;  %v1479_v41 = vmax.f32 %v1440_v29, 0.0  ;;  %v4745_v63 = vld [vmem:[#allocation5 + $0x54] sm:$0xf] }
 0x2c3   :  { %v1497_v57 = vpack.c.bf16 %v1479_v41, %v1478_v27  ;;  %v4774_v27 = vld [vmem:[#allocation10 + $0x18] sm:$0xff] }
 0x2c4   :  { %1929 = vmatpush.bf16.msrb.mxu0 %v4774_v27 }
 0x2c6   :  { %v1449_v56 = vpop.f32.mrf.mxu1 }
 0x2c7   :  { %v1450_v4 = vadd.f32 %v1449_v56, %v6127_v6  ;;  %v4509_v6 = vld [vmem:[#allocation5 + $0x20] sm:$0xf]  ;;  %v4535_v56 = vld [vmem:[#allocation5 + $0x58] sm:$0xf0] }
 0x2c8   :  { %v6483_v40 = vor.u32 %v4740_v23, %v4509_v6  ;;  %1930 = vmatpush.bf16.msrb.mxu0 %v4773_v9  ;;  %v4573_v6 = vld [vmem:[#allocation5 + $0xa0] sm:$0xf]  ;;  %v4756_v23 = vld [vmem:[#allocation5 + $0xa4] sm:$0xf0]  ;;  %v4597_v9 = vld [vmem:[#allocation5 + $0xd0] sm:$0xf] }
 0x2c9   :  { %v1483_v13 = vmax.f32 %v1450_v4, 0.0  ;;  %v6540_v4 = vor.u32 %v4745_v63, %v4535_v56  ;;  %v6559_v10 = vor.u32 %v4756_v23, %v4573_v6  ;;  %v4589_v63 = vld [vmem:[#allocation5 + $0xc0] sm:$0xf]  ;;  %v4760_v56 = vld [vmem:[#allocation5 + $0xc4] sm:$0xf0] }
 0x2ca   :  { %1678 = vmatmul.bf16.gmra.mxu2 %v6483_v40  ;;  %v4762_v6 = vld [vmem:[#allocation5 + $0xd4] sm:$0xf0] }
 0x2cb   :  { %v6465_v54 = vpack.c.bf16 %v1483_v13, %v1482_v45  ;;  %7996 = vst [vmem:[#allocation27_spill] sm:$0xff] %v6540_v4  ;;  %v4752_v45 = vld [vmem:[#allocation5 + $0x84] sm:$0xf0]  ;;  %v6579_v23 = vor.u32 %v4762_v6, %v4597_v9  ;;  %v4761_v6 = vld [vmem:[#allocation5 + $0xd4] sm:$0xf] }
 0x2cc   :  { %v6543_v13 = vor.u32 %v4752_v45, %v4557_v42  ;;  %v6572_v42 = vor.u32 %v4760_v56, %v4589_v63  ;;  %v4755_v45 = vld [vmem:[#allocation5 + $0xa4] sm:$0xf]  ;;  %v4591_v63 = vld [vmem:[#allocation5 + $0xc8] sm:$0xf0] }
 0x2cd   :  { %1749 = vmatpush.bf16.msrb.mxu3 %v6465_v54  ;;  %8004 = vst [vmem:[#allocation35_spill] sm:$0xff] %v6579_v23 }
 0x2ce   :  { %v6498_v21 = vpop.f32.mrf.mxu1  ;;  %8002 = vst [vmem:[#allocation33_spill] sm:$0xff] %v6572_v42 }
 0x2d1   :  { %1750 = vmatpush.bf16.msrb.mxu3 %v6470_v32  ;;  %4659 = vmatmul.msk.bf16.gmra.mxu1 %vm271_vm0, %v6429_v44 }
 0x2d5   :  { %1751 = vmatpush.bf16.msrb.mxu3 %v1497_v57 }
 0x2d6   :  { %v6506_v48 = vpop.f32.mrf.mxu1 }
 0x2d9   :  { %1752 = vmatpush.bf16.msrb.mxu3 %v1496_v52 }
 0x2da   :  { %1683 = vmatmul.bf16.gmra.mxu2 %v6493_v60 }
 0x2dd   :  { %1753 = vmatpush.bf16.msrb.mxu3 %v6451_v46 }
 0x2de   :  { %v6511_v19 = vpop.f32.mrf.mxu1 }
 0x2e1   :  { %1754 = vmatpush.bf16.msrb.mxu3 %v6445_v50  ;;  %4660 = vmatmul.msk.bf16.gmra.mxu1 %vm271_vm0, %v6439_v59 }
 0x2e5   :  { %1755 = vmatpush.bf16.msrb.mxu3 %v6439_v59 }
 0x2e6   :  { %v6519_v38 = vpop.f32.mrf.mxu1 }
 0x2e9   :  { %1756 = vmatpush.bf16.msrb.mxu3 %v6429_v44  ;;  %v4525_v44 = vld [vmem:[#allocation5 + $0x40] sm:$0xf] }
 0x2ea   :  { %v6503_v59 = vor.u32 %v4744_v1, %v4525_v44  ;;  %v4581_v1 = vld [vmem:[#allocation5 + $0xb0] sm:$0xf] }
 0x2eb   :  { %v6565_v58 = vor.u32 %v4758_v33, %v4581_v1  ;;  %v6582_v33 = vor.u32 %v4757_v28, %v4583_v22  ;;  %v4599_v28 = vld [vmem:[#allocation5 + $0xd8] sm:$0xf0] }
 0x2ec   :  { %1757 = vmatmul.bf16.vlgmr.msrb.gmra.mxu3 %v6487_v31  ;;  %1688 = vmatmul.bf16.gmra.mxu2 %v6503_v59 }
 0x2ed   :  { %8000 = vst [vmem:[#allocation31_spill] sm:$0xff] %v6565_v58 }
 0x2ee   :  { %v6525_v24 = vpop.f32.mrf.mxu1  ;;  %8005 = vst [vmem:[#allocation36_spill] sm:$0xff] %v6582_v33 }
 0x2ef   :  { %v1669_v51 = vpop.f32.mrf.mxu2 }
 0x2f1   :  { %4661 = vmatmul.msk.bf16.gmra.mxu1 %vm271_vm0, %v6445_v50  ;;  %v4746_v50 = vld [vmem:[#allocation5 + $0x54] sm:$0xf0] }
 0x2f2   :  { %v6514_v0 = vor.u32 %v4746_v50, %v4533_v53  ;;  %v4753_v53 = vld [vmem:[#allocation5 + $0x94] sm:$0xf]  ;;  %v4567_v50 = vld [vmem:[#allocation5 + $0x98] sm:$0xf0] }
 0x2f3   :  { %v6568_v7 = vor.u32 %v4753_v53, %v4567_v50 }
 0x2f5   :  { %8001 = vst [vmem:[#allocation32_spill] sm:$0xff] %v6568_v7 }
 0x2f6   :  { %v6531_v8 = vpop.f32.mrf.mxu1 }
 0x2f7   :  { %v1671_v41 = vpop.f32.mrf.mxu2 }
 0x2fc   :  { %1762 = vmatmul.bf16.gmra.mxu3 %v6496_v20  ;;  %1693 = vmatmul.bf16.gmra.mxu2 %v6514_v0 }
 0x2fe   :  { %v6538_v37 = vpop.f32.mrf.mxu1 }
 0x301   :  { %4662 = vmatmul.msk.bf16.gmra.mxu1 %vm271_vm0, %v6451_v46  ;;  %v4748_v46 = vld [vmem:[#allocation5 + $0x64] sm:$0xf0] }
 0x302   :  { %v6523_v26 = vor.u32 %v4748_v46, %v4541_v49 }
 0x306   :  { %v6545_v29 = vpop.f32.mrf.mxu1 }
 0x30c   :  { %1767 = vmatmul.bf16.gmra.mxu3 %v6508_v47  ;;  %1698 = vmatmul.bf16.gmra.mxu2 %v6523_v26 }
 0x311   :  { %4663 = vmatmul.msk.bf16.gmra.mxu1 %vm271_vm0, %v1496_v52 }
 0x31c   :  { %1772 = vmatmul.bf16.gmra.mxu3 %v6517_v36  ;;  %1703 = vmatmul.bf16.gmra.mxu2 %v6533_v15 }
 0x321   :  { %4664 = vmatmul.msk.bf16.gmra.mxu1 %vm271_vm0, %v1497_v57 }
 0x32c   :  { %1777 = vmatmul.bf16.gmra.mxu3 %v6528_v3  ;;  %1708 = vmatmul.bf16.gmra.mxu2 %v6543_v13 }
 0x331   :  { %4665 = vmatmul.msk.bf16.gmra.mxu1 %vm271_vm0, %v6470_v32  ;;  %v4565_v32 = vld [vmem:[#allocation5 + $0x90] sm:$0xf] }
 0x332   :  { %v6553_v11 = vor.u32 %v4754_v2, %v4565_v32  ;;  %v6575_v2 = vor.u32 %v4755_v45, %v4575_v34 }
 0x334   :  { %8003 = vst [vmem:[#allocation34_spill] sm:$0xff] %v6575_v2 }
 0x336   :  { %v1674_v43 = vpop.f32.mrf.mxu2 }
 0x33c   :  { %1782 = vmatmul.bf16.gmra.mxu3 %v6540_v4  ;;  %1713 = vmatmul.bf16.gmra.mxu2 %v6553_v11 }
 0x33e   :  { %v1676_v52 = vpop.f32.mrf.mxu2 }
 0x341   :  { %4666 = vmatmul.msk.bf16.gmra.mxu1 %vm271_vm0, %v6465_v54  ;;  %v4551_v54 = vld [vmem:[#allocation5 + $0x78] sm:$0xf0] }
 0x342   :  { %v6556_v57 = vor.u32 %v4749_v30, %v4551_v54 }
 0x344   :  { %7998 = vst [vmem:[#allocation29_spill] sm:$0xff] %v6556_v57 }
 0x34c   :  { %1787 = vmatmul.bf16.gmra.mxu3 %v6550_v14  ;;  %1718 = vmatmul.bf16.gmra.mxu2 %v6559_v10 }
 0x34d   :  { %v1679_v16 = vpop.f32.mrf.mxu2 }
 0x355   :  { %v1681_v44 = vpop.f32.mrf.mxu2 }
 0x35c   :  { %1792 = vmatmul.bf16.gmra.mxu3 %v6556_v57  ;;  %1723 = vmatmul.bf16.gmra.mxu2 %v6565_v58 }
 0x35d   :  { %v1684_v39 = vpop.f32.mrf.mxu2 }
 0x365   :  { %v1686_v5 = vpop.f32.mrf.mxu2 }
 0x36c   :  { %1797 = vmatmul.bf16.gmra.mxu3 %v6562_v25  ;;  %1728 = vmatmul.bf16.gmra.mxu2 %v6572_v42 }
 0x36f   :  { %v1758_v61 = vpop.f32.mrf.mxu3 }
 0x370   :  { %v1759_v49 = vadd.f32 %v1758_v61, %v1669_v51  ;;  %v1689_v51 = vpop.f32.mrf.mxu2 }
 0x377   :  { %v1760_v12 = vpop.f32.mrf.mxu3 }
 0x378   :  { %v1761_v46 = vadd.f32 %v1760_v12, %v1671_v41  ;;  %v1691_v54 = vpop.f32.mrf.mxu2 }
 0x37a   :  { %v1843_v18 = vpack.c.bf16 %v1761_v46, %v1759_v49  ;;  %v4605_v49 = vld [vmem:[#allocation5 + $0xe0] sm:$0xf]  ;;  %v4764_v46 = vld [vmem:[#allocation5 + $0xe4] sm:$0xf0] }
 0x37c   :  { %1802 = vmatmul.bf16.gmra.mxu3 %v6568_v7  ;;  %4627 = vmatmul.msk.bf16.vlgmr.msrb.gmra.mxu0 %vm271_vm0, %v1843_v18  ;;  %v6586_v18 = vor.u32 %v4764_v46, %v4605_v49  ;;  %v4607_v49 = vld [vmem:[#allocation5 + $0xe8] sm:$0xf0] }
 0x37d   :  { %1733 = vmatmul.bf16.gmra.mxu2 %v6579_v23 }
 0x37e   :  { %8006 = vst [vmem:[#allocation37_spill] sm:$0xff] %v6586_v18 }
 0x37f   :  { %v1763_v35 = vpop.f32.mrf.mxu3 }
 0x380   :  { %v1764_v41 = vadd.f32 %v1763_v35, %v1674_v43  ;;  %v1694_v43 = vpop.f32.mrf.mxu2  ;;  %v4759_v35 = vld [vmem:[#allocation5 + $0xc4] sm:$0xf] }
 0x381   :  { %v6589_v45 = vor.u32 %v4759_v35, %v4591_v63 }
 0x383   :  { %8007 = vst [vmem:[#allocation38_spill] sm:$0xff] %v6589_v45 }
 0x387   :  { %v1765_v55 = vpop.f32.mrf.mxu3 }
 0x388   :  { %v1766_v32 = vadd.f32 %v1765_v55, %v1676_v52  ;;  %v1696_v12 = vpop.f32.mrf.mxu2 }
 0x38a   :  { %v1844_v27 = vpack.c.bf16 %v1766_v32, %v1764_v41  ;;  %v4613_v32 = vld [vmem:[#allocation5 + $0xf0] sm:$0xf] }
 0x38c   :  { %1807 = vmatmul.bf16.gmra.mxu3 %v6575_v2  ;;  %4628 = vmatmul.msk.bf16.gmra.mxu0 %vm271_vm0, %v1844_v27  ;;  %v4766_v27 = vld [vmem:[#allocation5 + $0xf4] sm:$0xf0] }
 0x38d   :  { %1738 = vmatmul.bf16.gmra.mxu2 %v6586_v18 }
 0x38f   :  { %v1768_v30 = vpop.f32.mrf.mxu3 }
 0x390   :  { %v1769_v52 = vadd.f32 %v1768_v30, %v1679_v16  ;;  %v1699_v34 = vpop.f32.mrf.mxu2  ;;  %v6593_v30 = vor.u32 %v4766_v27, %v4613_v32 }
 0x392   :  { %8008 = vst [vmem:[#allocation39_spill] sm:$0xff] %v6593_v30 }
 0x397   :  { %v1770_v61 = vpop.f32.mrf.mxu3 }
 0x398   :  { %v1771_v1 = vadd.f32 %v1770_v61, %v1681_v44  ;;  %v1701_v9 = vpop.f32.mrf.mxu2  ;;  %v6596_v61 = vor.u32 %v4761_v6, %v4599_v28 }
 0x39a   :  { %v1845_v53 = vpack.c.bf16 %v1771_v1, %v1769_v52  ;;  %8009 = vst [vmem:[#allocation40_spill] sm:$0xff] %v6596_v61 }
 0x39c   :  { %1812 = vmatmul.bf16.gmra.mxu3 %v6582_v33  ;;  %4629 = vmatmul.msk.bf16.gmra.mxu0 %vm271_vm0, %v1845_v53 }
 0x39d   :  { %1743 = vmatmul.bf16.gmra.mxu2 %v6593_v30 }
 0x39f   :  { %v1773_v50 = vpop.f32.mrf.mxu3 }
 0x3a0   :  { %v1774_v16 = vadd.f32 %v1773_v50, %v1684_v39  ;;  %v1704_v1 = vpop.f32.mrf.mxu2  ;;  %v4763_v50 = vld [vmem:[#allocation5 + $0xe4] sm:$0xf] }
 0x3a7   :  { %v1775_v56 = vpop.f32.mrf.mxu3 }
 0x3a8   :  { %v1776_v44 = vadd.f32 %v1775_v56, %v1686_v5  ;;  %v1706_v35 = vpop.f32.mrf.mxu2 }
 0x3aa   :  { %v1846_v55 = vpack.c.bf16 %v1776_v44, %v1774_v16  ;;  %v6600_v16 = vor.u32 %v4763_v50, %v4607_v49 }
 0x3ac   :  { %1817 = vmatmul.bf16.gmra.mxu3 %v6589_v45  ;;  %4630 = vmatmul.msk.bf16.gmra.mxu0 %vm271_vm0, %v1846_v55  ;;  %8010 = vst [vmem:[#allocation41_spill] sm:$0xff] %v6600_v16  ;;  %v4765_v55 = vld [vmem:[#allocation5 + $0xf4] sm:$0xf] }
 0x3af   :  { %v1778_v41 = vpop.f32.mrf.mxu3 }
 0x3b0   :  { %v1779_v5 = vadd.f32 %v1778_v41, %v1689_v51  ;;  %v4615_v41 = vld [vmem:[#allocation5 + $0xf8] sm:$0xf0] }
 0x3b1   :  { %v6604_v28 = vor.u32 %v4765_v55, %v4615_v41 }
 0x3b3   :  { %8011 = vst [vmem:[#allocation42_spill] sm:$0xff] %v6604_v28 }
 0x3b7   :  { %v1780_v39 = vpop.f32.mrf.mxu3 }
 0x3b8   :  { %v1781_v22 = vadd.f32 %v1780_v39, %v1691_v54  ;;  %v1709_v54 = vpop.f32.mrf.mxu2 }
 0x3ba   :  { %v1847_v52 = vpack.c.bf16 %v1781_v22, %v1779_v5 }
 0x3bc   :  { %1822 = vmatmul.bf16.gmra.mxu3 %v6596_v61  ;;  %4631 = vmatmul.msk.bf16.gmra.mxu0 %vm271_vm0, %v1847_v52 }
 0x3bf   :  { %v1783_v53 = vpop.f32.mrf.mxu3 }
 0x3c0   :  { %v1784_v63 = vadd.f32 %v1783_v53, %v1694_v43  ;;  %v1711_v5 = vpop.f32.mrf.mxu2 }
 0x3c7   :  { %v1785_v46 = vpop.f32.mrf.mxu3 }
 0x3c8   :  { %v1786_v56 = vadd.f32 %v1785_v46, %v1696_v12  ;;  %v1714_v12 = vpop.f32.mrf.mxu2 }
 0x3ca   :  { %v1848_v44 = vpack.c.bf16 %v1786_v56, %v1784_v63 }
 0x3cc   :  { %1827 = vmatmul.bf16.gmra.mxu3 %v6600_v16  ;;  %4632 = vmatmul.msk.bf16.gmra.mxu0 %vm271_vm0, %v1848_v44 }
 0x3cf   :  { %v1788_v51 = vpop.f32.mrf.mxu3 }
 0x3d0   :  { %v1789_v27 = vadd.f32 %v1788_v51, %v1699_v34  ;;  %v1716_v46 = vpop.f32.mrf.mxu2  ;;  %v6609_v34 = vld [vmem:[#allocation11] sm:$0xf] }
 0x3d1   :  { %v6612_v44 = vperm.slane %v6609_v34, 0 }
 0x3d7   :  { %v1790_v32 = vpop.f32.mrf.mxu3 }
 0x3d8   :  { %v1791_v6 = vadd.f32 %v1790_v32, %v1701_v9  ;;  %v1719_v55 = vpop.f32.mrf.mxu2 }
 0x3da   :  { %v1849_v39 = vpack.c.bf16 %v1791_v6, %v1789_v27 }
 0x3dc   :  { %1832 = vmatmul.bf16.gmra.mxu3 %v6604_v28  ;;  %4633 = vmatmul.msk.bf16.gmra.mxu0 %vm271_vm0, %v1849_v39 }
 0x3df   :  { %v1793_v43 = vpop.f32.mrf.mxu3 }
 0x3e0   :  { %v1794_v52 = vadd.f32 %v1793_v43, %v1704_v1 }
 0x3e7   :  { %v1795_v22 = vpop.f32.mrf.mxu3 }
 0x3e8   :  { %v1796_v53 = vadd.f32 %v1795_v22, %v1706_v35 }
 0x3ea   :  { %v1850_v50 = vpack.c.bf16 %v1796_v53, %v1794_v52 }
 0x3ec   :  { %4634 = vmatmul.msk.bf16.gmra.mxu0 %vm271_vm0, %v1850_v50 }
 0x3ef   :  { %v1798_v49 = vpop.f32.mrf.mxu3 }
 0x3f0   :  { %v1799_v63 = vadd.f32 %v1798_v49, %v1709_v54 }
 0x3f7   :  { %v1800_v9 = vpop.f32.mrf.mxu3 }
 0x3f8   :  { %v1801_v56 = vadd.f32 %v1800_v9, %v1711_v5  ;;  %v1721_v5 = vpop.f32.mrf.mxu2 }
 0x3f9   :  { %v1932_v51 = vpop.f32.mrf.mxu0 }
 0x3fa   :  { %v1851_v41 = vpack.c.bf16 %v1801_v56, %v1799_v63  ;;  %v2082_v32 = vadd.f32 %v6498_v21, %v1932_v51  ;;  %v6634_v51 = vpop.f32.mrf.mxu1 }
 0x3fc   :  { %v6616_v1 = vadd.f32 %v6612_v44, %v2082_v32  ;;  %4635 = vmatmul.msk.bf16.gmra.mxu0 %vm271_vm0, %v1851_v41 }
 0x3fe   :  { %v2195_v35 = vsel %vm2194_vm8, %v6616_v1, 0.0  ;;  %v2330_v54 = vmul.f32 %v6616_v1, %v6616_v1 }
 0x3ff   :  { %v1803_v27 = vpop.f32.mrf.mxu3  ;;  %2196 = vadd.xlane.f32.xlu1 %v2195_v35 }
 0x400   :  { %v2362_v6 = vsel %vm2194_vm8, %v2330_v54, 0.0  ;;  %v1804_v50 = vadd.f32 %v1803_v27, %v1714_v12  ;;  %v1724_v32 = vpop.f32.mrf.mxu2 }
 0x401   :  { %2363 = vadd.xlane.f32.xlu0 %v2362_v6  ;;  %v1934_v39 = vpop.f32.mrf.mxu0 }
 0x402   :  { %v2084_v21 = vadd.f32 %v6506_v48, %v1934_v39  ;;  %v6649_v39 = vpop.f32.mrf.mxu1 }
 0x404   :  { %v6626_v43 = vadd.f32 %v6612_v44, %v2084_v21 }
 0x406   :  { %v2198_v22 = vsel %vm2194_vm8, %v6626_v43, 0.0  ;;  %v2331_v52 = vmul.f32 %v6626_v43, %v6626_v43 }
 0x407   :  { %v1805_v53 = vpop.f32.mrf.mxu3  ;;  %2199 = vadd.xlane.f32.xlu2 %v2198_v22 }
 0x408   :  { %v1806_v49 = vadd.f32 %v1805_v53, %v1716_v46  ;;  %v2365_v9 = vsel %vm2194_vm8, %v2331_v52, 0.0  ;;  %v1726_v53 = vpop.f32.mrf.mxu2 }
 0x409   :  { %2366 = vadd.xlane.f32.xlu1 %v2365_v9  ;;  %v1937_v63 = vpop.f32.mrf.mxu0 }
 0x40a   :  { %v1852_v56 = vpack.c.bf16 %v1806_v49, %v1804_v50  ;;  %v2087_v48 = vadd.f32 %v6511_v19, %v1937_v63 }
 0x40c   :  { %v6637_v41 = vadd.f32 %v6612_v44, %v2087_v48  ;;  %4636 = vmatmul.msk.bf16.gmra.mxu0 %vm271_vm0, %v1852_v56 }
 0x40e   :  { %v2201_v35 = vsel %vm2194_vm8, %v6637_v41, 0.0  ;;  %v2332_v12 = vmul.f32 %v6637_v41, %v6637_v41 }
 0x40f   :  { %v1808_v46 = vpop.f32.mrf.mxu3  ;;  %2202 = vadd.xlane.f32.xlu2 %v2201_v35 }
 0x410   :  { %v2368_v54 = vsel %vm2194_vm8, %v2332_v12, 0.0  ;;  %v1809_v50 = vadd.f32 %v1808_v46, %v1719_v55  ;;  %v6665_v55 = vpop.f32.mrf.mxu1 }
 0x411   :  { %2369 = vadd.xlane.f32.xlu1 %v2368_v54  ;;  %v1939_v19 = vpop.f32.mrf.mxu0 }
 0x412   :  { %v2089_v27 = vadd.f32 %v6519_v38, %v1939_v19 }
 0x414   :  { %v6647_v6 = vadd.f32 %v6612_v44, %v2089_v27 }
 0x416   :  { %v2204_v21 = vsel %vm2194_vm8, %v6647_v6, 0.0  ;;  %v2333_v22 = vmul.f32 %v6647_v6, %v6647_v6 }
 0x417   :  { %v1810_v52 = vpop.f32.mrf.mxu3  ;;  %2205 = vadd.xlane.f32.xlu0 %v2204_v21 }
 0x418   :  { %v1811_v49 = vadd.f32 %v1810_v52, %v1721_v5  ;;  %v2371_v9 = vsel %vm2194_vm8, %v2333_v22, 0.0 }
 0x419   :  { %2372 = vadd.xlane.f32.xlu2 %v2371_v9  ;;  %v1942_v38 = vpop.f32.mrf.mxu0 }
 0x41a   :  { %v1853_v63 = vpack.c.bf16 %v1811_v49, %v1809_v50  ;;  %v2092_v56 = vadd.f32 %v6525_v24, %v1942_v38  ;;  %v1729_v24 = vpop.f32.mrf.mxu2  ;;  %v6677_v38 = vpop.f32.mrf.mxu1 }
 0x41c   :  { %v6658_v48 = vadd.f32 %v6612_v44, %v2092_v56  ;;  %4637 = vmatmul.msk.bf16.gmra.mxu0 %vm271_vm0, %v1853_v63 }
 0x41e   :  { %v2207_v35 = vsel %vm2194_vm8, %v6658_v48, 0.0  ;;  %v2334_v12 = vmul.f32 %v6658_v48, %v6658_v48 }
 0x41f   :  { %v1813_v5 = vpop.f32.mrf.mxu3  ;;  %2208 = vadd.xlane.f32.xlu0 %v2207_v35 }
 0x420   :  { %v2374_v46 = vsel %vm2194_vm8, %v2334_v12, 0.0  ;;  %v1814_v50 = vadd.f32 %v1813_v5, %v1724_v32 }
 0x421   :  { %2375 = vadd.xlane.f32.xlu2 %v2374_v46  ;;  %v1944_v54 = vpop.f32.mrf.mxu0 }
 0x422   :  { %v2094_v19 = vadd.f32 %v6531_v8, %v1944_v54  ;;  %v1731_v35 = vpop.f32.mrf.mxu2 }
 0x424   :  { %v6670_v27 = vadd.f32 %v6612_v44, %v2094_v19  ;;  %v6690_v19 = vpop.f32.mrf.mxu1 }
 0x426   :  { %v2210_v21 = vsel %vm2194_vm8, %v6670_v27, 0.0  ;;  %v2335_v22 = vmul.f32 %v6670_v27, %v6670_v27 }
 0x427   :  { %v1815_v52 = vpop.f32.mrf.mxu3  ;;  %2211 = vadd.xlane.f32.xlu1 %v2210_v21 }
 0x428   :  { %v1816_v49 = vadd.f32 %v1815_v52, %v1726_v53  ;;  %v2377_v9 = vsel %vm2194_vm8, %v2335_v22, 0.0 }
 0x429   :  { %2378 = vadd.xlane.f32.xlu0 %v2377_v9  ;;  %v1947_v63 = vpop.f32.mrf.mxu0 }
 0x42a   :  { %v1854_v8 = vpack.c.bf16 %v1816_v49, %v1814_v50  ;;  %v2097_v56 = vadd.f32 %v6538_v37, %v1947_v63  ;;  %v1734_v22 = vpop.f32.mrf.mxu2 }
 0x42c   :  { %v6681_v12 = vadd.f32 %v6612_v44, %v2097_v56  ;;  %4638 = vmatmul.msk.bf16.gmra.mxu0 %vm271_vm0, %v1854_v8 }
 0x42e   :  { %v2213_v46 = vsel %vm2194_vm8, %v6681_v12, 0.0  ;;  %v2336_v32 = vmul.f32 %v6681_v12, %v6681_v12 }
 0x42f   :  { %v1818_v53 = vpop.f32.mrf.mxu3  ;;  %2214 = vadd.xlane.f32.xlu1 %v2213_v46 }
 0x430   :  { %v2380_v5 = vsel %vm2194_vm8, %v2336_v32, 0.0  ;;  %v1819_v9 = vadd.f32 %v1818_v53, %v1729_v24 }
 0x431   :  { %2381 = vadd.xlane.f32.xlu0 %v2380_v5  ;;  %v1949_v54 = vpop.f32.mrf.mxu0  ;;  %v6705_v5 = vpop.f32.mrf.mxu1 }
 0x432   :  { %v2099_v37 = vadd.f32 %v6545_v29, %v1949_v54 }
 0x434   :  { %v6693_v21 = vadd.f32 %v6612_v44, %v2099_v37 }
 0x436   :  { %v2216_v52 = vsel %vm2194_vm8, %v6693_v21, 0.0  ;;  %v2337_v50 = vmul.f32 %v6693_v21, %v6693_v21 }
 0x437   :  { %v1820_v49 = vpop.f32.mrf.mxu3  ;;  %2217 = vadd.xlane.f32.xlu2 %v2216_v52 }
 0x438   :  { %v1821_v63 = vadd.f32 %v1820_v49, %v1731_v35  ;;  %v2383_v8 = vsel %vm2194_vm8, %v2337_v50, 0.0  ;;  %v1736_v35 = vpop.f32.mrf.mxu2 }
 0x439   :  { %2384 = vadd.xlane.f32.xlu1 %v2383_v8  ;;  %v1952_v29 = vpop.f32.mrf.mxu0 }
 0x43a   :  { %v1855_v56 = vpack.c.bf16 %v1821_v63, %v1819_v9  ;;  %v2102_v46 = vadd.f32 %v6634_v51, %v1952_v29  ;;  %v6720_v63 = vpop.f32.mrf.mxu1 }
 0x43c   :  { %v6702_v32 = vadd.f32 %v6612_v44, %v2102_v46  ;;  %4639 = vmatmul.msk.bf16.gmra.mxu0 %vm271_vm0, %v1855_v56 }
 0x43e   :  { %v2219_v54 = vsel %vm2194_vm8, %v6702_v32, 0.0  ;;  %v2338_v24 = vmul.f32 %v6702_v32, %v6702_v32 }
 0x43f   :  { %v1823_v53 = vpop.f32.mrf.mxu3  ;;  %2220 = vadd.xlane.f32.xlu2 %v2219_v54 }
 0x440   :  { %v2386_v37 = vsel %vm2194_vm8, %v2338_v24, 0.0  ;;  %v1824_v29 = vadd.f32 %v1823_v53, %v1734_v22  ;;  %v1739_v54 = vpop.f32.mrf.mxu2 }
 0x441   :  { %2387 = vadd.xlane.f32.xlu1 %v2386_v37  ;;  %v1954_v51 = vpop.f32.mrf.mxu0 }
 0x442   :  { %v2104_v52 = vadd.f32 %v6649_v39, %v1954_v51 }
 0x444   :  { %v6714_v50 = vadd.f32 %v6612_v44, %v2104_v52 }
 0x446   :  { %v2222_v49 = vsel %vm2194_vm8, %v6714_v50, 0.0  ;;  %v2339_v9 = vmul.f32 %v6714_v50, %v6714_v50 }
 0x447   :  { %v1825_v8 = vpop.f32.mrf.mxu3  ;;  %2223 = vadd.xlane.f32.xlu0 %v2222_v49  ;;  %v2118_v49 = vpop.f32.mrf.mxu1 }
 0x448   :  { %v1826_v56 = vadd.f32 %v1825_v8, %v1736_v35  ;;  %v2389_v46 = vsel %vm2194_vm8, %v2339_v9, 0.0  ;;  %v1741_v8 = vpop.f32.mrf.mxu2 }
 0x449   :  { %2390 = vadd.xlane.f32.xlu2 %v2389_v46  ;;  %v1957_v39 = vpop.f32.mrf.mxu0 }
 0x44a   :  { %v1856_v24 = vpack.c.bf16 %v1826_v56, %v1824_v29  ;;  %v2107_v37 = vadd.f32 %v6665_v55, %v1957_v39 }
 0x44c   :  { %v6725_v51 = vadd.f32 %v6612_v44, %v2107_v37  ;;  %4640 = vmatmul.msk.bf16.gmra.mxu0 %vm271_vm0, %v1856_v24  ;;  %v5218_v24 = vmov 64.0  }
 0x44d   :  { %4874 = vrcp.f32 %v5218_v24 }
 0x44e   :  { %v2225_v52 = vsel %vm2194_vm8, %v6725_v51, 0.0  ;;  %v2340_v22 = vmul.f32 %v6725_v51, %v6725_v51 }
 0x44f   :  { %v1828_v35 = vpop.f32.mrf.mxu3  ;;  %2226 = vadd.xlane.f32.xlu0 %v2225_v52 }
 0x450   :  { %v2392_v53 = vsel %vm2194_vm8, %v2340_v22, 0.0  ;;  %v1829_v37 = vadd.f32 %v1828_v35, %v1739_v54 }
 0x451   :  { %2393 = vadd.xlane.f32.xlu2 %v2392_v53  ;;  %v1959_v9 = vpop.f32.mrf.mxu0 }
 0x452   :  { %v2109_v55 = vadd.f32 %v6677_v38, %v1959_v9 }
 0x453   :  { %v4875_v16 = vpop.eup %4874 }
 0x454   :  { %v6735_v29 = vadd.f32 %v6612_v44, %v2109_v55  ;;  %v6743_v55 = vpop.f32.mrf.mxu1  ;;  %vm2296_vm9 = vweird.f32 %v4875_v16 }
 0x456   :  { %v2228_v56 = vsel %vm2194_vm8, %v6735_v29, 0.0  ;;  %v2341_v46 = vmul.f32 %v6735_v29, %v6735_v29 }
 0x457   :  { %v1830_v39 = vpop.f32.mrf.mxu3  ;;  %2229 = vadd.xlane.f32.xlu1 %v2228_v56  ;;  %v1744_v56 = vpop.f32.mrf.mxu2 }
 0x458   :  { %v1831_v52 = vadd.f32 %v1830_v39, %v1741_v8  ;;  %v2395_v22 = vsel %vm2194_vm8, %v2341_v46, 0.0 }
 0x459   :  { %2396 = vadd.xlane.f32.xlu0 %v2395_v22  ;;  %v1962_v38 = vpop.f32.mrf.mxu0 }
 0x45a   :  { %v1857_v53 = vpack.c.bf16 %v1831_v52, %v1829_v37  ;;  %v2112_v9 = vadd.f32 %v6690_v19, %v1962_v38  ;;  %v2292_v19 = vmul.f32 64.0, %v4875_v16 }
 0x45c   :  { %v6746_v28 = vadd.f32 %v6612_v44, %v2112_v9  ;;  %4641 = vmatmul.msk.bf16.gmra.mxu0 %vm271_vm0, %v1857_v53  ;;  %v2293_v52 = vsub.f32 1.0, %v2292_v19  ;;  %v6758_v22 = vpop.f32.mrf.mxu1 }
 0x45e   :  { %v2231_v54 = vsel %vm2194_vm8, %v6746_v28, 0.0  ;;  %v2342_v35 = vmul.f32 %v6746_v28, %v6746_v28 }
 0x45f   :  { %v1833_v8 = vpop.f32.mrf.mxu3  ;;  %2232 = vadd.xlane.f32.xlu1 %v2231_v54  ;;  %v1746_v9 = vpop.f32.mrf.mxu2 }
 0x460   :  { %v2398_v46 = vsel %vm2194_vm8, %v2342_v35, 0.0  ;;  %v1834_v35 = vadd.f32 %v1833_v8, %v1744_v56 }
 0x461   :  { %2399 = vadd.xlane.f32.xlu0 %v2398_v46  ;;  %v1964_v39 = vpop.f32.mrf.mxu0 }
 0x462   :  { %v2114_v24 = vadd.f32 %v6705_v5, %v1964_v39  ;;  %v2294_v5 = vmul.f32 %v4875_v16, %v2293_v52 }
 0x464   :  { %v6756_v37 = vadd.f32 %v6612_v44, %v2114_v24  ;;  %v2295_v33 = vadd.f32 %v4875_v16, %v2294_v5  ;;  %v6774_v8 = vpop.f32.mrf.mxu1 }
 0x466   :  { %v2234_v38 = vsel %vm2194_vm8, %v6756_v37, 0.0  ;;  %v2343_v53 = vmul.f32 %v6756_v37, %v6756_v37  ;;  %v6777_v52 = vsel %vm2296_vm9, %v4875_v16, %v2295_v33 }
 0x467   :  { %v1835_v54 = vpop.f32.mrf.mxu3  ;;  %2235 = vadd.xlane.f32.xlu2 %v2234_v38 }
 0x468   :  { %v1836_v46 = vadd.f32 %v1835_v54, %v1746_v9  ;;  %v2401_v61 = vsel %vm2194_vm8, %v2343_v53, 0.0 }
 0x469   :  { %2402 = vadd.xlane.f32.xlu1 %v2401_v61  ;;  %v1967_v39 = vpop.f32.mrf.mxu0 }
 0x46a   :  { %v1858_v24 = vpack.c.bf16 %v1836_v46, %v1834_v35  ;;  %v2117_v19 = vadd.f32 %v6720_v63, %v1967_v39  ;;  %v4778_v63 = vld [vmem:[#allocation13 + $0x18] sm:$0xff]  ;;  %v4777_v39 = vld [vmem:[#allocation13 + $0x10] sm:$0xff] }
 0x46b   :  { %3169 = vmatpush.bf16.msrb.mxu2 %v4778_v63 }
 0x46c   :  { %v6767_v45 = vadd.f32 %v6612_v44, %v2117_v19  ;;  %4642 = vmatmul.msk.bf16.gmra.mxu0 %vm271_vm0, %v1858_v24 }
 0x46e   :  { %v2237_v38 = vsel %vm2194_vm8, %v6767_v45, 0.0  ;;  %v2344_v56 = vmul.f32 %v6767_v45, %v6767_v45 }
 0x46f   :  { %2238 = vadd.xlane.f32.xlu2 %v2237_v38  ;;  %3170 = vmatpush.bf16.msrb.mxu2 %v4777_v39 }
 0x470   :  { %v2404_v61 = vsel %vm2194_vm8, %v2344_v56, 0.0  ;;  %v4776_v56 = vld [vmem:[#allocation13 + $0x8] sm:$0xff] }
 0x471   :  { %2405 = vadd.xlane.f32.xlu1 %v2404_v61  ;;  %v1969_v53 = vpop.f32.mrf.mxu0  ;;  %v6793_v61 = vpop.f32.mrf.mxu1 }
 0x472   :  { %v2119_v9 = vadd.f32 %v2118_v49, %v1969_v53  ;;  %v2197_v54 = vpop.xlane.xlu1 %2196 }
 0x473   :  { %v6780_v35 = vmul.f32 %v6777_v52, %v2197_v54  ;;  %3171 = vmatpush.bf16.msrb.mxu2 %v4776_v56 }
 0x474   :  { %v6783_v46 = vadd.f32 %v6612_v44, %v2119_v9  ;;  %v2364_v5 = vpop.xlane.xlu0 %2363 }
 0x475   :  { %v2490_v24 = vmul.f32 %v6780_v35, %v6780_v35  ;;  %v2458_v33 = vmul.f32 %v2364_v5, %v6777_v52 }
 0x476   :  { %v2240_v16 = vsel %vm2194_vm8, %v6783_v46, 0.0  ;;  %v2345_v49 = vmul.f32 %v6783_v46, %v6783_v46 }
 0x477   :  { %v2522_v19 = vsub.f32 %v2458_v33, %v2490_v24  ;;  %2241 = vadd.xlane.f32.xlu0 %v2240_v16  ;;  %v4775_v33 = vld [vmem:[#allocation13] sm:$0xff] }
 0x478   :  { %v2407_v38 = vsel %vm2194_vm8, %v2345_v49, 0.0  ;;  %3172 = vmatpush.bf16.msrb.mxu2 %v4775_v33 }
 0x479   :  { %v2554_v63 = vmax.f32 %v2522_v19, 0.0  ;;  %2408 = vadd.xlane.f32.xlu2 %v2407_v38  ;;  %v1972_v53 = vpop.f32.mrf.mxu0  ;;  %v6811_v18 = vpop.f32.mrf.mxu1 }
 0x47a   :  { %v2122_v9 = vadd.f32 %v6743_v55, %v1972_v53  ;;  %v2200_v54 = vpop.xlane.xlu2 %2199 }
 0x47b   :  { %v2618_v5 = vadd.f32 1e-05, %v2554_v63  ;;  %v6797_v30 = vmul.f32 %v6777_v52, %v2200_v54 }
 0x47c   :  { %v6800_v39 = vadd.f32 %v6612_v44, %v2122_v9  ;;  %v2367_v24 = vpop.xlane.xlu1 %2366 }
 0x47d   :  { %4876 = vrsqrt.f32 %v2618_v5  ;;  %v2491_v16 = vmul.f32 %v6797_v30, %v6797_v30  ;;  %v2459_v49 = vmul.f32 %v2367_v24, %v6777_v52  ;;  %vm2656_vm10 = vweird.f32 %v2618_v5 }
 0x47e   :  { %v2243_v55 = vsel %vm2194_vm8, %v6800_v39, 0.0  ;;  %v2346_v19 = vmul.f32 %v6800_v39, %v6800_v39 }
 0x47f   :  { %2244 = vadd.xlane.f32.xlu0 %v2243_v55  ;;  %v2523_v38 = vsub.f32 %v2459_v49, %v2491_v16 }
 0x480   :  { %v2410_v56 = vsel %vm2194_vm8, %v2346_v19, 0.0 }
 0x481   :  { %2411 = vadd.xlane.f32.xlu2 %v2410_v56  ;;  %v1974_v63 = vpop.f32.mrf.mxu0  ;;  %v2555_v53 = vmax.f32 %v2523_v38, 0.0 }
 0x482   :  { %v2124_v9 = vadd.f32 %v6758_v22, %v1974_v63  ;;  %v2203_v54 = vpop.xlane.xlu2 %2202 }
 0x483   :  { %v4877_v2 = vpop.eup %4876  ;;  %v6814_v24 = vmul.f32 %v6777_v52, %v2203_v54  ;;  %v2619_v23 = vadd.f32 1e-05, %v2555_v53 }
 0x484   :  { %v2651_v7 = vmul.f32 %v4877_v2, %v2618_v5  ;;  %v6817_v33 = vadd.f32 %v6612_v44, %v2124_v9  ;;  %v2370_v16 = vpop.xlane.xlu1 %2369  ;;  %vm2657_vm0 = vweird.f32 %v4877_v2 }
 0x485   :  { %v2492_v49 = vmul.f32 %v6814_v24, %v6814_v24  ;;  %v2460_v55 = vmul.f32 %v2370_v16, %v6777_v52  ;;  %4878 = vrsqrt.f32 %v2619_v23  ;;  %vm6846_vm11 = vmor %vm2656_vm10, %vm2657_vm0  ;;  %vm2666_vm13 = vweird.f32 %v2619_v23 }
 0x486   :  { %v2652_v19 = vmul.f32 %v4877_v2, %v2651_v7  ;;  %v2246_v22 = vsel %vm2194_vm8, %v6817_v33, 0.0  ;;  %v2347_v56 = vmul.f32 %v6817_v33, %v6817_v33 }
 0x487   :  { %v2524_v38 = vsub.f32 %v2460_v55, %v2492_v49  ;;  %2247 = vadd.xlane.f32.xlu1 %v2246_v22 }
 0x488   :  { %v2653_v63 = vmul.f32 0.5, %v2652_v19  ;;  %v2413_v9 = vsel %vm2194_vm8, %v2347_v56, 0.0  ;;  %v6836_v19 = vpop.f32.mrf.mxu1 }
 0x489   :  { %v2556_v53 = vmax.f32 %v2524_v38, 0.0  ;;  %v1977_v54 = vpop.f32.mrf.mxu0  ;;  %2414 = vadd.xlane.f32.xlu0 %v2413_v9 }
 0x48a   :  { %v2654_v25 = vsub.f32 1.5, %v2653_v63  ;;  %v2127_v57 = vadd.f32 %v6774_v8, %v1977_v54  ;;  %v2206_v16 = vpop.xlane.xlu0 %2205 }
 0x48b   :  { %v6828_v7 = vadd.f32 1e-05, %v2556_v53  ;;  %v6831_v42 = vmul.f32 %v6777_v52, %v2206_v16  ;;  %v4879_v49 = vpop.eup %4878 }
 0x48c   :  { %v6834_v55 = vadd.f32 %v6612_v44, %v2127_v57  ;;  %v2373_v22 = vpop.xlane.xlu2 %2372  ;;  %v2655_v38 = vmul.f32 %v4877_v2, %v2654_v25  ;;  %v2661_v56 = vmul.f32 %v4879_v49, %v2619_v23  ;;  %vm2667_vm12 = vweird.f32 %v4879_v49 }
 0x48d   :  { %4880 = vrsqrt.f32 %v6828_v7  ;;  %v2493_v8 = vmul.f32 %v6831_v42, %v6831_v42  ;;  %v2461_v63 = vmul.f32 %v2373_v22, %v6777_v52  ;;  %vm2668_vm14 = vmor %vm2666_vm13, %vm2667_vm12  ;;  %vm2676_vm1 = vweird.f32 %v6828_v7 }
 0x48e   :  { %v2662_v53 = vmul.f32 %v4879_v49, %v2661_v56  ;;  %v2249_v9 = vsel %vm2194_vm8, %v6834_v55, 0.0  ;;  %v2348_v57 = vmul.f32 %v6834_v55, %v6834_v55  ;;  %v2659_v16 = vsel %vm6846_vm11, %v4877_v2, %v2655_v38 }
 0x48f   :  { %v2525_v25 = vsub.f32 %v2461_v63, %v2493_v8  ;;  %2250 = vadd.xlane.f32.xlu1 %v2249_v9  ;;  %v2586_v56 = vsub.f32 %v6616_v1, %v6780_v35  ;;  %v6859_v8 = vperm.slane %v6609_v34, 1 }
 0x490   :  { %v2663_v14 = vmul.f32 0.5, %v2662_v53  ;;  %v2416_v22 = vsel %vm2194_vm8, %v2348_v57, 0.0 }
 0x491   :  { %v1979_v5 = vpop.f32.mrf.mxu0  ;;  %v2557_v4 = vmax.f32 %v2525_v25, 0.0  ;;  %2417 = vadd.xlane.f32.xlu0 %v2416_v22  ;;  %v2970_v38 = vmul.f32 %v2659_v16, %v2586_v56  ;;  %v6885_v22 = vperm.slane %v6609_v34, 2 }
 0x492   :  { %v2129_v3 = vadd.f32 %v6793_v61, %v1979_v5  ;;  %v2209_v36 = vpop.xlane.xlu0 %2208  ;;  %v2664_v63 = vsub.f32 1.5, %v2663_v14 }
 0x493   :  { %v6856_v58 = vpop.eup %4880  ;;  %v6862_v2 = vmul.f32 %v6777_v52, %v2209_v36  ;;  %v6866_v1 = vadd.f32 1e-05, %v2557_v4  ;;  %v2587_v36 = vsub.f32 %v6626_v43, %v6797_v30  ;;  %v6880_v4 = vpop.f32.mrf.mxu1  ;;  %v3003_v30 = vmul.f32 %v6859_v8, %v2970_v38 }
 0x494   :  { %v2671_v53 = vmul.f32 %v6856_v58, %v6828_v7  ;;  %v6869_v35 = vadd.f32 %v6612_v44, %v2129_v3  ;;  %v2376_v61 = vpop.xlane.xlu2 %2375  ;;  %v2665_v9 = vmul.f32 %v4879_v49, %v2664_v63  ;;  %vm2677_vm15 = vweird.f32 %v6856_v58 }
 0x495   :  { %v2494_v57 = vmul.f32 %v6862_v2, %v6862_v2  ;;  %v2462_v14 = vmul.f32 %v2376_v61, %v6777_v52  ;;  %4882 = vrsqrt.f32 %v6866_v1  ;;  %vm6911_vm2 = vmor %vm2676_vm1, %vm2677_vm15  ;;  %vm2686_vm4 = vweird.f32 %v6866_v1 }
 0x496   :  { %v2672_v54 = vmul.f32 %v6856_v58, %v2671_v53  ;;  %v2252_v3 = vsel %vm2194_vm8, %v6869_v35, 0.0  ;;  %v2669_v25 = vsel %vm2668_vm14, %v4879_v49, %v2665_v9  ;;  %v2349_v16 = vmul.f32 %v6869_v35, %v6869_v35 }
 0x497   :  { %v2526_v23 = vsub.f32 %v2462_v14, %v2494_v57  ;;  %2253 = vadd.xlane.f32.xlu2 %v2252_v3  ;;  %v2971_v43 = vmul.f32 %v2669_v25, %v2587_v36 }
 0x498   :  { %v2673_v5 = vmul.f32 0.5, %v2672_v54  ;;  %v2419_v63 = vsel %vm2194_vm8, %v2349_v16, 0.0  ;;  %v3036_v54 = vadd.f32 %v6885_v22, %v3003_v30 }
 0x499   :  { %v2558_v56 = vmax.f32 %v2526_v23, 0.0  ;;  %v1982_v53 = vpop.f32.mrf.mxu0  ;;  %v3004_v61 = vmul.f32 %v6859_v8, %v2971_v43  ;;  %2420 = vadd.xlane.f32.xlu1 %v2419_v63 }
 0x49a   :  { %v2674_v47 = vsub.f32 1.5, %v2673_v5  ;;  %v2132_v49 = vadd.f32 %v6811_v18, %v1982_v53  ;;  %v2212_v9 = vpop.xlane.xlu1 %2211 }
 0x49b   :  { %v6891_v57 = vadd.f32 1e-05, %v2558_v56  ;;  %v6894_v34 = vmul.f32 %v6777_v52, %v2212_v9  ;;  %v4883_v14 = vpop.eup %4882  ;;  %v3037_v3 = vadd.f32 %v6885_v22, %v3004_v61  ;;  %v6917_v53 = vpop.f32.mrf.mxu1  ;;  %v2588_v9 = vsub.f32 %v6637_v41, %v6814_v24 }
 0x49c   :  { %v6897_v38 = vadd.f32 %v6612_v44, %v2132_v49  ;;  %v2379_v36 = vpop.xlane.xlu0 %2378  ;;  %v2675_v25 = vmul.f32 %v6856_v58, %v2674_v47  ;;  %v2681_v18 = vmul.f32 %v4883_v14, %v6866_v1  ;;  %vm2687_vm3 = vweird.f32 %v4883_v14 }
 0x49d   :  { %4884 = vrsqrt.f32 %v6891_v57  ;;  %v2495_v23 = vmul.f32 %v6894_v34, %v6894_v34  ;;  %v2463_v16 = vmul.f32 %v2379_v36, %v6777_v52  ;;  %v3068_v5 = vpack.c.bf16 %v3037_v3, %v3036_v54  ;;  %vm2688_vm5 = vmor %vm2686_vm4, %vm2687_vm3 }
 0x49e   :  { %v2682_v43 = vmul.f32 %v4883_v14, %v2681_v18  ;;  %v2255_v30 = vsel %vm2194_vm8, %v6897_v38, 0.0  ;;  %v2350_v63 = vmul.f32 %v6897_v38, %v6897_v38  ;;  %v2679_v7 = vsel %vm6911_vm2, %v6856_v58, %v2675_v25 }
 0x49f   :  { %v2527_v56 = vsub.f32 %v2463_v16, %v2495_v23  ;;  %2256 = vadd.xlane.f32.xlu2 %v2255_v30  ;;  %4683 = vmatmul.msk.bf16.vlgmr.msrb.gmra.mxu2 %vm2194_vm8, %v3068_v5  ;;  %v2972_v25 = vmul.f32 %v2679_v7, %v2588_v9  ;;  %vm2696_vm7 = vweird.f32 %v6891_v57 }
 0x4a0   :  { %v2683_v61 = vmul.f32 0.5, %v2682_v43  ;;  %v2422_v54 = vsel %vm2194_vm8, %v2350_v63, 0.0 }
 0x4a1   :  { %v1984_v49 = vpop.f32.mrf.mxu0  ;;  %v2559_v36 = vmax.f32 %v2527_v56, 0.0  ;;  %2423 = vadd.xlane.f32.xlu1 %v2422_v54  ;;  %v2589_v56 = vsub.f32 %v6647_v6, %v6831_v42  ;;  %v3005_v54 = vmul.f32 %v6859_v8, %v2972_v25 }
 0x4a2   :  { %v2134_v3 = vadd.f32 %v6836_v19, %v1984_v49  ;;  %v2215_v18 = vpop.xlane.xlu1 %2214  ;;  %v2684_v16 = vsub.f32 1.5, %v2683_v61 }
 0x4a3   :  { %v6927_v23 = vpop.eup %4884  ;;  %v6930_v58 = vmul.f32 %v6777_v52, %v2215_v18  ;;  %v6934_v5 = vadd.f32 1e-05, %v2559_v36 }
 0x4a4   :  { %v2691_v43 = vmul.f32 %v6927_v23, %v6891_v57  ;;  %v6937_v41 = vadd.f32 %v6612_v44, %v2134_v3  ;;  %v2382_v24 = vpop.xlane.xlu0 %2381  ;;  %v2685_v19 = vmul.f32 %v4883_v14, %v2684_v16  ;;  %vm2697_vm6 = vweird.f32 %v6927_v23 }
 0x4a5   :  { %v2496_v30 = vmul.f32 %v6930_v58, %v6930_v58  ;;  %v2464_v47 = vmul.f32 %v2382_v24, %v6777_v52  ;;  %4886 = vrsqrt.f32 %v6934_v5  ;;  %v6955_v24 = vpop.f32.mrf.mxu1  ;;  %vm6977_vm9 = vmor %vm2696_vm7, %vm2697_vm6  ;;  %vm2706_vm10 = vweird.f32 %v6934_v5 }
 0x4a6   :  { %v2692_v63 = vmul.f32 %v6927_v23, %v2691_v43  ;;  %v2258_v7 = vsel %vm2194_vm8, %v6937_v41, 0.0  ;;  %v2689_v61 = vsel %vm2688_vm5, %v4883_v14, %v2685_v19  ;;  %v2351_v1 = vmul.f32 %v6937_v41, %v6937_v41 }
 0x4a7   :  { %v2528_v49 = vsub.f32 %v2464_v47, %v2496_v30  ;;  %2259 = vadd.xlane.f32.xlu0 %v2258_v7  ;;  %v2973_v9 = vmul.f32 %v2689_v61, %v2589_v56 }
 0x4a8   :  { %v2693_v36 = vmul.f32 0.5, %v2692_v63  ;;  %v2425_v42 = vsel %vm2194_vm8, %v2351_v1, 0.0  ;;  %v3038_v63 = vadd.f32 %v6885_v22, %v3005_v54 }
 0x4a9   :  { %v2560_v3 = vmax.f32 %v2528_v49, 0.0  ;;  %v1987_v6 = vpop.f32.mrf.mxu0  ;;  %2426 = vadd.xlane.f32.xlu2 %v2425_v42  ;;  %v3006_v14 = vmul.f32 %v6859_v8, %v2973_v9 }
 0x4aa   :  { %v2694_v18 = vsub.f32 1.5, %v2693_v36  ;;  %v2137_v16 = vadd.f32 %v6880_v4, %v1987_v6  ;;  %v2218_v43 = vpop.xlane.xlu2 %2217 }
 0x4ab   :  { %v6957_v19 = vadd.f32 1e-05, %v2560_v3  ;;  %v6960_v30 = vmul.f32 %v6777_v52, %v2218_v43  ;;  %v4887_v47 = vpop.eup %4886  ;;  %v3039_v7 = vadd.f32 %v6885_v22, %v3006_v14  ;;  %v2590_v43 = vsub.f32 %v6658_v48, %v6862_v2 }
 0x4ac   :  { %v6963_v25 = vadd.f32 %v6612_v44, %v2137_v16  ;;  %v2385_v56 = vpop.xlane.xlu1 %2384  ;;  %v2695_v4 = vmul.f32 %v6927_v23, %v2694_v18  ;;  %v2701_v61 = vmul.f32 %v4887_v47, %v6934_v5  ;;  %vm2707_vm0 = vweird.f32 %v4887_v47 }
 0x4ad   :  { %4888 = vrsqrt.f32 %v6957_v19  ;;  %v2497_v49 = vmul.f32 %v6960_v30, %v6960_v30  ;;  %v2465_v1 = vmul.f32 %v2385_v56, %v6777_v52  ;;  %v3069_v36 = vpack.c.bf16 %v3039_v7, %v3038_v63  ;;  %vm2708_vm11 = vmor %vm2706_vm10, %vm2707_vm0 }
 0x4ae   :  { %v2702_v9 = vmul.f32 %v4887_v47, %v2701_v61  ;;  %v2261_v54 = vsel %vm2194_vm8, %v6963_v25, 0.0  ;;  %v2352_v6 = vmul.f32 %v6963_v25, %v6963_v25  ;;  %v2699_v18 = vsel %vm6977_vm9, %v6927_v23, %v2695_v4 }
 0x4af   :  { %v2529_v42 = vsub.f32 %v2465_v1, %v2497_v49  ;;  %2262 = vadd.xlane.f32.xlu0 %v2261_v54  ;;  %4684 = vmatmul.msk.bf16.gmra.mxu2 %vm2194_vm8, %v3069_v36  ;;  %v2974_v4 = vmul.f32 %v2699_v18, %v2590_v43  ;;  %vm2716_vm13 = vweird.f32 %v6957_v19 }
 0x4b0   :  { %v2703_v16 = vmul.f32 0.5, %v2702_v9  ;;  %v2428_v56 = vsel %vm2194_vm8, %v2352_v6, 0.0 }
 0x4b1   :  { %v1989_v57 = vpop.f32.mrf.mxu0  ;;  %v2561_v14 = vmax.f32 %v2529_v42, 0.0  ;;  %2429 = vadd.xlane.f32.xlu2 %v2428_v56  ;;  %v2591_v42 = vsub.f32 %v6670_v27, %v6894_v34  ;;  %v3007_v56 = vmul.f32 %v6859_v8, %v2974_v4 }
 0x4b2   :  { %v2139_v63 = vadd.f32 %v6917_v53, %v1989_v57  ;;  %v2221_v7 = vpop.xlane.xlu2 %2220  ;;  %v2704_v49 = vsub.f32 1.5, %v2703_v16  ;;  %v2143_v53 = vpop.f32.mrf.mxu1 }
 0x4b3   :  { %v6991_v61 = vpop.eup %4888  ;;  %v6994_v23 = vmul.f32 %v6777_v52, %v2221_v7  ;;  %v6998_v9 = vadd.f32 1e-05, %v2561_v14 }
 0x4b4   :  { %v2711_v1 = vmul.f32 %v6991_v61, %v6957_v19  ;;  %v7001_v48 = vadd.f32 %v6612_v44, %v2139_v63  ;;  %v2388_v2 = vpop.xlane.xlu1 %2387  ;;  %v2705_v36 = vmul.f32 %v4887_v47, %v2704_v49  ;;  %vm2717_vm12 = vweird.f32 %v6991_v61 }
 0x4b5   :  { %v2498_v54 = vmul.f32 %v6994_v23, %v6994_v23  ;;  %v2466_v3 = vmul.f32 %v2388_v2, %v6777_v52  ;;  %4890 = vrsqrt.f32 %v6998_v9  ;;  %vm7039_vm14 = vmor %vm2716_vm13, %vm2717_vm12  ;;  %vm2726_vm1 = vweird.f32 %v6998_v9 }
 0x4b6   :  { %v2712_v6 = vmul.f32 %v6991_v61, %v2711_v1  ;;  %v2264_v18 = vsel %vm2194_vm8, %v7001_v48, 0.0  ;;  %v2709_v16 = vsel %vm2708_vm11, %v4887_v47, %v2705_v36  ;;  %v2353_v5 = vmul.f32 %v7001_v48, %v7001_v48 }
 0x4b7   :  { %v2530_v57 = vsub.f32 %v2466_v3, %v2498_v54  ;;  %2265 = vadd.xlane.f32.xlu1 %v2264_v18  ;;  %v2975_v43 = vmul.f32 %v2709_v16, %v2591_v42  ;;  %v3040_v42 = vadd.f32 %v6885_v22, %v3007_v56 }
 0x4b8   :  { %v2713_v14 = vmul.f32 0.5, %v2712_v6  ;;  %v2431_v27 = vsel %vm2194_vm8, %v2353_v5, 0.0 }
 0x4b9   :  { %v2562_v63 = vmax.f32 %v2530_v57, 0.0  ;;  %v1992_v34 = vpop.f32.mrf.mxu0  ;;  %2432 = vadd.xlane.f32.xlu0 %v2431_v27  ;;  %v3008_v47 = vmul.f32 %v6859_v8, %v2975_v43 }
 0x4ba   :  { %v2714_v7 = vsub.f32 1.5, %v2713_v14  ;;  %v2142_v49 = vadd.f32 %v6955_v24, %v1992_v34  ;;  %v2224_v1 = vpop.xlane.xlu0 %2223  ;;  %v2146_v5 = vpop.f32.mrf.mxu1 }
 0x4bb   :  { %v7019_v2 = vadd.f32 1e-05, %v2562_v63  ;;  %v7022_v36 = vmul.f32 %v6777_v52, %v2224_v1  ;;  %v4891_v54 = vpop.eup %4890  ;;  %v3041_v6 = vadd.f32 %v6885_v22, %v3008_v47  ;;  %v2592_v1 = vsub.f32 %v6681_v12, %v6930_v58 }
 0x4bc   :  { %v7025_v3 = vadd.f32 %v6612_v44, %v2142_v49  ;;  %v2391_v4 = vpop.xlane.xlu2 %2390  ;;  %v2715_v18 = vmul.f32 %v6991_v61, %v2714_v7  ;;  %v2721_v24 = vmul.f32 %v4891_v54, %v6998_v9  ;;  %vm2727_vm15 = vweird.f32 %v4891_v54 }
 0x4bd   :  { %4892 = vrsqrt.f32 %v7019_v2  ;;  %v2499_v16 = vmul.f32 %v7022_v36, %v7022_v36  ;;  %v2467_v57 = vmul.f32 %v2391_v4, %v6777_v52  ;;  %v3070_v14 = vpack.c.bf16 %v3041_v6, %v3040_v42  ;;  %vm2728_vm2 = vmor %vm2726_vm1, %vm2727_vm15 }
 0x4be   :  { %v2722_v43 = vmul.f32 %v4891_v54, %v2721_v24  ;;  %v2267_v56 = vsel %vm2194_vm8, %v7025_v3, 0.0  ;;  %v2354_v34 = vmul.f32 %v7025_v3, %v7025_v3  ;;  %v2719_v7 = vsel %vm7039_vm14, %v6991_v61, %v2715_v18 }
 0x4bf   :  { %v2531_v27 = vsub.f32 %v2467_v57, %v2499_v16  ;;  %2268 = vadd.xlane.f32.xlu1 %v2267_v56  ;;  %4685 = vmatmul.msk.bf16.gmra.mxu2 %vm2194_vm8, %v3070_v14  ;;  %v2976_v61 = vmul.f32 %v2719_v7, %v2592_v1  ;;  %v2593_v63 = vsub.f32 %v6693_v21, %v6960_v30  ;;  %vm2736_vm4 = vweird.f32 %v7019_v2 }
 0x4c0   :  { %v2723_v49 = vmul.f32 0.5, %v2722_v43  ;;  %v2434_v4 = vsel %vm2194_vm8, %v2354_v34, 0.0 }
 0x4c1   :  { %v1994_v19 = vpop.f32.mrf.mxu0  ;;  %v2563_v47 = vmax.f32 %v2531_v27, 0.0  ;;  %2435 = vadd.xlane.f32.xlu0 %v2434_v4 }
 0x4c2   :  { %v2144_v42 = vadd.f32 %v2143_v53, %v1994_v19  ;;  %v2227_v6 = vpop.xlane.xlu0 %2226  ;;  %v2724_v16 = vsub.f32 1.5, %v2723_v49  ;;  %v2148_v4 = vpop.f32.mrf.mxu1 }
 0x4c3   :  { %v7052_v24 = vpop.eup %4892  ;;  %v7055_v57 = vmul.f32 %v6777_v52, %v2227_v6  ;;  %v7059_v43 = vadd.f32 1e-05, %v2563_v47  ;;  %v3009_v47 = vmul.f32 %v6859_v8, %v2976_v61 }
 0x4c4   :  { %v2731_v18 = vmul.f32 %v7052_v24, %v7019_v2  ;;  %v7062_v12 = vadd.f32 %v6612_v44, %v2144_v42  ;;  %v2394_v58 = vpop.xlane.xlu2 %2393  ;;  %v2725_v53 = vmul.f32 %v4891_v54, %v2724_v16  ;;  %vm2737_vm3 = vweird.f32 %v7052_v24 }
 0x4c5   :  { %v2500_v14 = vmul.f32 %v7055_v57, %v7055_v57  ;;  %v2468_v56 = vmul.f32 %v2394_v58, %v6777_v52  ;;  %4894 = vrsqrt.f32 %v7059_v43  ;;  %vm7099_vm5 = vmor %vm2736_vm4, %vm2737_vm3  ;;  %vm2746_vm7 = vweird.f32 %v7059_v43 }
 0x4c6   :  { %v2732_v27 = vmul.f32 %v7052_v24, %v2731_v18  ;;  %v2270_v34 = vsel %vm2194_vm8, %v7062_v12, 0.0  ;;  %v2729_v7 = vsel %vm2728_vm2, %v4891_v54, %v2725_v53  ;;  %v2355_v9 = vmul.f32 %v7062_v12, %v7062_v12 }
 0x4c7   :  { %v2532_v49 = vsub.f32 %v2468_v56, %v2500_v14  ;;  %2271 = vadd.xlane.f32.xlu2 %v2270_v34  ;;  %v2977_v19 = vmul.f32 %v2729_v7, %v2593_v63  ;;  %v3042_v63 = vadd.f32 %v6885_v22, %v3009_v47  ;;  %v2595_v47 = vsub.f32 %v6714_v50, %v7022_v36 }
 0x4c8   :  { %v2733_v1 = vmul.f32 0.5, %v2732_v27  ;;  %v2437_v30 = vsel %vm2194_vm8, %v2355_v9, 0.0 }
 0x4c9   :  { %v2564_v21 = vmax.f32 %v2532_v49, 0.0  ;;  %v1997_v42 = vpop.f32.mrf.mxu0  ;;  %2438 = vadd.xlane.f32.xlu1 %v2437_v30  ;;  %v3010_v54 = vmul.f32 %v6859_v8, %v2977_v19 }
 0x4ca   :  { %v2734_v6 = vsub.f32 1.5, %v2733_v1  ;;  %v2147_v16 = vadd.f32 %v2146_v5, %v1997_v42  ;;  %v2230_v18 = vpop.xlane.xlu1 %2229 }
 0x4cb   :  { %v7079_v58 = vadd.f32 1e-05, %v2564_v21  ;;  %v7082_v53 = vmul.f32 %v6777_v52, %v2230_v18  ;;  %v4895_v14 = vpop.eup %4894  ;;  %v3043_v27 = vadd.f32 %v6885_v22, %v3010_v54 }
 0x4cc   :  { %v7085_v56 = vadd.f32 %v6612_v44, %v2147_v16  ;;  %v2397_v61 = vpop.xlane.xlu0 %2396  ;;  %v2735_v34 = vmul.f32 %v7052_v24, %v2734_v6  ;;  %v2741_v5 = vmul.f32 %v4895_v14, %v7059_v43  ;;  %v2594_v16 = vsub.f32 %v6702_v32, %v6994_v23 }
 0x4cd   :  { %4896 = vrsqrt.f32 %v7079_v58  ;;  %v2501_v7 = vmul.f32 %v7082_v53, %v7082_v53  ;;  %v2469_v49 = vmul.f32 %v2397_v61, %v6777_v52  ;;  %v3071_v19 = vpack.c.bf16 %v3043_v27, %v3042_v63 }
 0x4ce   :  { %v2742_v9 = vmul.f32 %v4895_v14, %v2741_v5  ;;  %v2273_v1 = vsel %vm2194_vm8, %v7085_v56, 0.0  ;;  %v2356_v30 = vmul.f32 %v7085_v56, %v7085_v56  ;;  %v2739_v42 = vsel %vm7099_vm5, %v7052_v24, %v2735_v34  ;;  %v2151_v5 = vpop.f32.mrf.mxu1 }
 0x4cf   :  { %v2533_v21 = vsub.f32 %v2469_v49, %v2501_v7  ;;  %2274 = vadd.xlane.f32.xlu2 %v2273_v1  ;;  %4686 = vmatmul.msk.bf16.gmra.mxu2 %vm2194_vm8, %v3071_v19  ;;  %vm2747_vm6 = vweird.f32 %v4895_v14  ;;  %v2978_v34 = vmul.f32 %v2739_v42, %v2594_v16  ;;  %vm2756_vm10 = vweird.f32 %v7079_v58 }
 0x4d0   :  { %v2743_v6 = vmul.f32 0.5, %v2742_v9  ;;  %v2440_v54 = vsel %vm2194_vm8, %v2356_v30, 0.0  ;;  %vm2748_vm9 = vmor %vm2746_vm7, %vm2747_vm6 }
 0x4d1   :  { %v1999_v2 = vpop.f32.mrf.mxu0  ;;  %v2565_v18 = vmax.f32 %v2533_v21, 0.0  ;;  %2441 = vadd.xlane.f32.xlu1 %v2440_v54 }
 0x4d2   :  { %v2149_v61 = vadd.f32 %v2148_v4, %v1999_v2  ;;  %v2233_v63 = vpop.xlane.xlu1 %2232  ;;  %v2744_v7 = vsub.f32 1.5, %v2743_v6 }
 0x4d3   :  { %v7112_v27 = vpop.eup %4896  ;;  %v7115_v24 = vmul.f32 %v6777_v52, %v2233_v63  ;;  %v7119_v9 = vadd.f32 1e-05, %v2565_v18  ;;  %v3011_v18 = vmul.f32 %v6859_v8, %v2978_v34 }
 0x4d4   :  { %v2751_v49 = vmul.f32 %v7112_v27, %v7079_v58  ;;  %v7122_v32 = vadd.f32 %v6612_v44, %v2149_v61  ;;  %v2400_v23 = vpop.xlane.xlu0 %2399  ;;  %v2745_v4 = vmul.f32 %v4895_v14, %v2744_v7  ;;  %vm2757_vm0 = vweird.f32 %v7112_v27 }
 0x4d5   :  { %v2502_v19 = vmul.f32 %v7115_v24, %v7115_v24  ;;  %v2470_v1 = vmul.f32 %v2400_v23, %v6777_v52  ;;  %4898 = vrsqrt.f32 %v7119_v9  ;;  %vm7159_vm11 = vmor %vm2756_vm10, %vm2757_vm0  ;;  %vm2766_vm13 = vweird.f32 %v7119_v9 }
 0x4d6   :  { %v2752_v21 = vmul.f32 %v7112_v27, %v2751_v49  ;;  %v2276_v30 = vsel %vm2194_vm8, %v7122_v32, 0.0  ;;  %v2749_v42 = vsel %vm2748_vm9, %v4895_v14, %v2745_v4  ;;  %v2357_v43 = vmul.f32 %v7122_v32, %v7122_v32 }
 0x4d7   :  { %v2534_v6 = vsub.f32 %v2470_v1, %v2502_v19  ;;  %2277 = vadd.xlane.f32.xlu0 %v2276_v30  ;;  %v2979_v2 = vmul.f32 %v2749_v42, %v2595_v47  ;;  %v3044_v1 = vadd.f32 %v6885_v22, %v3011_v18 }
 0x4d8   :  { %v2753_v16 = vmul.f32 0.5, %v2752_v21  ;;  %v2443_v50 = vsel %vm2194_vm8, %v2357_v43, 0.0  ;;  %v2153_v21 = vpop.f32.mrf.mxu1 }
 0x4d9   :  { %v2566_v54 = vmax.f32 %v2534_v6, 0.0  ;;  %v2002_v36 = vpop.f32.mrf.mxu0  ;;  %2444 = vadd.xlane.f32.xlu2 %v2443_v50  ;;  %v3012_v49 = vmul.f32 %v6859_v8, %v2979_v2 }
 0x4da   :  { %v2754_v61 = vsub.f32 1.5, %v2753_v16  ;;  %v2152_v63 = vadd.f32 %v2151_v5, %v2002_v36  ;;  %v2236_v7 = vpop.xlane.xlu2 %2235 }
 0x4db   :  { %v7139_v14 = vadd.f32 1e-05, %v2566_v54  ;;  %v7142_v23 = vmul.f32 %v6777_v52, %v2236_v7  ;;  %v4899_v4 = vpop.eup %4898  ;;  %v3045_v47 = vadd.f32 %v6885_v22, %v3012_v49 }
 0x4dc   :  { %v7145_v19 = vadd.f32 %v6612_v44, %v2152_v63  ;;  %v2403_v34 = vpop.xlane.xlu1 %2402  ;;  %v2755_v5 = vmul.f32 %v7112_v27, %v2754_v61  ;;  %v2761_v30 = vmul.f32 %v4899_v4, %v7119_v9  ;;  %v2596_v63 = vsub.f32 %v6725_v51, %v7055_v57 }
 0x4dd   :  { %4900 = vrsqrt.f32 %v7139_v14  ;;  %v2503_v42 = vmul.f32 %v7142_v23, %v7142_v23  ;;  %v2471_v6 = vmul.f32 %v2403_v34, %v6777_v52  ;;  %v3072_v2 = vpack.c.bf16 %v3045_v47, %v3044_v1 }
 0x4de   :  { %v2762_v43 = vmul.f32 %v4899_v4, %v2761_v30  ;;  %v2279_v16 = vsel %vm2194_vm8, %v7145_v19, 0.0  ;;  %v2358_v50 = vmul.f32 %v7145_v19, %v7145_v19  ;;  %v2759_v36 = vsel %vm7159_vm11, %v7112_v27, %v2755_v5 }
 0x4df   :  { %v2535_v54 = vsub.f32 %v2471_v6, %v2503_v42  ;;  %2280 = vadd.xlane.f32.xlu0 %v2279_v16  ;;  %4687 = vmatmul.msk.bf16.gmra.mxu2 %vm2194_vm8, %v3072_v2  ;;  %vm2767_vm12 = vweird.f32 %v4899_v4  ;;  %v2980_v27 = vmul.f32 %v2759_v36, %v2596_v63  ;;  %v2597_v16 = vsub.f32 %v6735_v29, %v7082_v53 }
 0x4e0   :  { %v2763_v61 = vmul.f32 0.5, %v2762_v43  ;;  %v2446_v49 = vsel %vm2194_vm8, %v2358_v50, 0.0  ;;  %vm2768_vm14 = vmor %vm2766_vm13, %vm2767_vm12  ;;  %v2156_v50 = vpop.f32.mrf.mxu1  ;;  %vm2776_vm1 = vweird.f32 %v7139_v14 }
 0x4e1   :  { %v2004_v58 = vpop.f32.mrf.mxu0  ;;  %v2567_v7 = vmax.f32 %v2535_v54, 0.0  ;;  %2447 = vadd.xlane.f32.xlu2 %v2446_v49 }
 0x4e2   :  { %v2154_v34 = vadd.f32 %v2153_v21, %v2004_v58  ;;  %v2239_v1 = vpop.xlane.xlu2 %2238  ;;  %v2764_v30 = vsub.f32 1.5, %v2763_v61 }
 0x4e3   :  { %v7172_v47 = vpop.eup %4900  ;;  %v7175_v42 = vmul.f32 %v6777_v52, %v2239_v1  ;;  %v7179_v6 = vadd.f32 1e-05, %v2567_v7  ;;  %v3013_v7 = vmul.f32 %v6859_v8, %v2980_v27 }
 0x4e4   :  { %v2771_v5 = vmul.f32 %v7172_v47, %v7139_v14  ;;  %v7182_v51 = vadd.f32 %v6612_v44, %v2154_v34  ;;  %v2406_v57 = vpop.xlane.xlu1 %2405  ;;  %v2765_v21 = vmul.f32 %v4899_v4, %v2764_v30  ;;  %vm2777_vm15 = vweird.f32 %v7172_v47 }
 0x4e5   :  { %v2504_v43 = vmul.f32 %v7175_v42, %v7175_v42  ;;  %v2472_v2 = vmul.f32 %v2406_v57, %v6777_v52  ;;  %4902 = vrsqrt.f32 %v7179_v6  ;;  %vm7219_vm2 = vmor %vm2776_vm1, %vm2777_vm15  ;;  %vm2786_vm4 = vweird.f32 %v7179_v6 }
 0x4e6   :  { %v2772_v18 = vmul.f32 %v7172_v47, %v2771_v5  ;;  %v2282_v54 = vsel %vm2194_vm8, %v7182_v51, 0.0  ;;  %v2769_v36 = vsel %vm2768_vm14, %v4899_v4, %v2765_v21  ;;  %v2359_v9 = vmul.f32 %v7182_v51, %v7182_v51 }
 0x4e7   :  { %v2536_v61 = vsub.f32 %v2472_v2, %v2504_v43  ;;  %2283 = vadd.xlane.f32.xlu1 %v2282_v54  ;;  %v2981_v58 = vmul.f32 %v2769_v36, %v2597_v16  ;;  %v3046_v2 = vadd.f32 %v6885_v22, %v3013_v7 }
 0x4e8   :  { %v2773_v63 = vmul.f32 0.5, %v2772_v18  ;;  %v2449_v53 = vsel %vm2194_vm8, %v2359_v9, 0.0 }
 0x4e9   :  { %v2568_v29 = vmax.f32 %v2536_v61, 0.0  ;;  %v2007_v49 = vpop.f32.mrf.mxu0  ;;  %2450 = vadd.xlane.f32.xlu0 %v2449_v53  ;;  %v3014_v5 = vmul.f32 %v6859_v8, %v2981_v58  ;;  %v2158_v53 = vpop.f32.mrf.mxu1 }
 0x4ea   :  { %v2774_v34 = vsub.f32 1.5, %v2773_v63  ;;  %v2157_v1 = vadd.f32 %v2156_v50, %v2007_v49  ;;  %v2242_v30 = vpop.xlane.xlu0 %2241  ;;  %v2599_v63 = vsub.f32 %v6756_v37, %v7142_v23 }
 0x4eb   :  { %v7199_v4 = vadd.f32 1e-05, %v2568_v29  ;;  %v7202_v57 = vmul.f32 %v6777_v52, %v2242_v30  ;;  %v4903_v21 = vpop.eup %4902  ;;  %v3047_v16 = vadd.f32 %v6885_v22, %v3014_v5 }
 0x4ec   :  { %v7205_v43 = vadd.f32 %v6612_v44, %v2157_v1  ;;  %v2409_v27 = vpop.xlane.xlu2 %2408  ;;  %v2775_v18 = vmul.f32 %v7172_v47, %v2774_v34  ;;  %v2781_v54 = vmul.f32 %v4903_v21, %v7179_v6  ;;  %v2598_v1 = vsub.f32 %v6746_v28, %v7115_v24 }
 0x4ed   :  { %4904 = vrsqrt.f32 %v7199_v4  ;;  %v2505_v50 = vmul.f32 %v7202_v57, %v7202_v57  ;;  %v2473_v36 = vmul.f32 %v2409_v27, %v6777_v52  ;;  %v3073_v9 = vpack.c.bf16 %v3047_v16, %v3046_v2 }
 0x4ee   :  { %v2782_v61 = vmul.f32 %v4903_v21, %v2781_v54  ;;  %v2285_v58 = vsel %vm2194_vm8, %v7205_v43, 0.0  ;;  %v2360_v29 = vmul.f32 %v7205_v43, %v7205_v43  ;;  %v2779_v49 = vsel %vm7219_vm2, %v7172_v47, %v2775_v18 }
 0x4ef   :  { %v2537_v7 = vsub.f32 %v2473_v36, %v2505_v50  ;;  %2286 = vadd.xlane.f32.xlu1 %v2285_v58  ;;  %4688 = vmatmul.msk.bf16.gmra.mxu2 %vm2194_vm8, %v3073_v9  ;;  %vm2787_vm3 = vweird.f32 %v4903_v21  ;;  %v2982_v47 = vmul.f32 %v2779_v49, %v2598_v1  ;;  %vm2796_vm7 = vweird.f32 %v7199_v4 }
 0x4f0   :  { %v2783_v14 = vmul.f32 0.5, %v2782_v61  ;;  %v2452_v5 = vsel %vm2194_vm8, %v2360_v29, 0.0  ;;  %vm2788_vm5 = vmor %vm2786_vm4, %vm2787_vm3 }
 0x4f1   :  { %v2009_v34 = vpop.f32.mrf.mxu0  ;;  %v2569_v30 = vmax.f32 %v2537_v7, 0.0  ;;  %2453 = vadd.xlane.f32.xlu0 %v2452_v5 }
 0x4f2   :  { %v2159_v27 = vadd.f32 %v2158_v53, %v2009_v34  ;;  %v2245_v2 = vpop.xlane.xlu0 %2244  ;;  %v2784_v54 = vsub.f32 1.5, %v2783_v14  ;;  %v3015_v34 = vmul.f32 %v6859_v8, %v2982_v47 }
 0x4f3   :  { %v4905_v16 = vpop.eup %4904  ;;  %v7233_v50 = vmul.f32 %v6777_v52, %v2245_v2  ;;  %v2633_v36 = vadd.f32 1e-05, %v2569_v30 }
 0x4f4   :  { %v2791_v18 = vmul.f32 %v4905_v16, %v7199_v4  ;;  %v7237_v61 = vadd.f32 %v6612_v44, %v2159_v27  ;;  %v2412_v28 = vpop.xlane.xlu2 %2411  ;;  %v2785_v24 = vmul.f32 %v4903_v21, %v2784_v54  ;;  %v3048_v54 = vadd.f32 %v6885_v22, %v3015_v34 }
 0x4f5   :  { %v2506_v9 = vmul.f32 %v7233_v50, %v7233_v50  ;;  %v2474_v58 = vmul.f32 %v2412_v28, %v6777_v52  ;;  %4906 = vrsqrt.f32 %v2633_v36  ;;  %vm2797_vm6 = vweird.f32 %v4905_v16 }
 0x4f6   :  { %v2792_v7 = vmul.f32 %v4905_v16, %v2791_v18  ;;  %v2288_v29 = vsel %vm2194_vm8, %v7237_v61, 0.0  ;;  %v2789_v44 = vsel %vm2788_vm5, %v4903_v21, %v2785_v24  ;;  %v2361_v6 = vmul.f32 %v7237_v61, %v7237_v61  ;;  %vm2798_vm9 = vmor %vm2796_vm7, %vm2797_vm6 }
 0x4f7   :  { %v2538_v53 = vsub.f32 %v2474_v58, %v2506_v9  ;;  %2289 = vadd.xlane.f32.xlu2 %v2288_v29  ;;  %v2983_v49 = vmul.f32 %v2789_v44, %v2599_v63  ;;  %vm2806_vm10 = vweird.f32 %v2633_v36 }
 0x4f8   :  { %v2793_v14 = vmul.f32 0.5, %v2792_v7  ;;  %v2455_v30 = vsel %vm2194_vm8, %v2361_v6, 0.0  ;;  %v2600_v6 = vsub.f32 %v6767_v45, %v7175_v42 }
 0x4f9   :  { %v2570_v1 = vmax.f32 %v2538_v53, 0.0  ;;  %2456 = vadd.xlane.f32.xlu1 %v2455_v30  ;;  %v3016_v5 = vmul.f32 %v6859_v8, %v2983_v49 }
 0x4fa   :  { %v2794_v37 = vsub.f32 1.5, %v2793_v14  ;;  %v2248_v23 = vpop.xlane.xlu1 %2247 }
 0x4fb   :  { %v7252_v27 = vadd.f32 1e-05, %v2570_v1  ;;  %v7255_v21 = vmul.f32 %v6777_v52, %v2248_v23  ;;  %v4907_v2 = vpop.eup %4906  ;;  %v3049_v18 = vadd.f32 %v6885_v22, %v3016_v5 }
 0x4fc   :  { %v2795_v28 = vmul.f32 %v4905_v16, %v2794_v37  ;;  %v2801_v47 = vmul.f32 %v4907_v2, %v2633_v36  ;;  %v2415_v24 = vpop.xlane.xlu0 %2414  ;;  %vm2807_vm0 = vweird.f32 %v4907_v2 }
 0x4fd   :  { %4908 = vrsqrt.f32 %v7252_v27  ;;  %v2507_v9 = vmul.f32 %v7255_v21, %v7255_v21  ;;  %v2475_v58 = vmul.f32 %v2415_v24, %v6777_v52  ;;  %v3074_v7 = vpack.c.bf16 %v3049_v18, %v3048_v54  ;;  %vm2808_vm11 = vmor %vm2806_vm10, %vm2807_vm0 }
 0x4fe   :  { %v2802_v63 = vmul.f32 %v4907_v2, %v2801_v47  ;;  %v2799_v44 = vsel %vm2798_vm9, %v4905_v16, %v2795_v28  ;;  %v2601_v54 = vsub.f32 %v6783_v46, %v7202_v57  ;;  %vm2816_vm13 = vweird.f32 %v7252_v27 }
 0x4ff   :  { %v2539_v29 = vsub.f32 %v2475_v58, %v2507_v9  ;;  %4689 = vmatmul.msk.bf16.gmra.mxu2 %vm2194_vm8, %v3074_v7  ;;  %v2984_v30 = vmul.f32 %v2799_v44, %v2600_v6 }
 0x500   :  { %v2803_v53 = vmul.f32 0.5, %v2802_v63 }
 0x501   :  { %v2571_v49 = vmax.f32 %v2539_v29, 0.0  ;;  %v3017_v9 = vmul.f32 %v6859_v8, %v2984_v30 }
 0x502   :  { %v2804_v34 = vsub.f32 1.5, %v2803_v53  ;;  %v2251_v1 = vpop.xlane.xlu1 %2250 }
 0x503   :  { %v4909_v14 = vpop.eup %4908  ;;  %v2635_v4 = vadd.f32 1e-05, %v2571_v49  ;;  %v7269_v23 = vmul.f32 %v6777_v52, %v2251_v1  ;;  %v3050_v44 = vadd.f32 %v6885_v22, %v3017_v9 }
 0x504   :  { %v2811_v37 = vmul.f32 %v4909_v14, %v7252_v27  ;;  %v2805_v5 = vmul.f32 %v4907_v2, %v2804_v34  ;;  %v2418_v16 = vpop.xlane.xlu0 %2417  ;;  %vm2817_vm12 = vweird.f32 %v4909_v14 }
 0x505   :  { %4910 = vrsqrt.f32 %v2635_v4  ;;  %v2508_v42 = vmul.f32 %v7269_v23, %v7269_v23  ;;  %v2476_v28 = vmul.f32 %v2418_v16, %v6777_v52  ;;  %vm2818_vm14 = vmor %vm2816_vm13, %vm2817_vm12  ;;  %vm2826_vm1 = vweird.f32 %v2635_v4 }
 0x506   :  { %v2812_v45 = vmul.f32 %v4909_v14, %v2811_v37  ;;  %v2809_v18 = vsel %vm2808_vm11, %v4907_v2, %v2805_v5 }
 0x507   :  { %v2985_v47 = vmul.f32 %v2809_v18, %v2601_v54  ;;  %v2540_v58 = vsub.f32 %v2476_v28, %v2508_v42  ;;  %v2602_v42 = vsub.f32 %v6800_v39, %v7233_v50 }
 0x508   :  { %v2813_v24 = vmul.f32 0.5, %v2812_v45 }
 0x509   :  { %v3018_v7 = vmul.f32 %v6859_v8, %v2985_v47  ;;  %v2572_v29 = vmax.f32 %v2540_v58, 0.0 }
 0x50a   :  { %v2814_v63 = vsub.f32 1.5, %v2813_v24  ;;  %v2254_v36 = vpop.xlane.xlu2 %2253 }
 0x50b   :  { %v7279_v46 = vmul.f32 %v6777_v52, %v2254_v36  ;;  %v4911_v57 = vpop.eup %4910  ;;  %v3051_v2 = vadd.f32 %v6885_v22, %v3018_v7  ;;  %v2636_v49 = vadd.f32 1e-05, %v2572_v29 }
 0x50c   :  { %v2815_v53 = vmul.f32 %v4909_v14, %v2814_v63  ;;  %v2821_v6 = vmul.f32 %v4911_v57, %v2635_v4  ;;  %v2421_v1 = vpop.xlane.xlu1 %2420  ;;  %vm2827_vm15 = vweird.f32 %v4911_v57 }
 0x50d   :  { %v2509_v34 = vmul.f32 %v7279_v46, %v7279_v46  ;;  %v2477_v30 = vmul.f32 %v2421_v1, %v6777_v52  ;;  %v3075_v37 = vpack.c.bf16 %v3051_v2, %v3050_v44  ;;  %4912 = vrsqrt.f32 %v2636_v49  ;;  %vm2828_vm2 = vmor %vm2826_vm1, %vm2827_vm15 }
 0x50e   :  { %v2822_v5 = vmul.f32 %v4911_v57, %v2821_v6  ;;  %v2819_v54 = vsel %vm2818_vm14, %v4909_v14, %v2815_v53  ;;  %v2603_v14 = vsub.f32 %v6817_v33, %v7255_v21  ;;  %vm2836_vm4 = vweird.f32 %v2636_v49 }
 0x50f   :  { %v2541_v16 = vsub.f32 %v2477_v30, %v2509_v34  ;;  %4690 = vmatmul.msk.bf16.gmra.mxu2 %vm2194_vm8, %v3075_v37  ;;  %v2986_v24 = vmul.f32 %v2819_v54, %v2602_v42  ;;  %vm4073_vm15 = vcmask 1041409  }
 0x510   :  { %v2823_v45 = vmul.f32 0.5, %v2822_v5 }
 0x511   :  { %v2573_v18 = vmax.f32 %v2541_v16, 0.0  ;;  %v3019_v53 = vmul.f32 %v6859_v8, %v2986_v24 }
 0x512   :  { %v2824_v28 = vsub.f32 1.5, %v2823_v45  ;;  %v2257_v47 = vpop.xlane.xlu2 %2256 }
 0x513   :  { %v2637_v9 = vadd.f32 1e-05, %v2573_v18  ;;  %v7291_v58 = vmul.f32 %v6777_v52, %v2257_v47  ;;  %v4913_v27 = vpop.eup %4912  ;;  %v3052_v37 = vadd.f32 %v6885_v22, %v3019_v53 }
 0x514   :  { %v2825_v63 = vmul.f32 %v4911_v57, %v2824_v28  ;;  %v2831_v36 = vmul.f32 %v4913_v27, %v2636_v49  ;;  %v2424_v7 = vpop.xlane.xlu1 %2423  ;;  %vm2837_vm3 = vweird.f32 %v4913_v27 }
 0x515   :  { %4914 = vrsqrt.f32 %v2637_v9  ;;  %v2510_v50 = vmul.f32 %v7291_v58, %v7291_v58  ;;  %v2478_v29 = vmul.f32 %v2424_v7, %v6777_v52  ;;  %vm2838_vm5 = vmor %vm2836_vm4, %vm2837_vm3  ;;  %vm2846_vm7 = vweird.f32 %v2637_v9 }
 0x516   :  { %v2829_v39 = vsel %vm2828_vm2, %v4911_v57, %v2825_v63  ;;  %v2832_v2 = vmul.f32 %v4913_v27, %v2831_v36  ;;  %v4951_v36 = vld [vmem:[#allocation11] sm:$0xf]  ;;  %vm4075_vm2 = vcmask 1042434  }
 0x517   :  { %v2987_v44 = vmul.f32 %v2829_v39, %v2603_v14  ;;  %v2542_v6 = vsub.f32 %v2478_v29, %v2510_v50  ;;  %v7312_v7 = vperm.slane %v4951_v36, 3  ;;  %v2604_v29 = vsub.f32 %v6834_v55, %v7269_v23 }
 0x518   :  { %v2833_v34 = vmul.f32 0.5, %v2832_v2 }
 0x519   :  { %v3020_v1 = vmul.f32 %v6859_v8, %v2987_v44  ;;  %v2574_v33 = vmax.f32 %v2542_v6, 0.0 }
 0x51a   :  { %v2260_v4 = vpop.xlane.xlu0 %2259  ;;  %v2834_v57 = vsub.f32 1.5, %v2833_v34 }
 0x51b   :  { %v7301_v21 = vmul.f32 %v6777_v52, %v2260_v4  ;;  %v4915_v30 = vpop.eup %4914  ;;  %v3053_v5 = vadd.f32 %v6885_v22, %v3020_v1  ;;  %v7305_v54 = vadd.f32 1e-05, %v2574_v33  ;;  %v2605_v33 = vsub.f32 %v6869_v35, %v7279_v46 }
 0x51c   :  { %v2841_v16 = vmul.f32 %v4915_v30, %v2637_v9  ;;  %v2427_v42 = vpop.xlane.xlu2 %2426  ;;  %v2835_v18 = vmul.f32 %v4913_v27, %v2834_v57  ;;  %vm2847_vm6 = vweird.f32 %v4915_v30 }
 0x51d   :  { %v2511_v45 = vmul.f32 %v7301_v21, %v7301_v21  ;;  %v2479_v28 = vmul.f32 %v2427_v42, %v6777_v52  ;;  %v3076_v47 = vpack.c.bf16 %v3053_v5, %v3052_v37  ;;  %4916 = vrsqrt.f32 %v7305_v54  ;;  %vm2848_vm9 = vmor %vm2846_vm7, %vm2847_vm6 }
 0x51e   :  { %v2842_v24 = vmul.f32 %v4915_v30, %v2841_v16  ;;  %v2839_v39 = vsel %vm2838_vm5, %v4913_v27, %v2835_v18  ;;  %vm2856_vm10 = vweird.f32 %v7305_v54 }
 0x51f   :  { %v2543_v63 = vsub.f32 %v2479_v28, %v2511_v45  ;;  %4691 = vmatmul.msk.bf16.gmra.mxu2 %vm2194_vm8, %v3076_v47  ;;  %v2988_v4 = vmul.f32 %v2839_v39, %v2604_v29 }
 0x520   :  { %v2843_v14 = vmul.f32 0.5, %v2842_v24 }
 0x521   :  { %v2575_v50 = vmax.f32 %v2543_v63, 0.0  ;;  %v3021_v35 = vmul.f32 %v6859_v8, %v2988_v4 }
 0x522   :  { %v2844_v44 = vsub.f32 1.5, %v2843_v14  ;;  %v2263_v2 = vpop.xlane.xlu0 %2262  ;;  %v3174_v6 = vpop.f32.mrf.mxu2 }
 0x523   :  { %v7316_v53 = vadd.f32 1e-05, %v2575_v50  ;;  %v7319_v49 = vmul.f32 %v6777_v52, %v2263_v2  ;;  %v7321_v34 = vpop.eup %4916  ;;  %v3175_v27 = vadd.f32 %v3174_v6, %v7312_v7 }
 0x524   :  { %v2845_v1 = vmul.f32 %v4915_v30, %v2844_v44  ;;  %v2851_v55 = vmul.f32 %v7321_v34, %v7305_v54  ;;  %v2430_v23 = vpop.xlane.xlu2 %2429  ;;  %vm2857_vm0 = vweird.f32 %v7321_v34 }
 0x525   :  { %4918 = vrsqrt.f32 %v7316_v53  ;;  %v3254_v37 = vmax.f32 %v3175_v27, 0.0  ;;  %v2512_v5 = vmul.f32 %v7319_v49, %v7319_v49  ;;  %v2480_v45 = vmul.f32 %v2430_v23, %v6777_v52  ;;  %vm7356_vm11 = vmor %vm2856_vm10, %vm2857_vm0 }
 0x526   :  { %v2849_v57 = vsel %vm2848_vm9, %v4915_v30, %v2845_v1  ;;  %v2852_v9 = vmul.f32 %v7321_v34, %v2851_v55  ;;  %v3054_v1 = vadd.f32 %v6885_v22, %v3021_v35  ;;  %vm2866_vm13 = vweird.f32 %v7316_v53 }
 0x527   :  { %v2989_v16 = vmul.f32 %v2849_v57, %v2605_v33  ;;  %v3480_v42 = vsel %vm2194_vm8, %v3254_v37, -inf  ;;  %v2544_v28 = vsub.f32 %v2480_v45, %v2512_v5  ;;  %vm4077_vm9 = vcmask 1043459  }
 0x528   :  { %v2853_v46 = vmul.f32 0.5, %v2852_v9  ;;  %v3481_v18 = vrot.slane %v3480_v42, 4  ;;  %vm4079_vm10 = vcmask 1044484  }
 0x529   :  { %v3022_v24 = vmul.f32 %v6859_v8, %v2989_v16  ;;  %v2576_v39 = vmax.f32 %v2544_v28, 0.0 }
 0x52a   :  { %v2266_v47 = vpop.xlane.xlu1 %2265  ;;  %v2854_v14 = vsub.f32 1.5, %v2853_v46  ;;  %v3482_v36 = vmax.f32 %v3480_v42, %v3481_v18  ;;  %v3176_v50 = vpop.f32.mrf.mxu2 }
 0x52b   :  { %v7337_v30 = vmul.f32 %v6777_v52, %v2266_v47  ;;  %v4919_v63 = vpop.eup %4918  ;;  %v3055_v29 = vadd.f32 %v6885_v22, %v3022_v24  ;;  %v3177_v2 = vadd.f32 %v3176_v50, %v7312_v7  ;;  %v7345_v33 = vadd.f32 1e-05, %v2576_v39 }
 0x52c   :  { %v2861_v44 = vmul.f32 %v4919_v63, %v7316_v53  ;;  %v2433_v4 = vpop.xlane.xlu0 %2432  ;;  %v3483_v27 = vrot.slane %v3482_v36, 2  ;;  %v2855_v16 = vmul.f32 %v7321_v34, %v2854_v14  ;;  %vm2867_vm12 = vweird.f32 %v4919_v63 }
 0x52d   :  { %v2513_v6 = vmul.f32 %v7337_v30, %v7337_v30  ;;  %v3255_v23 = vmax.f32 %v3177_v2, 0.0  ;;  %v2481_v57 = vmul.f32 %v2433_v4, %v6777_v52  ;;  %v3077_v5 = vpack.c.bf16 %v3055_v29, %v3054_v1  ;;  %vm2868_vm14 = vmor %vm2866_vm13, %vm2867_vm12 }
 0x52e   :  { %v2862_v55 = vmul.f32 %v4919_v63, %v2861_v44  ;;  %v3484_v9 = vmax.f32 %v3482_v36, %v3483_v27  ;;  %4920 = vrsqrt.f32 %v7345_v33  ;;  %v2859_v39 = vsel %vm7356_vm11, %v7321_v34, %v2855_v16 }
 0x52f   :  { %v3487_v42 = vsel %vm2194_vm8, %v3255_v23, -inf  ;;  %v2545_v46 = vsub.f32 %v2481_v57, %v2513_v6  ;;  %4692 = vmatmul.msk.bf16.gmra.mxu2 %vm2194_vm8, %v3077_v5  ;;  %v7354_v28 = vpack.c.bf16 %v3255_v23, %v3254_v37  ;;  %v2606_v1 = vsub.f32 %v6897_v38, %v7291_v58 }
 0x530   :  { %v2863_v45 = vmul.f32 0.5, %v2862_v55  ;;  %v3485_v35 = vrot.slane %v3484_v9, 1  ;;  %v3488_v18 = vrot.slane %v3487_v42, 4  ;;  %v2607_v53 = vsub.f32 %v6937_v41, %v7301_v21 }
 0x531   :  { %v2577_v14 = vmax.f32 %v2545_v46, 0.0  ;;  %v2990_v5 = vmul.f32 %v2859_v39, %v2606_v1  ;;  %vm2876_vm3 = vweird.f32 %v7345_v33 }
 0x532   :  { %v2864_v24 = vsub.f32 1.5, %v2863_v45  ;;  %v2269_v36 = vpop.xlane.xlu1 %2268  ;;  %v3489_v50 = vmax.f32 %v3487_v42, %v3488_v18  ;;  %v3179_v54 = vpop.f32.mrf.mxu2  ;;  %v3486_v44 = vmax.f32 %v3484_v9, %v3485_v35 }
 0x533   :  { %v7365_v29 = vmul.f32 %v6777_v52, %v2269_v36  ;;  %v7367_v2 = vadd.f32 1e-05, %v2577_v14  ;;  %v7370_v6 = vadd.f32 %v3179_v54, %v7312_v7 }
 0x534   :  { %v2865_v37 = vmul.f32 %v4919_v63, %v2864_v24  ;;  %v7372_v4 = vpop.eup %4920  ;;  %v3490_v34 = vrot.slane %v3489_v50, 2  ;;  %v2436_v27 = vpop.xlane.xlu0 %2435  ;;  %v3929_v38 = vpack.c.bf16 %v3486_v44, %v3486_v44 }
 0x535   :  { %v2871_v23 = vmul.f32 %v7372_v4, %v7345_v33  ;;  %4922 = vrsqrt.f32 %v7367_v2  ;;  %v2514_v57 = vmul.f32 %v7365_v29, %v7365_v29  ;;  %v3256_v41 = vmax.f32 %v7370_v6, 0.0 }
 0x536   :  { %v2869_v55 = vsel %vm2868_vm14, %v4919_v63, %v2865_v37  ;;  %v3491_v9 = vmax.f32 %v3489_v50, %v3490_v34  ;;  %v2482_v21 = vmul.f32 %v2436_v27, %v6777_v52  ;;  %v2608_v63 = vsub.f32 %v6963_v25, %v7319_v49 }
 0x537   :  { %v2991_v16 = vmul.f32 %v2869_v55, %v2607_v53  ;;  %v2872_v58 = vmul.f32 %v7372_v4, %v2871_v23  ;;  %v3494_v18 = vsel %vm2194_vm8, %v3256_v41, -inf  ;;  %vm2877_vm1 = vweird.f32 %v7372_v4 }
 0x538   :  { %v3492_v45 = vrot.slane %v3491_v9, 1  ;;  %v2546_v47 = vsub.f32 %v2482_v21, %v2514_v57  ;;  %v3495_v36 = vrot.slane %v3494_v18, 4  ;;  %v3023_v50 = vmul.f32 %v6859_v8, %v2990_v5  ;;  %vm7414_vm4 = vmor %vm2876_vm3, %vm2877_vm1 }
 0x539   :  { %v3024_v46 = vmul.f32 %v6859_v8, %v2991_v16  ;;  %v2873_v35 = vmul.f32 0.5, %v2872_v58  ;;  %v4191_v37 = vunpack.c.l.b16 %v3929_v38  ;;  %vm2886_vm6 = vweird.f32 %v7367_v2 }
 0x53a   :  { %v2272_v42 = vpop.xlane.xlu2 %2271  ;;  %v3493_v14 = vmax.f32 %v3491_v9, %v3492_v45  ;;  %v3181_v39 = vpop.f32.mrf.mxu2  ;;  %v2578_v6 = vmax.f32 %v2546_v47, 0.0  ;;  %v3496_v55 = vmax.f32 %v3494_v18, %v3495_v36  ;;  %vm4081_vm3 = vcmask 1045509  }
 0x53b   :  { %v7392_v24 = vmul.f32 %v6777_v52, %v2272_v42  ;;  %v4923_v54 = vpop.eup %4922  ;;  %v2874_v44 = vsub.f32 1.5, %v2873_v35  ;;  %v3182_v1 = vadd.f32 %v3181_v39, %v7312_v7  ;;  %v3057_v23 = vadd.f32 %v6885_v22, %v3024_v46 }
 0x53c   :  { %v2439_v53 = vpop.xlane.xlu1 %2438  ;;  %v3930_v34 = vpack.c.bf16 %v3493_v14, %v3493_v14  ;;  %v2881_v27 = vmul.f32 %v4923_v54, %v7367_v2  ;;  %v7400_v16 = vadd.f32 1e-05, %v2578_v6  ;;  %v3497_v21 = vrot.slane %v3496_v55, 2 }
 0x53d   :  { %v2875_v57 = vmul.f32 %v7372_v4, %v2874_v44  ;;  %v3257_v9 = vmax.f32 %v3182_v1, 0.0  ;;  %v2515_v5 = vmul.f32 %v7392_v24, %v7392_v24  ;;  %v2483_v45 = vmul.f32 %v2439_v53, %v6777_v52 }
 0x53e   :  { %v4192_v38 = vunpack.c.l.b16 %v3930_v34  ;;  %v2882_v58 = vmul.f32 %v4923_v54, %v2881_v27  ;;  %v2609_v42 = vsub.f32 %v7001_v48, %v7337_v30  ;;  %4924 = vrsqrt.f32 %v7400_v16 }
 0x53f   :  { %v3501_v46 = vsel %vm2194_vm8, %v3257_v9, -inf  ;;  %v3056_v35 = vadd.f32 %v6885_v22, %v3023_v50  ;;  %v3498_v14 = vmax.f32 %v3496_v55, %v3497_v21  ;;  %vm2887_vm5 = vweird.f32 %v4923_v54 }
 0x540   :  { %v4223_v18 = vsel %vm4073_vm15, %v4192_v38, %v4191_v37  ;;  %v2883_v47 = vmul.f32 0.5, %v2882_v58  ;;  %v3502_v48 = vrot.slane %v3501_v46, 4  ;;  %v2547_v30 = vsub.f32 %v2483_v45, %v2515_v5  ;;  %vm2888_vm7 = vmor %vm2886_vm6, %vm2887_vm5 }
 0x541   :  { %v3078_v39 = vpack.c.bf16 %v3057_v23, %v3056_v35  ;;  %v2879_v50 = vsel %vm7414_vm4, %v7372_v4, %v2875_v57  ;;  %v3499_v6 = vrot.slane %v3498_v14, 1  ;;  %v7428_v55 = vpack.c.bf16 %v3257_v9, %v3256_v41 }
 0x542   :  { %v2275_v44 = vpop.xlane.xlu2 %2274  ;;  %v2884_v33 = vsub.f32 1.5, %v2883_v47  ;;  %v3184_v37 = vpop.f32.mrf.mxu2  ;;  %v3503_v53 = vmax.f32 %v3501_v46, %v3502_v48  ;;  %v2579_v34 = vmax.f32 %v2547_v30, 0.0  ;;  %v2992_v2 = vmul.f32 %v2879_v50, %v2608_v63 }
 0x543   :  { %v7422_v1 = vmul.f32 %v6777_v52, %v2275_v44  ;;  %4693 = vmatmul.msk.bf16.gmra.mxu2 %vm2194_vm8, %v3078_v39  ;;  %v7426_v27 = vadd.f32 %v3184_v37, %v7312_v7  ;;  %v3500_v5 = vmax.f32 %v3498_v14, %v3499_v6  ;;  %vm2896_vm11 = vweird.f32 %v7400_v16 }
 0x544   :  { %v2885_v23 = vmul.f32 %v4923_v54, %v2884_v33  ;;  %v2442_v57 = vpop.xlane.xlu1 %2441  ;;  %v7433_v38 = vpop.eup %4924  ;;  %v3504_v58 = vrot.slane %v3503_v53, 2  ;;  %v7436_v21 = vadd.f32 1e-05, %v2579_v34  ;;  %v3025_v37 = vmul.f32 %v6859_v8, %v2992_v2 }
 0x545   :  { %v2516_v4 = vmul.f32 %v7422_v1, %v7422_v1  ;;  %v3258_v45 = vmax.f32 %v7426_v27, 0.0  ;;  %v2484_v41 = vmul.f32 %v2442_v57, %v6777_v52  ;;  %v3931_v46 = vpack.c.bf16 %v3500_v5, %v3500_v5 }
 0x546   :  { %v2889_v9 = vsel %vm2888_vm7, %v4923_v54, %v2885_v23  ;;  %v2891_v35 = vmul.f32 %v7433_v38, %v7400_v16  ;;  %v3505_v14 = vmax.f32 %v3503_v53, %v3504_v58  ;;  %4926 = vrsqrt.f32 %v7436_v21 }
 0x547   :  { %v2993_v47 = vmul.f32 %v2889_v9, %v2609_v42  ;;  %v4193_v36 = vunpack.c.l.b16 %v3931_v46  ;;  %v3508_v30 = vsel %vm2194_vm8, %v3258_v45, -inf  ;;  %v2548_v39 = vsub.f32 %v2484_v41, %v2516_v4 }
 0x548   :  { %v2892_v48 = vmul.f32 %v7433_v38, %v2891_v35  ;;  %v3506_v49 = vrot.slane %v3505_v14, 1  ;;  %v3509_v63 = vrot.slane %v3508_v30, 4  ;;  %v2610_v53 = vsub.f32 %v7025_v3, %v7365_v29 }
 0x549   :  { %v3026_v42 = vmul.f32 %v6859_v8, %v2993_v47  ;;  %v4224_v44 = vsel %vm4075_vm2, %v4193_v36, %v4223_v18  ;;  %v2580_v33 = vmax.f32 %v2548_v39, 0.0  ;;  %vm2897_vm0 = vweird.f32 %v7433_v38 }
 0x54a   :  { %v2278_v25 = vpop.xlane.xlu0 %2277  ;;  %v2893_v50 = vmul.f32 0.5, %v2892_v48  ;;  %v3186_v6 = vpop.f32.mrf.mxu2  ;;  %v3507_v34 = vmax.f32 %v3505_v14, %v3506_v49  ;;  %v3510_v23 = vmax.f32 %v3508_v30, %v3509_v63  ;;  %v3058_v47 = vadd.f32 %v6885_v22, %v3025_v37  ;;  %vm7480_vm12 = vmor %vm2896_vm11, %vm2897_vm0 }
 0x54b   :  { %v7451_v54 = vmul.f32 %v6777_v52, %v2278_v25  ;;  %v7459_v5 = vadd.f32 %v3186_v6, %v7312_v7  ;;  %v7461_v58 = vadd.f32 1e-05, %v2580_v33  ;;  %v3059_v3 = vadd.f32 %v6885_v22, %v3026_v42 }
 0x54c   :  { %v2445_v4 = vpop.xlane.xlu2 %2444  ;;  %v2894_v57 = vsub.f32 1.5, %v2893_v50  ;;  %v4927_v9 = vpop.eup %4926  ;;  %v3932_v46 = vpack.c.bf16 %v3507_v34, %v3507_v34  ;;  %v3511_v2 = vrot.slane %v3510_v23, 2  ;;  %v2611_v37 = vsub.f32 %v7062_v12, %v7392_v24 }
 0x54d   :  { %v2517_v18 = vmul.f32 %v7451_v54, %v7451_v54  ;;  %v2485_v41 = vmul.f32 %v2445_v4, %v6777_v52  ;;  %v3259_v35 = vmax.f32 %v7459_v5, 0.0  ;;  %v2901_v29 = vmul.f32 %v4927_v9, %v7436_v21 }
 0x54e   :  { %4928 = vrsqrt.f32 %v7461_v58  ;;  %v2895_v14 = vmul.f32 %v7433_v38, %v2894_v57  ;;  %v4194_v36 = vunpack.c.l.b16 %v3932_v46  ;;  %v3512_v48 = vmax.f32 %v3510_v23, %v3511_v2 }
 0x54f   :  { %v3515_v30 = vsel %vm2194_vm8, %v3259_v35, -inf  ;;  %v2902_v39 = vmul.f32 %v4927_v9, %v2901_v29  ;;  %v2549_v49 = vsub.f32 %v2485_v41, %v2517_v18  ;;  %v3079_v50 = vpack.c.bf16 %v3059_v3, %v3058_v47 }
 0x550   :  { %v3516_v25 = vrot.slane %v3515_v30, 4  ;;  %v4225_v63 = vsel %vm4077_vm9, %v4194_v36, %v4224_v44  ;;  %v3513_v42 = vrot.slane %v3512_v48, 1  ;;  %v2899_v16 = vsel %vm7480_vm12, %v7433_v38, %v2895_v14 }
 0x551   :  { %v2903_v34 = vmul.f32 0.5, %v2902_v39  ;;  %v2581_v4 = vmax.f32 %v2549_v49, 0.0  ;;  %vm2907_vm13 = vweird.f32 %v4927_v9  ;;  %vm2906_vm14 = vweird.f32 %v7436_v21 }
 0x552   :  { %v2281_v33 = vpop.xlane.xlu0 %2280  ;;  %v3517_v23 = vmax.f32 %v3515_v30, %v3516_v25  ;;  %v3189_v57 = vpop.f32.mrf.mxu2  ;;  %v3514_v44 = vmax.f32 %v3512_v48, %v3513_v42  ;;  %v2994_v47 = vmul.f32 %v2899_v16, %v2610_v53  ;;  %vm2908_vm1 = vmor %vm2906_vm14, %vm2907_vm13  ;;  %vm2916_vm5 = vweird.f32 %v7461_v58 }
 0x553   :  { %4694 = vmatmul.msk.bf16.gmra.mxu2 %vm2194_vm8, %v3079_v50  ;;  %v7491_v18 = vadd.f32 %v3189_v57, %v7312_v7  ;;  %v7494_v41 = vmul.f32 %v6777_v52, %v2281_v33  ;;  %v2904_v12 = vsub.f32 1.5, %v2903_v34  ;;  %v7498_v2 = vadd.f32 1e-05, %v2581_v4 }
 0x554   :  { %v7496_v46 = vpop.eup %4928  ;;  %v3518_v24 = vrot.slane %v3517_v23, 2  ;;  %v3933_v3 = vpack.c.bf16 %v3514_v44, %v3514_v44  ;;  %v2448_v48 = vpop.xlane.xlu2 %2447  ;;  %vm4083_vm0 = vcmask 1046534   ;;  %vm4085_vm13 = vcmask 1047559  }
 0x555   :  { %v2911_v38 = vmul.f32 %v7496_v46, %v7461_v58  ;;  %v3260_v29 = vmax.f32 %v7491_v18, 0.0  ;;  %v2905_v14 = vmul.f32 %v4927_v9, %v2904_v12  ;;  %4930 = vrsqrt.f32 %v7498_v2 }
 0x556   :  { %v3519_v36 = vmax.f32 %v3517_v23, %v3518_v24  ;;  %v4195_v30 = vunpack.c.l.b16 %v3933_v3  ;;  %v2518_v25 = vmul.f32 %v7494_v41, %v7494_v41  ;;  %v2486_v23 = vmul.f32 %v2448_v48, %v6777_v52 }
 0x557   :  { %v2912_v39 = vmul.f32 %v7496_v46, %v2911_v38  ;;  %v3522_v21 = vsel %vm2194_vm8, %v3260_v29, -inf  ;;  %v2909_v49 = vsel %vm2908_vm1, %v4927_v9, %v2905_v14  ;;  %v3027_v3 = vmul.f32 %v6859_v8, %v2994_v47 }
 0x558   :  { %v3520_v42 = vrot.slane %v3519_v36, 1  ;;  %v3523_v50 = vrot.slane %v3522_v21, 4  ;;  %v2995_v33 = vmul.f32 %v2909_v49, %v2611_v37  ;;  %v4226_v6 = vsel %vm4079_vm10, %v4195_v30, %v4225_v63 }
 0x559   :  { %v2913_v34 = vmul.f32 0.5, %v2912_v39  ;;  %v2550_v12 = vsub.f32 %v2486_v23, %v2518_v25  ;;  %v2612_v63 = vsub.f32 %v7085_v56, %v7422_v1  ;;  %vm2917_vm4 = vweird.f32 %v7496_v46 }
 0x55a   :  { %v2284_v53 = vpop.xlane.xlu1 %2283  ;;  %v3521_v4 = vmax.f32 %v3519_v36, %v3520_v42  ;;  %v3524_v57 = vmax.f32 %v3522_v21, %v3523_v50  ;;  %v3191_v16 = vpop.f32.mrf.mxu2  ;;  %v3028_v37 = vmul.f32 %v6859_v8, %v2995_v33  ;;  %v3060_v56 = vadd.f32 %v6885_v22, %v3027_v3  ;;  %vm7542_vm6 = vmor %vm2916_vm5, %vm2917_vm4 }
 0x55b   :  { %v7514_v44 = vmul.f32 %v6777_v52, %v2284_v53  ;;  %v3192_v24 = vadd.f32 %v3191_v16, %v7312_v7  ;;  %v4931_v38 = vpop.eup %4930  ;;  %v2914_v14 = vsub.f32 1.5, %v2913_v34  ;;  %v2582_v39 = vmax.f32 %v2550_v12, 0.0 }
 0x55c   :  { %v2451_v9 = vpop.xlane.xlu0 %2450  ;;  %v3934_v36 = vpack.c.bf16 %v3521_v4, %v3521_v4  ;;  %v3525_v48 = vrot.slane %v3524_v57, 2  ;;  %v2921_v30 = vmul.f32 %v4931_v38, %v7498_v2  ;;  %v3061_v1 = vadd.f32 %v6885_v22, %v3028_v37 }
 0x55d   :  { %v2519_v21 = vmul.f32 %v7514_v44, %v7514_v44  ;;  %v3261_v47 = vmax.f32 %v3192_v24, 0.0  ;;  %v2487_v42 = vmul.f32 %v2451_v9, %v6777_v52  ;;  %v7526_v53 = vadd.f32 1e-05, %v2582_v39 }
 0x55e   :  { %v4196_v25 = vunpack.c.l.b16 %v3934_v36  ;;  %v3526_v49 = vmax.f32 %v3524_v57, %v3525_v48  ;;  %v2922_v50 = vmul.f32 %v4931_v38, %v2921_v30  ;;  %v2915_v33 = vmul.f32 %v7496_v46, %v2914_v14 }
 0x55f   :  { %v3529_v4 = vsel %vm2194_vm8, %v3261_v47, -inf  ;;  %4932 = vrsqrt.f32 %v7526_v53  ;;  %v2551_v9 = vsub.f32 %v2487_v42, %v2519_v21  ;;  %v3080_v36 = vpack.c.bf16 %v3061_v1, %v3060_v56 }
 0x560   :  { %v4227_v34 = vsel %vm4081_vm3, %v4196_v25, %v4226_v6  ;;  %v3527_v23 = vrot.slane %v3526_v49, 1  ;;  %v2923_v57 = vmul.f32 0.5, %v2922_v50  ;;  %v3530_v16 = vrot.slane %v3529_v4, 4 }
 0x561   :  { %vm2927_vm7 = vweird.f32 %v4931_v38  ;;  %v2919_v48 = vsel %vm7542_vm6, %v7496_v46, %v2915_v33  ;;  %v2583_v39 = vmax.f32 %v2551_v9, 0.0  ;;  %vm2926_vm11 = vweird.f32 %v7498_v2 }
 0x562   :  { %v2287_v12 = vpop.xlane.xlu1 %2286  ;;  %v3528_v24 = vmax.f32 %v3526_v49, %v3527_v23  ;;  %v7535_v3 = vpop.f32.mrf.mxu2  ;;  %v2924_v58 = vsub.f32 1.5, %v2923_v57  ;;  %v3531_v14 = vmax.f32 %v3529_v4, %v3530_v16  ;;  %v2613_v56 = vsub.f32 %v7122_v32, %v7451_v54  ;;  %vm2928_vm12 = vmor %vm2926_vm11, %vm2927_vm7 }
 0x563   :  { %v7538_v37 = vmul.f32 %v6777_v52, %v2287_v12  ;;  %4695 = vmatmul.msk.bf16.gmra.mxu2 %vm2194_vm8, %v3080_v36  ;;  %v2647_v46 = vadd.f32 1e-05, %v2583_v39  ;;  %v7558_v33 = vpack.c.bf16 %v3261_v47, %v3260_v29  ;;  %v2996_v4 = vmul.f32 %v2919_v48, %v2612_v63 }
 0x564   :  { %v3935_v30 = vpack.c.bf16 %v3528_v24, %v3528_v24  ;;  %v2454_v25 = vpop.xlane.xlu0 %2453  ;;  %v2925_v49 = vmul.f32 %v4931_v38, %v2924_v58  ;;  %v3532_v42 = vrot.slane %v3531_v14, 2  ;;  %vm2936_vm1 = vweird.f32 %v7526_v53 }
 0x565   :  { %v2520_v21 = vmul.f32 %v7538_v37, %v7538_v37  ;;  %v2488_v50 = vmul.f32 %v2454_v25, %v6777_v52  ;;  %v4933_v23 = vpop.eup %4932  ;;  %4934 = vrsqrt.f32 %v2647_v46  ;;  %v3029_v47 = vmul.f32 %v6859_v8, %v2996_v4 }
 0x566   :  { %v4197_v1 = vunpack.c.l.b16 %v3935_v30  ;;  %v2929_v57 = vsel %vm2928_vm12, %v4931_v38, %v2925_v49  ;;  %v3533_v16 = vmax.f32 %v3531_v14, %v3532_v42  ;;  %v2931_v9 = vmul.f32 %v4933_v23, %v7526_v53 }
 0x567   :  { %v2552_v12 = vsub.f32 %v2488_v50, %v2520_v21  ;;  %v2997_v24 = vmul.f32 %v2929_v57, %v2613_v56  ;;  %v3062_v5 = vadd.f32 %v6885_v22, %v3029_v47  ;;  %vm2937_vm14 = vweird.f32 %v4933_v23 }
 0x568   :  { %v4228_v2 = vsel %vm4083_vm0, %v4197_v1, %v4227_v34  ;;  %v3534_v6 = vrot.slane %v3533_v16, 1  ;;  %v2932_v32 = vmul.f32 %v4933_v23, %v2931_v9  ;;  %v7571_v34 = vpack.c.bf16 %v3259_v35, %v3258_v45  ;;  %vm2938_vm4 = vmor %vm2936_vm1, %vm2937_vm14 }
 0x569   :  { %v2584_v54 = vmax.f32 %v2552_v12, 0.0  ;;  %v3030_v29 = vmul.f32 %v6859_v8, %v2997_v24  ;;  %vm2946_vm6 = vweird.f32 %v2647_v46  ;;  %v2615_v53 = vsub.f32 %v7182_v51, %v7514_v44 }
 0x56a   :  { %v2290_v36 = vpop.xlane.xlu2 %2289  ;;  %v3196_v58 = vpop.f32.mrf.mxu2  ;;  %v3535_v63 = vmax.f32 %v3533_v16, %v3534_v6  ;;  %v2933_v14 = vmul.f32 0.5, %v2932_v32 }
 0x56b   :  { %v7563_v18 = vmul.f32 %v6777_v52, %v2290_v36  ;;  %v2648_v48 = vadd.f32 1e-05, %v2584_v54  ;;  %v3063_v49 = vadd.f32 %v6885_v22, %v3030_v29  ;;  %v4935_v42 = vpop.eup %4934  ;;  %v2614_v36 = vsub.f32 %v7145_v19, %v7494_v41 }
 0x56c   :  { %v2457_v38 = vpop.xlane.xlu1 %2456  ;;  %v3936_v39 = vpack.c.bf16 %v3535_v63, %v3535_v63  ;;  %v2934_v25 = vsub.f32 1.5, %v2933_v14  ;;  %v2941_v35 = vmul.f32 %v4935_v42, %v2647_v46  ;;  %vm2947_vm5 = vweird.f32 %v4935_v42 }
 0x56d   :  { %v2521_v30 = vmul.f32 %v7563_v18, %v7563_v18  ;;  %v2489_v21 = vmul.f32 %v2457_v38, %v6777_v52  ;;  %4936 = vrsqrt.f32 %v2648_v48  ;;  %v3081_v4 = vpack.c.bf16 %v3063_v49, %v3062_v5  ;;  %vm2948_vm7 = vmor %vm2946_vm6, %vm2947_vm5 }
 0x56e   :  { %v4198_v50 = vunpack.c.l.b16 %v3936_v39  ;;  %v2935_v45 = vmul.f32 %v4933_v23, %v2934_v25  ;;  %v2942_v52 = vmul.f32 %v4935_v42, %v2941_v35  ;;  %vm2956_vm12 = vweird.f32 %v2648_v48 }
 0x56f   :  { %v2553_v27 = vsub.f32 %v2489_v21, %v2521_v30  ;;  %v7590_v21 = vadd.f32 %v3196_v58, %v7312_v7 }
 0x570   :  { %v7579_v56 = vsel %vm4085_vm13, %v4198_v50, %v4228_v2  ;;  %v2939_v24 = vsel %vm2938_vm4, %v4933_v23, %v2935_v45  ;;  %v2943_v9 = vmul.f32 0.5, %v2942_v52  ;;  %v7599_v50 = vadd.f32 %v7535_v3, %v7312_v7 }
 0x571   :  { %v2585_v1 = vmax.f32 %v2553_v27, 0.0  ;;  %v2998_v32 = vmul.f32 %v2939_v24, %v2614_v36 }
 0x572   :  { %v3199_v57 = vpop.f32.mrf.mxu2  ;;  %v2944_v2 = vsub.f32 1.5, %v2943_v9  ;;  %v3262_v24 = vmax.f32 %v7599_v50, 0.0  ;;  %v2617_v9 = vsub.f32 %v7237_v61, %v7563_v18 }
 0x573   :  { %v2649_v16 = vadd.f32 1e-05, %v2585_v1  ;;  %v4937_v12 = vpop.eup %4936  ;;  %4696 = vmatmul.msk.bf16.gmra.mxu2 %vm2194_vm8, %v3081_v4  ;;  %v3031_v19 = vmul.f32 %v6859_v8, %v2998_v32  ;;  %v3263_v4 = vmax.f32 %v7590_v21, 0.0 }
 0x574   :  { %v2951_v6 = vmul.f32 %v4937_v12, %v2648_v48  ;;  %v2945_v29 = vmul.f32 %v4935_v42, %v2944_v2  ;;  %vm2957_vm11 = vweird.f32 %v4937_v12  ;;  %v2616_v48 = vsub.f32 %v7205_v43, %v7538_v37 }
 0x575   :  { %4938 = vrsqrt.f32 %v2649_v16  ;;  %v3064_v51 = vadd.f32 %v6885_v22, %v3031_v19  ;;  %vm7604_vm14 = vmor %vm2956_vm12, %vm2957_vm11  ;;  %vm2966_vm4 = vweird.f32 %v2649_v16  ;;  %v3543_v43 = vsel %vm2194_vm8, %v3263_v4, -inf }
 0x576   :  { %v2952_v54 = vmul.f32 %v4937_v12, %v2951_v6  ;;  %v2949_v23 = vsel %vm2948_vm7, %v4935_v42, %v2945_v29  ;;  %v7595_v42 = vadd.f32 %v3199_v57, %v7312_v7  ;;  %v3536_v61 = vsel %vm2194_vm8, %v3262_v24, -inf }
 0x577   :  { %v2999_v14 = vmul.f32 %v2949_v23, %v2615_v53  ;;  %v3544_v29 = vrot.slane %v3543_v43, 4 }
 0x578   :  { %v2953_v63 = vmul.f32 0.5, %v2952_v54  ;;  %v3264_v57 = vmax.f32 %v7595_v42, 0.0  ;;  %v4782_v54 = vld [vmem:[#allocation14 + $0x18] sm:$0xff] }
 0x579   :  { %v3032_v39 = vmul.f32 %v6859_v8, %v2999_v14  ;;  %4287 = vmatpush.bf16.msra.mxu2 %v4782_v54  ;;  %v3537_v14 = vrot.slane %v3536_v61, 4 }
 0x57a   :  { %v3201_v38 = vpop.f32.mrf.mxu2  ;;  %v2954_v30 = vsub.f32 1.5, %v2953_v63 }
 0x57b   :  { %v4939_v47 = vpop.eup %4938  ;;  %v3065_v44 = vadd.f32 %v6885_v22, %v3032_v39  ;;  %v7602_v27 = vadd.f32 %v3201_v38, %v7312_v7 }
 0x57c   :  { %v2961_v41 = vmul.f32 %v4939_v47, %v2649_v16  ;;  %v2955_v46 = vmul.f32 %v4937_v12, %v2954_v30  ;;  %vm2967_vm1 = vweird.f32 %v4939_v47  ;;  %v3550_v16 = vsel %vm2194_vm8, %v3264_v57, -inf }
 0x57d   :  { %v3082_v58 = vpack.c.bf16 %v3065_v44, %v3064_v51  ;;  %vm2968_vm5 = vmor %vm2966_vm4, %vm2967_vm1  ;;  %v3551_v38 = vrot.slane %v3550_v16, 4 }
 0x57e   :  { %v2962_v25 = vmul.f32 %v4939_v47, %v2961_v41  ;;  %v2959_v1 = vsel %vm7604_vm14, %v4937_v12, %v2955_v46  ;;  %v3265_v12 = vmax.f32 %v7602_v27, 0.0  ;;  %v3545_v46 = vmax.f32 %v3543_v43, %v3544_v29 }
 0x57f   :  { %v3000_v36 = vmul.f32 %v2959_v1, %v2616_v48  ;;  %v3552_v44 = vmax.f32 %v3550_v16, %v3551_v38  ;;  %v4780_v1 = vld [vmem:[#allocation14 + $0x8] sm:$0xff]  ;;  %v3290_v27 = vpack.c.bf16 %v3263_v4, %v3262_v24 }
 0x580   :  { %v2963_v49 = vmul.f32 0.5, %v2962_v25  ;;  %v3557_v18 = vsel %vm2194_vm8, %v3265_v12, -inf  ;;  %v4781_v25 = vld [vmem:[#allocation14 + $0x10] sm:$0xff]  ;;  %v3546_v48 = vrot.slane %v3545_v46, 2 }
 0x581   :  { %v3033_v23 = vmul.f32 %v6859_v8, %v3000_v36  ;;  %v3558_v30 = vrot.slane %v3557_v18, 4  ;;  %4288 = vmatpush.bf16.msra.mxu2 %v4781_v25  ;;  %v3553_v36 = vrot.slane %v3552_v44, 2 }
 0x582   :  { %v2964_v45 = vsub.f32 1.5, %v2963_v49  ;;  %v3204_v35 = vpop.f32.mrf.mxu2 }
 0x583   :  { %v7612_v3 = vadd.f32 %v3204_v35, %v7312_v7  ;;  %4697 = vmatmul.msk.bf16.gmra.mxu2 %vm2194_vm8, %v3082_v58  ;;  %v3066_v51 = vadd.f32 %v6885_v22, %v3033_v23  ;;  %v3559_v58 = vmax.f32 %v3557_v18, %v3558_v30  ;;  %v3554_v54 = vmax.f32 %v3552_v44, %v3553_v36 }
 0x584   :  { %v2965_v52 = vmul.f32 %v4939_v47, %v2964_v45 }
 0x585   :  { %v3266_v2 = vmax.f32 %v7612_v3, 0.0  ;;  %4289 = vmatpush.bf16.msra.mxu2 %v4780_v1  ;;  %v3291_v3 = vpack.c.bf16 %v3265_v12, %v3264_v57 }
 0x586   :  { %v2969_v6 = vsel %vm2968_vm5, %v4939_v47, %v2965_v52 }
 0x587   :  { %v3001_v37 = vmul.f32 %v2969_v6, %v2617_v9  ;;  %v3564_v53 = vsel %vm2194_vm8, %v3266_v2, -inf }
 0x588   :  { %v3565_v41 = vrot.slane %v3564_v53, 4 }
 0x589   :  { %v3034_v32 = vmul.f32 %v6859_v8, %v3001_v37  ;;  %v3538_v8 = vmax.f32 %v3536_v61, %v3537_v14  ;;  %v3560_v37 = vrot.slane %v3559_v58, 2  ;;  %v3547_v61 = vmax.f32 %v3545_v46, %v3546_v48 }
 0x58a   :  { %v3206_v63 = vpop.f32.mrf.mxu2  ;;  %v3566_v35 = vmax.f32 %v3564_v53, %v3565_v41  ;;  %v3555_v41 = vrot.slane %v3554_v54, 1 }
 0x58b   :  { %v7641_v47 = vadd.f32 %v3206_v63, %v7312_v7  ;;  %v3067_v19 = vadd.f32 %v6885_v22, %v3034_v32  ;;  %v3539_v43 = vrot.slane %v3538_v8, 2  ;;  %v4779_v32 = vld [vmem:[#allocation14] sm:$0xff]  ;;  %v3561_v63 = vmax.f32 %v3559_v58, %v3560_v37 }
 0x58c   :  { %v3567_v22 = vrot.slane %v3566_v35, 2  ;;  %4290 = vmatpush.bf16.msra.mxu2 %v4779_v32 }
 0x58d   :  { %v3267_v39 = vmax.f32 %v7641_v47, 0.0  ;;  %v3083_v45 = vpack.c.bf16 %v3067_v19, %v3066_v51  ;;  %v3540_v53 = vmax.f32 %v3538_v8, %v3539_v43  ;;  %v3548_v47 = vrot.slane %v3547_v61, 1 }
 0x58e   :  { %v3568_v38 = vmax.f32 %v3566_v35, %v3567_v22 }
 0x58f   :  { %v3571_v49 = vsel %vm2194_vm8, %v3267_v39, -inf  ;;  %v3541_v51 = vrot.slane %v3540_v53, 1  ;;  %v3549_v44 = vmax.f32 %v3547_v61, %v3548_v47  ;;  %v3292_v61 = vpack.c.bf16 %v3267_v39, %v3266_v2 }
 0x590   :  { %v3572_v5 = vrot.slane %v3571_v49, 4  ;;  %v3569_v46 = vrot.slane %v3568_v38, 1 }
 0x591   :  { %v3542_v35 = vmax.f32 %v3540_v53, %v3541_v51  ;;  %v3938_v37 = vpack.c.bf16 %v3549_v44, %v3549_v44 }
 0x592   :  { %v3573_v52 = vmax.f32 %v3571_v49, %v3572_v5  ;;  %v3209_v9 = vpop.f32.mrf.mxu2  ;;  %v3562_v49 = vrot.slane %v3561_v63, 1  ;;  %v3570_v43 = vmax.f32 %v3568_v38, %v3569_v46 }
 0x593   :  { %v3210_v6 = vadd.f32 %v3209_v9, %v7312_v7  ;;  %4698 = vmatmul.msk.bf16.gmra.mxu2 %vm2194_vm8, %v3083_v45  ;;  %v3556_v9 = vmax.f32 %v3554_v54, %v3555_v41 }
 0x594   :  { %v3574_v18 = vrot.slane %v3573_v52, 2  ;;  %v3563_v36 = vmax.f32 %v3561_v63, %v3562_v49  ;;  %v3941_v53 = vpack.c.bf16 %v3570_v43, %v3570_v43 }
 0x595   :  { %v3268_v16 = vmax.f32 %v3210_v6, 0.0 }
 0x596   :  { %v3575_v14 = vmax.f32 %v3573_v52, %v3574_v18  ;;  %v3940_v47 = vpack.c.bf16 %v3563_v36, %v3563_v36  ;;  %v4203_v46 = vunpack.c.l.b16 %v3941_v53 }
 0x597   :  { %v3578_v29 = vsel %vm2194_vm8, %v3268_v16, -inf }
 0x598   :  { %v3579_v23 = vrot.slane %v3578_v29, 4  ;;  %v3576_v1 = vrot.slane %v3575_v14, 1  ;;  %v4202_v39 = vunpack.c.l.b16 %v3940_v47 }
 0x59a   :  { %v3580_v30 = vmax.f32 %v3578_v29, %v3579_v23  ;;  %v3211_v19 = vpop.f32.mrf.mxu2  ;;  %v3577_v22 = vmax.f32 %v3575_v14, %v3576_v1  ;;  %v3939_v29 = vpack.c.bf16 %v3556_v9, %v3556_v9 }
 0x59b   :  { %v3212_v25 = vadd.f32 %v3211_v19, %v7312_v7  ;;  %v4200_v19 = vunpack.c.l.b16 %v3938_v37 }
 0x59c   :  { %v3581_v5 = vrot.slane %v3580_v30, 2  ;;  %v3942_v38 = vpack.c.bf16 %v3577_v22, %v3577_v22 }
 0x59d   :  { %v3269_v45 = vmax.f32 %v3212_v25, 0.0  ;;  %v4201_v25 = vunpack.c.l.b16 %v3939_v29 }
 0x59e   :  { %v3582_v48 = vmax.f32 %v3580_v30, %v3581_v5  ;;  %v4204_v44 = vunpack.c.l.b16 %v3942_v38 }
 0x59f   :  { %v3293_v8 = vpack.c.bf16 %v3269_v45, %v3268_v16  ;;  %v3585_v58 = vsel %vm2194_vm8, %v3269_v45, -inf  ;;  %v3937_v16 = vpack.c.bf16 %v3542_v35, %v3542_v35 }
 0x5a0   :  { %v3583_v52 = vrot.slane %v3582_v48, 1  ;;  %v3586_v6 = vrot.slane %v3585_v58, 4 }
 0x5a1   :  { %3302 = vmatpush.bf16.msra.mxu3 %v3293_v8  ;;  %v4199_v2 = vunpack.c.l.b16 %v3937_v16 }
 0x5a2   :  { %v3587_v32 = vmax.f32 %v3585_v58, %v3586_v6  ;;  %v3214_v18 = vpop.f32.mrf.mxu2  ;;  %v3584_v23 = vmax.f32 %v3582_v48, %v3583_v52 }
 0x5a3   :  { %v3215_v54 = vadd.f32 %v3214_v18, %v7312_v7  ;;  %v4230_v45 = vsel %vm4073_vm15, %v4200_v19, %v4199_v2 }
 0x5a4   :  { %v3588_v30 = vrot.slane %v3587_v32, 2  ;;  %v3943_v14 = vpack.c.bf16 %v3584_v23, %v3584_v23  ;;  %v4231_v8 = vsel %vm4075_vm2, %v4201_v25, %v4230_v45 }
 0x5a5   :  { %v3270_v63 = vmax.f32 %v3215_v54, 0.0  ;;  %3303 = vmatpush.bf16.msra.mxu3 %v3292_v61  ;;  %v4232_v57 = vsel %vm4077_vm9, %v4202_v39, %v4231_v8 }
 0x5a6   :  { %v3589_v41 = vmax.f32 %v3587_v32, %v3588_v30  ;;  %v4205_v58 = vunpack.c.l.b16 %v3943_v14  ;;  %v4233_v36 = vsel %vm4079_vm10, %v4203_v46, %v4232_v57 }
 0x5a7   :  { %v3592_v51 = vsel %vm2194_vm8, %v3270_v63, -inf  ;;  %v4234_v6 = vsel %vm4081_vm3, %v4204_v44, %v4233_v36 }
 0x5a8   :  { %v3590_v49 = vrot.slane %v3589_v41, 1  ;;  %v3593_v5 = vrot.slane %v3592_v51, 4  ;;  %v4235_v22 = vsel %vm4083_vm0, %v4205_v58, %v4234_v6 }
 0x5a9   :  { %3304 = vmatpush.bf16.msra.mxu3 %v3291_v3 }
 0x5aa   :  { %v3591_v1 = vmax.f32 %v3589_v41, %v3590_v49  ;;  %v3594_v48 = vmax.f32 %v3592_v51, %v3593_v5  ;;  %v3216_v9 = vpop.f32.mrf.mxu2 }
 0x5ab   :  { %v3217_v42 = vadd.f32 %v3216_v9, %v7312_v7 }
 0x5ac   :  { %v3944_v12 = vpack.c.bf16 %v3591_v1, %v3591_v1  ;;  %v3595_v35 = vrot.slane %v3594_v48, 2 }
 0x5ad   :  { %v3271_v52 = vmax.f32 %v3217_v42, 0.0  ;;  %3305 = vmatpush.bf16.msra.mxu3 %v3290_v27 }
 0x5ae   :  { %v4206_v43 = vunpack.c.l.b16 %v3944_v12  ;;  %v3596_v37 = vmax.f32 %v3594_v48, %v3595_v35 }
 0x5af   :  { %v7671_v32 = vpack.c.bf16 %v3271_v52, %v3270_v63  ;;  %v3599_v50 = vsel %vm2194_vm8, %v3271_v52, -inf }
 0x5b0   :  { %v4236_v21 = vsel %vm4085_vm13, %v4206_v43, %v4235_v22  ;;  %v3600_v4 = vrot.slane %v3599_v50, 4  ;;  %v3597_v18 = vrot.slane %v3596_v37, 1 }
 0x5b1   :  { %v4251_v24 = vpack.c.b16 %v4236_v21, %v7579_v56  ;;  %3306 = vmatpush.bf16.msra.mxu3 %v7558_v33 }
 0x5b2   :  { %v3601_v29 = vmax.f32 %v3599_v50, %v3600_v4  ;;  %v3219_v61 = vpop.f32.mrf.mxu2  ;;  %v3598_v47 = vmax.f32 %v3596_v37, %v3597_v18 }
 0x5b3   :  { %v3220_v23 = vadd.f32 %v3219_v61, %v7312_v7  ;;  %4733 = vmatmul.msk.bf16.vlgmr.msra.gmra.mxu2 %vm2194_vm8, %v4251_v24 }
 0x5b4   :  { %v3602_v54 = vrot.slane %v3601_v29, 2  ;;  %v3945_v33 = vpack.c.bf16 %v3598_v47, %v3598_v47 }
 0x5b5   :  { %v3272_v16 = vmax.f32 %v3220_v23, 0.0  ;;  %3307 = vmatpush.bf16.msra.mxu3 %v7571_v34 }
 0x5b6   :  { %v3603_v30 = vmax.f32 %v3601_v29, %v3602_v54  ;;  %v4207_v34 = vunpack.c.l.b16 %v3945_v33 }
 0x5b7   :  { %v3606_v53 = vsel %vm2194_vm8, %v3272_v16, -inf }
 0x5b8   :  { %v3604_v63 = vrot.slane %v3603_v30, 1  ;;  %v3607_v19 = vrot.slane %v3606_v53, 4 }
 0x5b9   :  { %3308 = vmatpush.bf16.msra.mxu3 %v7428_v55 }
 0x5ba   :  { %v3605_v56 = vmax.f32 %v3603_v30, %v3604_v63  ;;  %v3608_v38 = vmax.f32 %v3606_v53, %v3607_v19  ;;  %v3221_v41 = vpop.f32.mrf.mxu2 }
 0x5bb   :  { %v3222_v25 = vadd.f32 %v3221_v41, %v7312_v7 }
 0x5bc   :  { %v3946_v14 = vpack.c.bf16 %v3605_v56, %v3605_v56  ;;  %v3609_v51 = vrot.slane %v3608_v38, 2 }
 0x5bd   :  { %v3273_v3 = vmax.f32 %v3222_v25, 0.0  ;;  %3309 = vmatpush.bf16.msra.mxu3 %v7354_v28 }
 0x5be   :  { %v4208_v2 = vunpack.c.l.b16 %v3946_v14  ;;  %v3610_v39 = vmax.f32 %v3608_v38, %v3609_v51 }
 0x5bf   :  { %v7684_v49 = vpack.c.bf16 %v3273_v3, %v3272_v16  ;;  %v3613_v5 = vsel %vm2194_vm8, %v3273_v3, -inf }
 0x5c0   :  { %v4237_v55 = vsel %vm4073_vm15, %v4208_v2, %v4207_v34  ;;  %v3611_v46 = vrot.slane %v3610_v39, 1  ;;  %v3614_v45 = vrot.slane %v3613_v5, 4  ;;  %3310 = vmatmul.bf16.vlgmr.msra.gmra.mxu3 %v6457_v17 }
 0x5c2   :  { %v3612_v44 = vmax.f32 %v3610_v39, %v3611_v46  ;;  %v3615_v1 = vmax.f32 %v3613_v5, %v3614_v45 }
 0x5c4   :  { %v3947_v48 = vpack.c.bf16 %v3612_v44, %v3612_v44  ;;  %v3616_v9 = vrot.slane %v3615_v1, 2 }
 0x5c6   :  { %v4209_v8 = vunpack.c.l.b16 %v3947_v48  ;;  %v3617_v58 = vmax.f32 %v3615_v1, %v3616_v9  ;;  %v3224_v28 = vpop.f32.mrf.mxu2 }
 0x5c7   :  { %v3225_v42 = vadd.f32 %v3224_v28, %v7312_v7 }
 0x5c8   :  { %v4238_v27 = vsel %vm4075_vm2, %v4209_v8, %v4237_v55  ;;  %v3618_v57 = vrot.slane %v3617_v58, 1 }
 0x5c9   :  { %v3274_v12 = vmax.f32 %v3225_v42, 0.0 }
 0x5ca   :  { %v3619_v35 = vmax.f32 %v3617_v58, %v3618_v57 }
 0x5cb   :  { %v3620_v36 = vsel %vm2194_vm8, %v3274_v12, -inf }
 0x5cc   :  { %v3948_v52 = vpack.c.bf16 %v3619_v35, %v3619_v35  ;;  %v3621_v6 = vrot.slane %v3620_v36, 4 }
 0x5ce   :  { %v4210_v43 = vunpack.c.l.b16 %v3948_v52  ;;  %v3622_v17 = vmax.f32 %v3620_v36, %v3621_v6  ;;  %v3226_v37 = vpop.f32.mrf.mxu2 }
 0x5cf   :  { %v3227_v22 = vadd.f32 %v3226_v37, %v7312_v7 }
 0x5d0   :  { %v4239_v50 = vsel %vm4077_vm9, %v4210_v43, %v4238_v27  ;;  %v3623_v21 = vrot.slane %v3622_v17, 2  ;;  %3315 = vmatmul.bf16.gmra.mxu3 %v6476_v62 }
 0x5d1   :  { %v3275_v4 = vmax.f32 %v3227_v22, 0.0 }
 0x5d2   :  { %v3624_v24 = vmax.f32 %v3622_v17, %v3623_v21 }
 0x5d3   :  { %v7695_v18 = vpack.c.bf16 %v3275_v4, %v3274_v12  ;;  %v3627_v29 = vsel %vm2194_vm8, %v3275_v4, -inf }
 0x5d4   :  { %v3625_v61 = vrot.slane %v3624_v24, 1  ;;  %v3628_v23 = vrot.slane %v3627_v29, 4 }
 0x5d6   :  { %v3626_v54 = vmax.f32 %v3624_v24, %v3625_v61  ;;  %v3629_v16 = vmax.f32 %v3627_v29, %v3628_v23  ;;  %v3229_v47 = vpop.f32.mrf.mxu2 }
 0x5d7   :  { %v3230_v30 = vadd.f32 %v3229_v47, %v7312_v7 }
 0x5d8   :  { %v3949_v53 = vpack.c.bf16 %v3626_v54, %v3626_v54  ;;  %v3630_v63 = vrot.slane %v3629_v16, 2 }
 0x5d9   :  { %v3276_v19 = vmax.f32 %v3230_v30, 0.0 }
 0x5da   :  { %v4211_v33 = vunpack.c.l.b16 %v3949_v53  ;;  %v3631_v56 = vmax.f32 %v3629_v16, %v3630_v63 }
 0x5db   :  { %v3634_v62 = vsel %vm2194_vm8, %v3276_v19, -inf }
 0x5dc   :  { %v4240_v38 = vsel %vm4079_vm10, %v4211_v33, %v4239_v50  ;;  %v3632_v41 = vrot.slane %v3631_v56, 1  ;;  %v3635_v25 = vrot.slane %v3634_v62, 4 }
 0x5de   :  { %v3633_v14 = vmax.f32 %v3631_v56, %v3632_v41  ;;  %v3636_v51 = vmax.f32 %v3634_v62, %v3635_v25  ;;  %v3231_v3 = vpop.f32.mrf.mxu2 }
 0x5df   :  { %v3232_v34 = vadd.f32 %v3231_v3, %v7312_v7 }
 0x5e0   :  { %v3950_v2 = vpack.c.bf16 %v3633_v14, %v3633_v14  ;;  %v3637_v39 = vrot.slane %v3636_v51, 2  ;;  %3320 = vmatmul.bf16.gmra.mxu3 %v6483_v40 }
 0x5e1   :  { %v3277_v5 = vmax.f32 %v3232_v34, 0.0 }
 0x5e2   :  { %v4212_v55 = vunpack.c.l.b16 %v3950_v2  ;;  %v3638_v46 = vmax.f32 %v3636_v51, %v3637_v39 }
 0x5e3   :  { %v7703_v45 = vpack.c.bf16 %v3277_v5, %v3276_v19  ;;  %v3641_v44 = vsel %vm2194_vm8, %v3277_v5, -inf }
 0x5e4   :  { %v3639_v1 = vrot.slane %v3638_v46, 1  ;;  %v3642_v48 = vrot.slane %v3641_v44, 4  ;;  %v4241_v9 = vsel %vm4081_vm3, %v4212_v55, %v4240_v38 }
 0x5e6   :  { %v3640_v8 = vmax.f32 %v3638_v46, %v3639_v1  ;;  %v3643_v58 = vmax.f32 %v3641_v44, %v3642_v48  ;;  %v3234_v28 = vpop.f32.mrf.mxu2 }
 0x5e7   :  { %v7720_v4 = vadd.f32 %v3234_v28, %v7312_v7 }
 0x5e8   :  { %v3951_v42 = vpack.c.bf16 %v3640_v8, %v3640_v8  ;;  %v3644_v27 = vrot.slane %v3643_v58, 2 }
 0x5e9   :  { %v3278_v23 = vmax.f32 %v7720_v4, 0.0 }
 0x5ea   :  { %v4213_v57 = vunpack.c.l.b16 %v3951_v42  ;;  %v3645_v12 = vmax.f32 %v3643_v58, %v3644_v27 }
 0x5eb   :  { %v3648_v53 = vsel %vm2194_vm8, %v3278_v23, -inf }
 0x5ec   :  { %v3646_v35 = vrot.slane %v3645_v12, 1  ;;  %v4242_v40 = vsel %vm4083_vm0, %v4213_v57, %v4241_v9  ;;  %v3649_v41 = vrot.slane %v3648_v53, 4 }
 0x5ee   :  { %v3647_v36 = vmax.f32 %v3645_v12, %v3646_v35  ;;  %v3236_v52 = vpop.f32.mrf.mxu2  ;;  %v3650_v39 = vmax.f32 %v3648_v53, %v3649_v41 }
 0x5ef   :  { %v7714_v50 = vadd.f32 %v3236_v52, %v7312_v7 }
 0x5f0   :  { %v3952_v6 = vpack.c.bf16 %v3647_v36, %v3647_v36  ;;  %3325 = vmatmul.bf16.gmra.mxu3 %v6493_v60  ;;  %v3651_v58 = vrot.slane %v3650_v39, 2 }
 0x5f1   :  { %v3279_v29 = vmax.f32 %v7714_v50, 0.0 }
 0x5f2   :  { %v4214_v43 = vunpack.c.l.b16 %v3952_v6 }
 0x5f3   :  { %v3655_v47 = vsel %vm2194_vm8, %v3279_v29, -inf }
 0x5f4   :  { %v7710_v17 = vsel %vm4085_vm13, %v4214_v43, %v4242_v40  ;;  %v3656_v19 = vrot.slane %v3655_v47, 4  ;;  %v3652_v40 = vmax.f32 %v3650_v39, %v3651_v58 }
 0x5f6   :  { %v3239_v37 = vpop.f32.mrf.mxu2  ;;  %v3657_v3 = vmax.f32 %v3655_v47, %v3656_v19  ;;  %v3653_v53 = vrot.slane %v3652_v40, 1 }
 0x5f7   :  { %v7717_v21 = vadd.f32 %v3239_v37, %v7312_v7 }
 0x5f8   :  { %v3658_v44 = vrot.slane %v3657_v3, 2 }
 0x5fa   :  { %v3659_v27 = vmax.f32 %v3657_v3, %v3658_v44 }
 0x5fc   :  { %v3660_v43 = vrot.slane %v3659_v27, 1 }
 0x5fe   :  { %v3241_v22 = vpop.f32.mrf.mxu2 }
 0x5ff   :  { %v7723_v24 = vadd.f32 %v3241_v22, %v7312_v7 }
 0x600   :  { %3330 = vmatmul.bf16.gmra.mxu3 %v6503_v59  ;;  %v3280_v59 = vmax.f32 %v7717_v21, 0.0 }
 0x601   :  { %v3281_v54 = vmax.f32 %v7723_v24, 0.0 }
 0x602   :  { %v3662_v30 = vsel %vm2194_vm8, %v3280_v59, -inf }
 0x603   :  { %v3669_v63 = vsel %vm2194_vm8, %v3281_v54, -inf  ;;  %v3663_v62 = vrot.slane %v3662_v30, 4 }
 0x604   :  { %v3670_v25 = vrot.slane %v3669_v63, 4 }
 0x605   :  { %v3664_v34 = vmax.f32 %v3662_v30, %v3663_v62  ;;  %v3661_v62 = vmax.f32 %v3659_v27, %v3660_v43  ;;  %v3298_v43 = vpack.c.bf16 %v3279_v29, %v3278_v23  ;;  %v8042_v29 = vld [vmem:[#allocation33_spill] sm:$0xff] }
 0x606   :  { %v3244_v60 = vpop.f32.mrf.mxu2  ;;  %v3671_v5 = vmax.f32 %v3669_v63, %v3670_v25 }
 0x607   :  { %v7727_v61 = vadd.f32 %v3244_v60, %v7312_v7  ;;  %v3665_v9 = vrot.slane %v3664_v34, 2 }
 0x609   :  { %v3282_v16 = vmax.f32 %v7727_v61, 0.0  ;;  %v3666_v12 = vmax.f32 %v3664_v34, %v3665_v9  ;;  %v3654_v34 = vmax.f32 %v3652_v40, %v3653_v53  ;;  %v8044_v53 = vld [vmem:[#allocation30_spill] sm:$0xff] }
 0x60b   :  { %v3676_v33 = vsel %vm2194_vm8, %v3282_v16, -inf  ;;  %v3667_v47 = vrot.slane %v3666_v12, 1  ;;  %v3953_v9 = vpack.c.bf16 %v3654_v34, %v3654_v34 }
 0x60c   :  { %v3677_v14 = vrot.slane %v3676_v33, 4 }
 0x60d   :  { %v3668_v25 = vmax.f32 %v3666_v12, %v3667_v47  ;;  %v3299_v12 = vpack.c.bf16 %v3281_v54, %v3280_v59  ;;  %v4215_v40 = vunpack.c.l.b16 %v3953_v9 }
 0x60e   :  { %v3246_v56 = vpop.f32.mrf.mxu2  ;;  %v3678_v46 = vmax.f32 %v3676_v33, %v3677_v14 }
 0x60f   :  { %v3247_v38 = vadd.f32 %v3246_v56, %v7312_v7  ;;  %v3955_v44 = vpack.c.bf16 %v3668_v25, %v3668_v25 }
 0x610   :  { %3335 = vmatmul.bf16.gmra.mxu3 %v6514_v0  ;;  %v3672_v0 = vrot.slane %v3671_v5, 2  ;;  %v3679_v28 = vrot.slane %v3678_v46, 2 }
 0x611   :  { %v3283_v51 = vmax.f32 %v3247_v38, 0.0 }
 0x612   :  { %v3673_v36 = vmax.f32 %v3671_v5, %v3672_v0  ;;  %v3680_v6 = vmax.f32 %v3678_v46, %v3679_v28 }
 0x613   :  { %v3683_v2 = vsel %vm2194_vm8, %v3283_v51, -inf }
 0x614   :  { %v3684_v55 = vrot.slane %v3683_v2, 4  ;;  %v3674_v63 = vrot.slane %v3673_v36, 1  ;;  %v3681_v33 = vrot.slane %v3680_v6, 1 }
 0x616   :  { %v3685_v1 = vmax.f32 %v3683_v2, %v3684_v55  ;;  %v3249_v48 = vpop.f32.mrf.mxu2  ;;  %v3675_v2 = vmax.f32 %v3673_v36, %v3674_v63  ;;  %v3682_v55 = vmax.f32 %v3680_v6, %v3681_v33  ;;  %v8045_v33 = vld [vmem:[#allocation35_spill] sm:$0xff] }
 0x617   :  { %v3250_v8 = vadd.f32 %v3249_v48, %v7312_v7 }
 0x618   :  { %v3686_v57 = vrot.slane %v3685_v1, 2  ;;  %v3957_v0 = vpack.c.bf16 %v3682_v55, %v3682_v55 }
 0x619   :  { %v3284_v42 = vmax.f32 %v3250_v8, 0.0  ;;  %v3956_v8 = vpack.c.bf16 %v3675_v2, %v3675_v2 }
 0x61a   :  { %v3687_v37 = vmax.f32 %v3685_v1, %v3686_v57  ;;  %v3300_v1 = vpack.c.bf16 %v3283_v51, %v3282_v16  ;;  %v4217_v57 = vunpack.c.l.b16 %v3955_v44  ;;  %v4219_v16 = vunpack.c.l.b16 %v3957_v0 }
 0x61b   :  { %v3690_v35 = vsel %vm2194_vm8, %v3284_v42, -inf  ;;  %v4218_v36 = vunpack.c.l.b16 %v3956_v8 }
 0x61c   :  { %v3691_v52 = vrot.slane %v3690_v35, 4  ;;  %v3688_v38 = vrot.slane %v3687_v37, 1 }
 0x61e   :  { %v3692_v22 = vmax.f32 %v3690_v35, %v3691_v52  ;;  %v3251_v60 = vpop.f32.mrf.mxu2 }
 0x61f   :  { %v3252_v30 = vadd.f32 %v3251_v60, %v7312_v7  ;;  %v3954_v7 = vpack.c.bf16 %v3661_v62, %v3661_v62 }
 0x620   :  { %3340 = vmatmul.bf16.gmra.mxu3 %v6523_v26  ;;  %v3693_v19 = vrot.slane %v3692_v22, 2  ;;  %v3689_v26 = vmax.f32 %v3687_v37, %v3688_v38 }
 0x621   :  { %v3285_v56 = vmax.f32 %v3252_v30, 0.0  ;;  %v4216_v28 = vunpack.c.l.b16 %v3954_v7 }
 0x622   :  { %v3694_v41 = vmax.f32 %v3692_v22, %v3693_v19 }
 0x623   :  { %v3301_v14 = vpack.c.bf16 %v3285_v56, %v3284_v42  ;;  %v3697_v3 = vsel %vm2194_vm8, %v3285_v56, -inf  ;;  %v3958_v42 = vpack.c.bf16 %v3689_v26, %v3689_v26  ;;  %v4244_v51 = vsel %vm4073_vm15, %v4216_v28, %v4215_v40 }
 0x624   :  { %v3695_v39 = vrot.slane %v3694_v41, 1  ;;  %v3698_v5 = vrot.slane %v3697_v3, 4  ;;  %v4245_v21 = vsel %vm4075_vm2, %v4217_v57, %v4244_v51 }
 0x625   :  { %3391 = vmatpush.bf16.msra.mxu0 %v3301_v14  ;;  %v4220_v52 = vunpack.c.l.b16 %v3958_v42  ;;  %v4246_v24 = vsel %vm4077_vm9, %v4218_v36, %v4245_v21 }
 0x626   :  { %v3699_v46 = vmax.f32 %v3697_v3, %v3698_v5  ;;  %v3696_v48 = vmax.f32 %v3694_v41, %v3695_v39  ;;  %v4247_v54 = vsel %vm4079_vm10, %v4219_v16, %v4246_v24 }
 0x627   :  { %v4248_v60 = vsel %vm4081_vm3, %v4220_v52, %v4247_v54 }
 0x628   :  { %v3700_v58 = vrot.slane %v3699_v46, 2  ;;  %v3959_v35 = vpack.c.bf16 %v3696_v48, %v3696_v48 }
 0x629   :  { %3392 = vmatpush.bf16.msra.mxu0 %v3300_v1  ;;  %v8046_v1 = vld [vmem:[#allocation32_spill] sm:$0xff] }
 0x62a   :  { %v3701_v27 = vmax.f32 %v3699_v46, %v3700_v58  ;;  %v4221_v37 = vunpack.c.l.b16 %v3959_v35  ;;  %v8047_v58 = vld [vmem:[#allocation37_spill] sm:$0xff] }
 0x62c   :  { %v3702_v61 = vrot.slane %v3701_v27, 1  ;;  %v4249_v47 = vsel %vm4083_vm0, %v4221_v37, %v4248_v60 }
 0x62d   :  { %3393 = vmatpush.bf16.msra.mxu0 %v3299_v12 }
 0x62e   :  { %v3703_v6 = vmax.f32 %v3701_v27, %v3702_v61 }
 0x630   :  { %3345 = vmatmul.bf16.gmra.mxu3 %v6533_v15  ;;  %v3960_v59 = vpack.c.bf16 %v3703_v6, %v3703_v6  ;;  %v8036_v15 = vld [vmem:[#allocation24_spill] sm:$0xff] }
 0x631   :  { %3394 = vmatpush.bf16.msra.mxu0 %v3298_v43 }
 0x632   :  { %v4222_v22 = vunpack.c.l.b16 %v3960_v59 }
 0x634   :  { %v4250_v4 = vsel %vm4085_vm13, %v4222_v22, %v4249_v47 }
 0x635   :  { %3395 = vmatpush.bf16.msra.mxu0 %v7703_v45  ;;  %v4252_v50 = vpack.c.b16 %v4250_v4, %v7710_v17  ;;  %v8037_v45 = vld [vmem:[#allocation31_spill] sm:$0xff]  ;;  %v8038_v17 = vld [vmem:[#allocation25_spill] sm:$0xff] }
 0x637   :  { %4734 = vmatmul.msk.bf16.gmra.mxu2 %vm2194_vm8, %v4252_v50  ;;  %v8048_v50 = vld [vmem:[#allocation34_spill] sm:$0xff] }
 0x639   :  { %3396 = vmatpush.bf16.msra.mxu0 %v7695_v18  ;;  %v8039_v18 = vld [vmem:[#allocation26_spill] sm:$0xff] }
 0x63d   :  { %3397 = vmatpush.bf16.msra.mxu0 %v7684_v49  ;;  %v8040_v49 = vld [vmem:[#allocation27_spill] sm:$0xff] }
 0x640   :  { %3350 = vmatmul.bf16.gmra.mxu3 %v6543_v13  ;;  %v8041_v13 = vld [vmem:[#allocation28_spill] sm:$0xff] }
 0x641   :  { %3398 = vmatpush.bf16.msra.mxu0 %v7671_v32 }
 0x643   :  { %v3311_v32 = vpop.f32.mrf.mxu3 }
 0x644   :  { %3399 = vmatmul.bf16.vlgmr.msra.gmra.mxu0 %v6487_v31 }
 0x64b   :  { %v3313_v31 = vpop.f32.mrf.mxu3 }
 0x650   :  { %3355 = vmatmul.bf16.gmra.mxu3 %v6553_v11  ;;  %v8043_v11 = vld [vmem:[#allocation29_spill] sm:$0xff] }
 0x654   :  { %3404 = vmatmul.bf16.gmra.mxu0 %v6496_v20  ;;  %v3316_v20 = vpop.f32.mrf.mxu3 }
 0x65c   :  { %v3318_v19 = vpop.f32.mrf.mxu3 }
 0x660   :  { %3360 = vmatmul.bf16.gmra.mxu3 %v6559_v10 }
 0x664   :  { %3409 = vmatmul.bf16.gmra.mxu0 %v8036_v15  ;;  %v3321_v34 = vpop.f32.mrf.mxu3 }
 0x66c   :  { %v3323_v8 = vpop.f32.mrf.mxu3 }
 0x670   :  { %3365 = vmatmul.bf16.gmra.mxu3 %v8037_v45 }
 0x674   :  { %3414 = vmatmul.bf16.gmra.mxu0 %v8038_v17  ;;  %v3326_v43 = vpop.f32.mrf.mxu3 }
 0x680   :  { %3370 = vmatmul.bf16.gmra.mxu3 %v8042_v29 }
 0x684   :  { %3419 = vmatmul.bf16.gmra.mxu0 %v8039_v18  ;;  %v3328_v18 = vpop.f32.mrf.mxu3 }
 0x690   :  { %3375 = vmatmul.bf16.gmra.mxu3 %v8045_v33  ;;  %v3331_v33 = vpop.f32.mrf.mxu3 }
 0x694   :  { %3424 = vmatmul.bf16.gmra.mxu0 %v8040_v49  ;;  %v8049_v49 = vld [vmem:[#allocation39_spill] sm:$0xff] }
 0x6a0   :  { %3380 = vmatmul.bf16.gmra.mxu3 %v8047_v58 }
 0x6a4   :  { %3429 = vmatmul.bf16.gmra.mxu0 %v8041_v13 }
 0x6b0   :  { %3385 = vmatmul.bf16.gmra.mxu3 %v8049_v49 }
 0x6b4   :  { %3434 = vmatmul.bf16.gmra.mxu0 %v8043_v11 }
 0x6c1   :  { %v3400_v10 = vpop.f32.mrf.mxu0 }
 0x6c2   :  { %v3401_v23 = vadd.f32 %v3400_v10, %v3311_v32 }
 0x6c4   :  { %v3704_v30 = vsel %vm2194_vm8, %v3401_v23, -inf  ;;  %3439 = vmatmul.bf16.gmra.mxu0 %v8044_v53 }
 0x6c5   :  { %v3705_v63 = vrot.slane %v3704_v30, 4 }
 0x6c7   :  { %v3706_v56 = vmax.f32 %v3704_v30, %v3705_v63 }
 0x6c9   :  { %v3707_v62 = vrot.slane %v3706_v56, 2  ;;  %v3402_v38 = vpop.f32.mrf.mxu0 }
 0x6ca   :  { %v3403_v41 = vadd.f32 %v3402_v38, %v3313_v31 }
 0x6cb   :  { %v3708_v25 = vmax.f32 %v3706_v56, %v3707_v62 }
 0x6cc   :  { %v3711_v14 = vsel %vm2194_vm8, %v3403_v41, -inf }
 0x6cd   :  { %v3712_v3 = vrot.slane %v3711_v14, 4  ;;  %v3709_v2 = vrot.slane %v3708_v25, 1 }
 0x6cf   :  { %v3713_v39 = vmax.f32 %v3711_v14, %v3712_v3  ;;  %v3710_v26 = vmax.f32 %v3708_v25, %v3709_v2 }
 0x6d1   :  { %v3714_v5 = vrot.slane %v3713_v39, 2  ;;  %v3405_v55 = vpop.f32.mrf.mxu0  ;;  %v3969_v0 = vpack.c.bf16 %v3710_v26, %v3710_v26  ;;  %v3333_v26 = vpop.f32.mrf.mxu3 }
 0x6d2   :  { %v3406_v7 = vadd.f32 %v3405_v55, %v3316_v20 }
 0x6d3   :  { %v3715_v46 = vmax.f32 %v3713_v39, %v3714_v5  ;;  %v4041_v40 = vunpack.c.l.b16 %v3969_v0  ;;  %v8050_v39 = vld [vmem:[#allocation36_spill] sm:$0xff] }
 0x6d4   :  { %v3718_v44 = vsel %vm2194_vm8, %v3406_v7, -inf  ;;  %3444 = vmatmul.bf16.gmra.mxu0 %v8046_v1 }
 0x6d5   :  { %v3716_v48 = vrot.slane %v3715_v46, 1  ;;  %v3719_v9 = vrot.slane %v3718_v44, 4 }
 0x6d7   :  { %v3717_v28 = vmax.f32 %v3715_v46, %v3716_v48  ;;  %v3720_v42 = vmax.f32 %v3718_v44, %v3719_v9 }
 0x6d9   :  { %v3970_v27 = vpack.c.bf16 %v3717_v28, %v3717_v28  ;;  %v3721_v57 = vrot.slane %v3720_v42, 2  ;;  %v3407_v12 = vpop.f32.mrf.mxu0 }
 0x6da   :  { %v3408_v35 = vadd.f32 %v3407_v12, %v3318_v19  ;;  %v3336_v12 = vpop.f32.mrf.mxu3 }
 0x6db   :  { %v4042_v36 = vunpack.c.l.b16 %v3970_v27  ;;  %v3722_v61 = vmax.f32 %v3720_v42, %v3721_v57 }
 0x6dc   :  { %v3725_v16 = vsel %vm2194_vm8, %v3408_v35, -inf }
 0x6dd   :  { %v4074_v51 = vsel %vm4073_vm15, %v4042_v36, %v4041_v40  ;;  %v3723_v52 = vrot.slane %v3722_v61, 1  ;;  %v3726_v6 = vrot.slane %v3725_v16, 4 }
 0x6df   :  { %v3724_v21 = vmax.f32 %v3722_v61, %v3723_v52  ;;  %v3727_v37 = vmax.f32 %v3725_v16, %v3726_v6  ;;  %v8051_v6 = vld [vmem:[#allocation38_spill] sm:$0xff] }
 0x6e1   :  { %v3971_v24 = vpack.c.bf16 %v3724_v21, %v3724_v21  ;;  %v3728_v59 = vrot.slane %v3727_v37, 2  ;;  %v3410_v54 = vpop.f32.mrf.mxu0 }
 0x6e2   :  { %v3411_v22 = vadd.f32 %v3410_v54, %v3321_v34 }
 0x6e3   :  { %v4043_v60 = vunpack.c.l.b16 %v3971_v24  ;;  %v3729_v47 = vmax.f32 %v3727_v37, %v3728_v59  ;;  %v3338_v37 = vpop.f32.mrf.mxu3 }
 0x6e4   :  { %v3732_v4 = vsel %vm2194_vm8, %v3411_v22, -inf  ;;  %3449 = vmatmul.bf16.gmra.mxu0 %v8048_v50  ;;  %v8052_v50 = vld [vmem:[#allocation40_spill] sm:$0xff] }
 0x6e5   :  { %v4076_v15 = vsel %vm4075_vm2, %v4043_v60, %v4074_v51  ;;  %v3730_v45 = vrot.slane %v3729_v47, 1  ;;  %v3733_v17 = vrot.slane %v3732_v4, 4 }
 0x6e7   :  { %v3731_v13 = vmax.f32 %v3729_v47, %v3730_v45  ;;  %v3734_v32 = vmax.f32 %v3732_v4, %v3733_v17 }
 0x6e9   :  { %v3972_v31 = vpack.c.bf16 %v3731_v13, %v3731_v13  ;;  %v3735_v29 = vrot.slane %v3734_v32, 2  ;;  %v3412_v11 = vpop.f32.mrf.mxu0 }
 0x6ea   :  { %v3413_v20 = vadd.f32 %v3412_v11, %v3323_v8 }
 0x6eb   :  { %v4044_v10 = vunpack.c.l.b16 %v3972_v31  ;;  %v3736_v23 = vmax.f32 %v3734_v32, %v3735_v29  ;;  %v3341_v47 = vpop.f32.mrf.mxu3 }
 0x6ec   :  { %v3739_v30 = vsel %vm2194_vm8, %v3413_v20, -inf  ;;  %v8053_v20 = vld [vmem:[#allocation41_spill] sm:$0xff] }
 0x6ed   :  { %v4078_v53 = vsel %vm4077_vm9, %v4044_v10, %v4076_v15  ;;  %v3737_v63 = vrot.slane %v3736_v23, 1  ;;  %v3740_v19 = vrot.slane %v3739_v30, 4 }
 0x6ef   :  { %v3738_v56 = vmax.f32 %v3736_v23, %v3737_v63  ;;  %v3741_v62 = vmax.f32 %v3739_v30, %v3740_v19 }
 0x6f1   :  { %v3973_v38 = vpack.c.bf16 %v3738_v56, %v3738_v56  ;;  %v3742_v41 = vrot.slane %v3741_v62, 2  ;;  %v3415_v25 = vpop.f32.mrf.mxu0 }
 0x6f2   :  { %v3416_v14 = vadd.f32 %v3415_v25, %v3326_v43 }
 0x6f3   :  { %v4045_v3 = vunpack.c.l.b16 %v3973_v38  ;;  %v3743_v34 = vmax.f32 %v3741_v62, %v3742_v41  ;;  %v3343_v15 = vpop.f32.mrf.mxu3 }
 0x6f4   :  { %v3746_v2 = vsel %vm2194_vm8, %v3416_v14, -inf  ;;  %3454 = vmatmul.bf16.gmra.mxu0 %v8050_v39 }
 0x6f5   :  { %v4080_v5 = vsel %vm4079_vm10, %v4045_v3, %v4078_v53  ;;  %v3744_v55 = vrot.slane %v3743_v34, 1  ;;  %v3747_v7 = vrot.slane %v3746_v2, 4 }
 0x6f7   :  { %v3745_v46 = vmax.f32 %v3743_v34, %v3744_v55  ;;  %v3748_v44 = vmax.f32 %v3746_v2, %v3747_v7 }
 0x6f9   :  { %v3974_v1 = vpack.c.bf16 %v3745_v46, %v3745_v46  ;;  %v3749_v48 = vrot.slane %v3748_v44, 2  ;;  %v3417_v9 = vpop.f32.mrf.mxu0 }
 0x6fa   :  { %v3418_v8 = vadd.f32 %v3417_v9, %v3328_v18 }
 0x6fb   :  { %v4046_v58 = vunpack.c.l.b16 %v3974_v1  ;;  %v3750_v0 = vmax.f32 %v3748_v44, %v3749_v48  ;;  %v3346_v17 = vpop.f32.mrf.mxu3 }
 0x6fc   :  { %v3753_v28 = vsel %vm2194_vm8, %v3418_v8, -inf }
 0x6fd   :  { %v4082_v42 = vsel %vm4081_vm3, %v4046_v58, %v4080_v5  ;;  %v3751_v27 = vrot.slane %v3750_v0, 1  ;;  %v3754_v57 = vrot.slane %v3753_v28, 4 }
 0x6ff   :  { %v3752_v35 = vmax.f32 %v3750_v0, %v3751_v27  ;;  %v3755_v40 = vmax.f32 %v3753_v28, %v3754_v57 }
 0x701   :  { %v3975_v36 = vpack.c.bf16 %v3752_v35, %v3752_v35  ;;  %v3756_v61 = vrot.slane %v3755_v40, 2  ;;  %v3420_v16 = vpop.f32.mrf.mxu0 }
 0x702   :  { %v3421_v32 = vadd.f32 %v3420_v16, %v3331_v33 }
 0x703   :  { %v4047_v51 = vunpack.c.l.b16 %v3975_v36  ;;  %v3757_v52 = vmax.f32 %v3755_v40, %v3756_v61  ;;  %v3348_v23 = vpop.f32.mrf.mxu3  ;;  %v4785_v61 = vld [vmem:[#allocation14 + $0x30] sm:$0xff] }
 0x704   :  { %3459 = vmatmul.bf16.gmra.mxu0 %v8051_v6  ;;  %v3760_v30 = vsel %vm2194_vm8, %v3421_v32, -inf }
 0x705   :  { %v4084_v43 = vsel %vm4083_vm0, %v4047_v51, %v4082_v42  ;;  %v3758_v21 = vrot.slane %v3757_v52, 1  ;;  %v3761_v62 = vrot.slane %v3760_v30, 4  ;;  %v4786_v42 = vld [vmem:[#allocation14 + $0x38] sm:$0xff] }
 0x706   :  { %4144 = vmatpush.bf16.msrb.mxu1 %v4786_v42 }
 0x707   :  { %v3759_v24 = vmax.f32 %v3757_v52, %v3758_v21  ;;  %v3762_v2 = vmax.f32 %v3760_v30, %v3761_v62 }
 0x709   :  { %v3976_v59 = vpack.c.bf16 %v3759_v24, %v3759_v24  ;;  %v3422_v54 = vpop.f32.mrf.mxu0  ;;  %v3763_v1 = vrot.slane %v3762_v2, 2 }
 0x70a   :  { %v3423_v18 = vadd.f32 %v3422_v54, %v3333_v26  ;;  %4145 = vmatpush.bf16.msrb.mxu1 %v4785_v61 }
 0x70b   :  { %v4048_v22 = vunpack.c.l.b16 %v3976_v59  ;;  %v3351_v7 = vpop.f32.mrf.mxu3  ;;  %v3764_v35 = vmax.f32 %v3762_v2, %v3763_v1 }
 0x70c   :  { %v3767_v11 = vsel %vm2194_vm8, %v3423_v18, -inf }
 0x70d   :  { %v7816_v60 = vsel %vm4085_vm13, %v4048_v22, %v4084_v43  ;;  %v3768_v63 = vrot.slane %v3767_v11, 4 }
 0x70f   :  { %v3769_v14 = vmax.f32 %v3767_v11, %v3768_v63 }
 0x711   :  { %v3425_v4 = vpop.f32.mrf.mxu0  ;;  %v3770_v26 = vrot.slane %v3769_v14, 2 }
 0x712   :  { %v3426_v49 = vadd.f32 %v3425_v4, %v3336_v12  ;;  %v8054_v12 = vld [vmem:[#allocation42_spill] sm:$0xff] }
 0x713   :  { %v3771_v0 = vmax.f32 %v3769_v14, %v3770_v26  ;;  %v3353_v51 = vpop.f32.mrf.mxu3 }
 0x714   :  { %3464 = vmatmul.bf16.gmra.mxu0 %v8052_v50  ;;  %v3774_v10 = vsel %vm2194_vm8, %v3426_v49, -inf }
 0x715   :  { %v3775_v56 = vrot.slane %v3774_v10, 4  ;;  %v3772_v52 = vrot.slane %v3771_v0, 1 }
 0x717   :  { %v3776_v3 = vmax.f32 %v3774_v10, %v3775_v56  ;;  %v3773_v4 = vmax.f32 %v3771_v0, %v3772_v52 }
 0x719   :  { %v3427_v45 = vpop.f32.mrf.mxu0  ;;  %v3777_v44 = vrot.slane %v3776_v3, 2 }
 0x71a   :  { %v3428_v31 = vadd.f32 %v3427_v45, %v3338_v37  ;;  %v3765_v37 = vrot.slane %v3764_v35, 1 }
 0x71b   :  { %v3778_v27 = vmax.f32 %v3776_v3, %v3777_v44  ;;  %v3356_v11 = vpop.f32.mrf.mxu3 }
 0x71c   :  { %v3781_v53 = vsel %vm2194_vm8, %v3428_v31, -inf  ;;  %v3766_v18 = vmax.f32 %v3764_v35, %v3765_v37  ;;  %v4784_v31 = vld [vmem:[#allocation14 + $0x28] sm:$0xff] }
 0x71d   :  { %v3782_v38 = vrot.slane %v3781_v53, 4  ;;  %v3779_v21 = vrot.slane %v3778_v27, 1  ;;  %4146 = vmatpush.bf16.msrb.mxu1 %v4784_v31 }
 0x71f   :  { %v3783_v39 = vmax.f32 %v3781_v53, %v3782_v38  ;;  %v3780_v45 = vmax.f32 %v3778_v27, %v3779_v21  ;;  %v4783_v53 = vld [vmem:[#allocation14 + $0x20] sm:$0xff] }
 0x721   :  { %v3430_v13 = vpop.f32.mrf.mxu0  ;;  %v3784_v48 = vrot.slane %v3783_v39, 2  ;;  %v3979_v63 = vpack.c.bf16 %v3780_v45, %v3780_v45  ;;  %4147 = vmatpush.bf16.msrb.mxu1 %v4783_v53 }
 0x722   :  { %v3431_v29 = vadd.f32 %v3430_v13, %v3341_v47 }
 0x723   :  { %v3785_v40 = vmax.f32 %v3783_v39, %v3784_v48  ;;  %v3358_v1 = vpop.f32.mrf.mxu3 }
 0x724   :  { %3469 = vmatmul.bf16.gmra.mxu0 %v8053_v20  ;;  %v3788_v19 = vsel %vm2194_vm8, %v3431_v29, -inf  ;;  %v3978_v20 = vpack.c.bf16 %v3773_v4, %v3773_v4 }
 0x725   :  { %v3789_v41 = vrot.slane %v3788_v19, 4  ;;  %v3786_v24 = vrot.slane %v3785_v40, 1 }
 0x727   :  { %v3790_v55 = vmax.f32 %v3788_v19, %v3789_v41  ;;  %v3787_v49 = vmax.f32 %v3785_v40, %v3786_v24  ;;  %v3977_v19 = vpack.c.bf16 %v3766_v18, %v3766_v18 }
 0x729   :  { %v3432_v33 = vpop.f32.mrf.mxu0  ;;  %v3791_v8 = vrot.slane %v3790_v55, 2  ;;  %v3980_v56 = vpack.c.bf16 %v3787_v49, %v3787_v49 }
 0x72a   :  { %v3433_v25 = vadd.f32 %v3432_v33, %v3343_v15 }
 0x72b   :  { %v3792_v16 = vmax.f32 %v3790_v55, %v3791_v8  ;;  %v4052_v55 = vunpack.c.l.b16 %v3980_v56  ;;  %v3361_v37 = vpop.f32.mrf.mxu3 }
 0x72c   :  { %v3795_v34 = vsel %vm2194_vm8, %v3433_v25, -inf  ;;  %v4050_v25 = vunpack.c.l.b16 %v3978_v20 }
 0x72d   :  { %v3796_v5 = vrot.slane %v3795_v34, 4  ;;  %v3793_v22 = vrot.slane %v3792_v16, 1 }
 0x72f   :  { %v3797_v46 = vmax.f32 %v3795_v34, %v3796_v5  ;;  %v3794_v29 = vmax.f32 %v3792_v16, %v3793_v22  ;;  %v4051_v34 = vunpack.c.l.b16 %v3979_v63  ;;  %v4049_v5 = vunpack.c.l.b16 %v3977_v19 }
 0x731   :  { %v3435_v9 = vpop.f32.mrf.mxu0  ;;  %v3798_v28 = vrot.slane %v3797_v46, 2  ;;  %v3981_v33 = vpack.c.bf16 %v3794_v29, %v3794_v29  ;;  %v4087_v48 = vsel %vm4073_vm15, %v4050_v25, %v4049_v5 }
 0x732   :  { %v3436_v58 = vadd.f32 %v3435_v9, %v3346_v17 }
 0x733   :  { %v3799_v6 = vmax.f32 %v3797_v46, %v3798_v28  ;;  %v4053_v44 = vunpack.c.l.b16 %v3981_v33 }
 0x734   :  { %v3802_v57 = vsel %vm2194_vm8, %v3436_v58, -inf  ;;  %3474 = vmatmul.bf16.gmra.mxu0 %v8054_v12 }
 0x735   :  { %v3803_v36 = vrot.slane %v3802_v57, 4  ;;  %v3800_v50 = vrot.slane %v3799_v6, 1 }
 0x737   :  { %v3804_v43 = vmax.f32 %v3802_v57, %v3803_v36  ;;  %v3801_v10 = vmax.f32 %v3799_v6, %v3800_v50 }
 0x739   :  { %v3805_v59 = vrot.slane %v3804_v43, 2  ;;  %v3437_v54 = vpop.f32.mrf.mxu0  ;;  %v3982_v14 = vpack.c.bf16 %v3801_v10, %v3801_v10 }
 0x73a   :  { %v3438_v47 = vadd.f32 %v3437_v54, %v3348_v23 }
 0x73b   :  { %v3806_v15 = vmax.f32 %v3804_v43, %v3805_v59  ;;  %v4054_v9 = vunpack.c.l.b16 %v3982_v14 }
 0x73c   :  { %v3809_v17 = vsel %vm2194_vm8, %v3438_v47, -inf }
 0x73d   :  { %v3807_v13 = vrot.slane %v3806_v15, 1  ;;  %v3810_v32 = vrot.slane %v3809_v17, 4 }
 0x73f   :  { %v3811_v30 = vmax.f32 %v3809_v17, %v3810_v32  ;;  %v3808_v23 = vmax.f32 %v3806_v15, %v3807_v13  ;;  %v3363_v17 = vpop.f32.mrf.mxu3 }
 0x741   :  { %v3812_v62 = vrot.slane %v3811_v30, 2  ;;  %v3440_v38 = vpop.f32.mrf.mxu0  ;;  %v3983_v2 = vpack.c.bf16 %v3808_v23, %v3808_v23 }
 0x742   :  { %v3441_v41 = vadd.f32 %v3440_v38, %v3351_v7  ;;  %v4088_v7 = vsel %vm4075_vm2, %v4051_v34, %v4087_v48 }
 0x743   :  { %v3813_v3 = vmax.f32 %v3811_v30, %v3812_v62  ;;  %v4055_v0 = vunpack.c.l.b16 %v3983_v2  ;;  %v4089_v28 = vsel %vm4077_vm9, %v4052_v55, %v4088_v7 }
 0x744   :  { %v3816_v39 = vsel %vm2194_vm8, %v3441_v41, -inf  ;;  %v4090_v12 = vsel %vm4079_vm10, %v4053_v44, %v4089_v28 }
 0x745   :  { %v3814_v26 = vrot.slane %v3813_v3, 1  ;;  %v3817_v46 = vrot.slane %v3816_v39, 4  ;;  %v4091_v40 = vsel %vm4081_vm3, %v4054_v9, %v4090_v12 }
 0x746   :  { %v4092_v16 = vsel %vm4083_vm0, %v4055_v0, %v4091_v40 }
 0x747   :  { %v3815_v8 = vmax.f32 %v3813_v3, %v3814_v26  ;;  %v3818_v58 = vmax.f32 %v3816_v39, %v3817_v46  ;;  %v3366_v62 = vpop.f32.mrf.mxu3 }
 0x749   :  { %v3984_v42 = vpack.c.bf16 %v3815_v8, %v3815_v8  ;;  %v3819_v27 = vrot.slane %v3818_v58, 2  ;;  %v3442_v57 = vpop.f32.mrf.mxu0 }
 0x74a   :  { %v3443_v35 = vadd.f32 %v3442_v57, %v3353_v51 }
 0x74b   :  { %v4056_v36 = vunpack.c.l.b16 %v3984_v42  ;;  %v3820_v61 = vmax.f32 %v3818_v58, %v3819_v27 }
 0x74c   :  { %v3823_v52 = vsel %vm2194_vm8, %v3443_v35, -inf }
 0x74d   :  { %v4093_v6 = vsel %vm4085_vm13, %v4056_v36, %v4092_v16  ;;  %v3824_v43 = vrot.slane %v3823_v52, 4  ;;  %v3821_v24 = vrot.slane %v3820_v61, 1 }
 0x74e   :  { %v4108_v21 = vpack.c.b16 %v4093_v6, %v7816_v60 }
 0x74f   :  { %v3825_v59 = vmax.f32 %v3823_v52, %v3824_v43  ;;  %v3822_v47 = vmax.f32 %v3820_v61, %v3821_v24  ;;  %v3368_v48 = vpop.f32.mrf.mxu3 }
 0x750   :  { %4715 = vmatmul.msk.bf16.vlgmr.msrb.gmra.mxu1 %vm2194_vm8, %v4108_v21 }
 0x751   :  { %v3826_v54 = vrot.slane %v3825_v59, 2  ;;  %v3445_v51 = vpop.f32.mrf.mxu0  ;;  %v3985_v18 = vpack.c.bf16 %v3822_v47, %v3822_v47 }
 0x752   :  { %v3446_v22 = vadd.f32 %v3445_v51, %v3356_v11 }
 0x753   :  { %v3827_v4 = vmax.f32 %v3825_v59, %v3826_v54  ;;  %v4057_v20 = vunpack.c.l.b16 %v3985_v18 }
 0x754   :  { %v3830_v50 = vsel %vm2194_vm8, %v3446_v22, -inf }
 0x755   :  { %v3828_v15 = vrot.slane %v3827_v4, 1  ;;  %v3831_v45 = vrot.slane %v3830_v50, 4 }
 0x757   :  { %v3829_v49 = vmax.f32 %v3827_v4, %v3828_v15  ;;  %v3832_v13 = vmax.f32 %v3830_v50, %v3831_v45  ;;  %v3371_v52 = vpop.f32.mrf.mxu3 }
 0x759   :  { %v3986_v32 = vpack.c.bf16 %v3829_v49, %v3829_v49  ;;  %v3833_v60 = vrot.slane %v3832_v13, 2  ;;  %v3447_v31 = vpop.f32.mrf.mxu0 }
 0x75a   :  { %v3448_v29 = vadd.f32 %v3447_v31, %v3358_v1 }
 0x75b   :  { %v4058_v10 = vunpack.c.l.b16 %v3986_v32  ;;  %v3834_v30 = vmax.f32 %v3832_v13, %v3833_v60 }
 0x75c   :  { %v3837_v53 = vsel %vm2194_vm8, %v3448_v29, -inf }
 0x75d   :  { %v4094_v11 = vsel %vm4073_vm15, %v4058_v10, %v4057_v20  ;;  %v3835_v63 = vrot.slane %v3834_v30, 1  ;;  %v3838_v23 = vrot.slane %v3837_v53, 4 }
 0x75f   :  { %v3836_v19 = vmax.f32 %v3834_v30, %v3835_v63  ;;  %v3839_v56 = vmax.f32 %v3837_v53, %v3838_v23  ;;  %v3373_v18 = vpop.f32.mrf.mxu3 }
 0x761   :  { %v3987_v38 = vpack.c.bf16 %v3836_v19, %v3836_v19  ;;  %v3840_v33 = vrot.slane %v3839_v56, 2  ;;  %v3450_v41 = vpop.f32.mrf.mxu0 }
 0x762   :  { %v3451_v25 = vadd.f32 %v3450_v41, %v3361_v37 }
 0x763   :  { %v4059_v14 = vunpack.c.l.b16 %v3987_v38  ;;  %v3841_v3 = vmax.f32 %v3839_v56, %v3840_v33 }
 0x764   :  { %v3844_v34 = vsel %vm2194_vm8, %v3451_v25, -inf }
 0x765   :  { %v4095_v2 = vsel %vm4075_vm2, %v4059_v14, %v4094_v11  ;;  %v3842_v39 = vrot.slane %v3841_v3, 1  ;;  %v3845_v5 = vrot.slane %v3844_v34, 4 }
 0x767   :  { %v3843_v55 = vmax.f32 %v3841_v3, %v3842_v39  ;;  %v3846_v26 = vmax.f32 %v3844_v34, %v3845_v5  ;;  %v3376_v63 = vpop.f32.mrf.mxu3 }
 0x769   :  { %v3988_v46 = vpack.c.bf16 %v3843_v55, %v3843_v55  ;;  %v3847_v44 = vrot.slane %v3846_v26, 2  ;;  %v3452_v1 = vpop.f32.mrf.mxu0 }
 0x76a   :  { %v3453_v9 = vadd.f32 %v3452_v1, %v3363_v17 }
 0x76b   :  { %v4060_v8 = vunpack.c.l.b16 %v3988_v46  ;;  %v3848_v58 = vmax.f32 %v3846_v26, %v3847_v44 }
 0x76c   :  { %v3851_v7 = vsel %vm2194_vm8, %v3453_v9, -inf }
 0x76d   :  { %v4096_v0 = vsel %vm4077_vm9, %v4060_v8, %v4095_v2  ;;  %v3849_v28 = vrot.slane %v3848_v58, 1  ;;  %v3852_v42 = vrot.slane %v3851_v7, 4 }
 0x76f   :  { %v3850_v27 = vmax.f32 %v3848_v58, %v3849_v28  ;;  %v3853_v57 = vmax.f32 %v3851_v7, %v3852_v42  ;;  %v3378_v33 = vpop.f32.mrf.mxu3 }
 0x771   :  { %v3989_v12 = vpack.c.bf16 %v3850_v27, %v3850_v27  ;;  %v3854_v35 = vrot.slane %v3853_v57, 2  ;;  %v3455_v40 = vpop.f32.mrf.mxu0 }
 0x772   :  { %v3456_v36 = vadd.f32 %v3455_v40, %v3366_v62 }
 0x773   :  { %v4061_v61 = vunpack.c.l.b16 %v3989_v12  ;;  %v3855_v16 = vmax.f32 %v3853_v57, %v3854_v35 }
 0x774   :  { %v3858_v6 = vsel %vm2194_vm8, %v3456_v36, -inf }
 0x775   :  { %v4097_v43 = vsel %vm4079_vm10, %v4061_v61, %v4096_v0  ;;  %v3856_v21 = vrot.slane %v3855_v16, 1  ;;  %v3859_v37 = vrot.slane %v3858_v6, 4 }
 0x777   :  { %v3857_v24 = vmax.f32 %v3855_v16, %v3856_v21  ;;  %v3860_v59 = vmax.f32 %v3858_v6, %v3859_v37  ;;  %v3381_v25 = vpop.f32.mrf.mxu3 }
 0x779   :  { %v3990_v54 = vpack.c.bf16 %v3857_v24, %v3857_v24  ;;  %v3861_v51 = vrot.slane %v3860_v59, 2  ;;  %v3457_v22 = vpop.f32.mrf.mxu0 }
 0x77a   :  { %v3458_v47 = vadd.f32 %v3457_v22, %v3368_v48 }
 0x77b   :  { %v4062_v4 = vunpack.c.l.b16 %v3990_v54  ;;  %v3862_v50 = vmax.f32 %v3860_v59, %v3861_v51 }
 0x77c   :  { %v3865_v15 = vsel %vm2194_vm8, %v3458_v47, -inf }
 0x77d   :  { %v3863_v45 = vrot.slane %v3862_v50, 1  ;;  %v3866_v17 = vrot.slane %v3865_v15, 4  ;;  %v4098_v49 = vsel %vm4081_vm3, %v4062_v4, %v4097_v43 }
 0x77f   :  { %v3864_v13 = vmax.f32 %v3862_v50, %v3863_v45  ;;  %v3867_v32 = vmax.f32 %v3865_v15, %v3866_v17  ;;  %v3383_v46 = vpop.f32.mrf.mxu3 }
 0x781   :  { %v3991_v60 = vpack.c.bf16 %v3864_v13, %v3864_v13  ;;  %v3868_v31 = vrot.slane %v3867_v32, 2  ;;  %v3460_v29 = vpop.f32.mrf.mxu0 }
 0x782   :  { %v3461_v2 = vadd.f32 %v3460_v29, %v3371_v52 }
 0x783   :  { %v4063_v20 = vunpack.c.l.b16 %v3991_v60  ;;  %v3869_v10 = vmax.f32 %v3867_v32, %v3868_v31 }
 0x784   :  { %v3872_v44 = vsel %vm2194_vm8, %v3461_v2, -inf }
 0x785   :  { %v3870_v30 = vrot.slane %v3869_v10, 1  ;;  %v4099_v53 = vsel %vm4083_vm0, %v4063_v20, %v4098_v49  ;;  %v3873_v58 = vrot.slane %v3872_v44, 4 }
 0x787   :  { %v3871_v11 = vmax.f32 %v3869_v10, %v3870_v30  ;;  %v3874_v35 = vmax.f32 %v3872_v44, %v3873_v58  ;;  %v3386_v6 = vpop.f32.mrf.mxu3 }
 0x789   :  { %v3992_v23 = vpack.c.bf16 %v3871_v11, %v3871_v11  ;;  %v3462_v19 = vpop.f32.mrf.mxu0  ;;  %v3875_v21 = vrot.slane %v3874_v35, 2 }
 0x78a   :  { %v3463_v14 = vadd.f32 %v3462_v19, %v3373_v18 }
 0x78b   :  { %v4064_v56 = vunpack.c.l.b16 %v3992_v23  ;;  %v3876_v50 = vmax.f32 %v3874_v35, %v3875_v21 }
 0x78c   :  { %v3879_v55 = vsel %vm2194_vm8, %v3463_v14, -inf }
 0x78d   :  { %v7853_v62 = vsel %vm4085_vm13, %v4064_v56, %v4099_v53  ;;  %v3880_v48 = vrot.slane %v3879_v55, 4  ;;  %v3877_v60 = vrot.slane %v3876_v50, 1 }
 0x78f   :  { %v3881_v27 = vmax.f32 %v3879_v55, %v3880_v48  ;;  %v3388_v20 = vpop.f32.mrf.mxu3 }
 0x791   :  { %v3465_v38 = vpop.f32.mrf.mxu0  ;;  %v3882_v16 = vrot.slane %v3881_v27, 2 }
 0x792   :  { %v3466_v3 = vadd.f32 %v3465_v38, %v3376_v63  ;;  %v3878_v38 = vmax.f32 %v3876_v50, %v3877_v60 }
 0x793   :  { %v3883_v51 = vmax.f32 %v3881_v27, %v3882_v16  ;;  %v7866_v16 = vld [vmem:[#allocation16] sm:$0x7] }
 0x794   :  { %v3886_v26 = vsel %vm2194_vm8, %v3466_v3, -inf  ;;  %v3993_v55 = vpack.c.bf16 %v3878_v38, %v3878_v38 }
 0x795   :  { %v3887_v8 = vrot.slane %v3886_v26, 4  ;;  %v3884_v18 = vrot.slane %v3883_v51, 1 }
 0x797   :  { %v3888_v57 = vmax.f32 %v3886_v26, %v3887_v8  ;;  %v3885_v11 = vmax.f32 %v3883_v51, %v3884_v18  ;;  %v5219_v18 = vmov 128.0  }
 0x798   :  { %4940 = vrcp.f32 %v5219_v18 }
 0x799   :  { %v3467_v41 = vpop.f32.mrf.mxu0  ;;  %v3889_v43 = vrot.slane %v3888_v57, 2  ;;  %v3994_v3 = vpack.c.bf16 %v3885_v11, %v3885_v11 }
 0x79a   :  { %v3468_v39 = vadd.f32 %v3467_v41, %v3378_v33 }
 0x79b   :  { %v3890_v47 = vmax.f32 %v3888_v57, %v3889_v43 }
 0x79c   :  { %v3893_v1 = vsel %vm2194_vm8, %v3468_v39, -inf }
 0x79d   :  { %v3894_v7 = vrot.slane %v3893_v1, 4  ;;  %v3891_v32 = vrot.slane %v3890_v47, 1 }
 0x79f   :  { %v3895_v40 = vmax.f32 %v3893_v1, %v3894_v7  ;;  %v3892_v19 = vmax.f32 %v3890_v47, %v3891_v32  ;;  %v4066_v1 = vunpack.c.l.b16 %v3994_v3  ;;  %v4065_v7 = vunpack.c.l.b16 %v3993_v55 }
 0x7a1   :  { %v3470_v34 = vpop.f32.mrf.mxu0  ;;  %v3896_v37 = vrot.slane %v3895_v40, 2  ;;  %v3995_v39 = vpack.c.bf16 %v3892_v19, %v3892_v19  ;;  %v4101_v27 = vsel %vm4073_vm15, %v4066_v1, %v4065_v7  ;;  %v7893_v1 = vperm.slane %v7866_v16, 1 }
 0x7a2   :  { %v3471_v5 = vadd.f32 %v3470_v34, %v3381_v25 }
 0x7a3   :  { %v3897_v15 = vmax.f32 %v3895_v40, %v3896_v37  ;;  %v4067_v8 = vunpack.c.l.b16 %v3995_v39  ;;  %v4302_v37 = vperm.slane %v7866_v16, 0 }
 0x7a4   :  { %v3900_v9 = vsel %vm2194_vm8, %v3471_v5, -inf }
 0x7a5   :  { %v3901_v28 = vrot.slane %v3900_v9, 4  ;;  %v3898_v31 = vrot.slane %v3897_v15, 1  ;;  %v4102_v35 = vsel %vm4075_vm2, %v4067_v8, %v4101_v27 }
 0x7a7   :  { %v3902_v61 = vmax.f32 %v3900_v9, %v3901_v28  ;;  %v3899_v33 = vmax.f32 %v3897_v15, %v3898_v31 }
 0x7a9   :  { %v3472_v0 = vpop.f32.mrf.mxu0  ;;  %v3903_v59 = vrot.slane %v3902_v61, 2  ;;  %v3996_v26 = vpack.c.bf16 %v3899_v33, %v3899_v33 }
 0x7aa   :  { %v3473_v42 = vadd.f32 %v3472_v0, %v3383_v46 }
 0x7ab   :  { %v3904_v17 = vmax.f32 %v3902_v61, %v3903_v59  ;;  %v4068_v0 = vunpack.c.l.b16 %v3996_v26 }
 0x7ac   :  { %v3907_v12 = vsel %vm2194_vm8, %v3473_v42, -inf }
 0x7ad   :  { %v3908_v36 = vrot.slane %v3907_v12, 4  ;;  %v3905_v30 = vrot.slane %v3904_v17, 1 }
 0x7af   :  { %v3909_v52 = vmax.f32 %v3907_v12, %v3908_v36  ;;  %v3906_v14 = vmax.f32 %v3904_v17, %v3905_v30  ;;  %v4103_v36 = vsel %vm4077_vm9, %v4068_v0, %v4102_v35 }
 0x7b1   :  { %v3475_v24 = vpop.f32.mrf.mxu0  ;;  %v3910_v22 = vrot.slane %v3909_v52, 2  ;;  %v3997_v44 = vpack.c.bf16 %v3906_v14, %v3906_v14 }
 0x7b2   :  { %v3476_v54 = vadd.f32 %v3475_v24, %v3386_v6  ;;  %v4292_v6 = vpop.f32.mrf.mxu2 }
 0x7b3   :  { %v3911_v49 = vmax.f32 %v3909_v52, %v3910_v22  ;;  %v4069_v42 = vunpack.c.l.b16 %v3997_v44 }
 0x7b4   :  { %v3914_v4 = vsel %vm2194_vm8, %v3476_v54, -inf }
 0x7b5   :  { %v3915_v45 = vrot.slane %v3914_v4, 4  ;;  %v3912_v63 = vrot.slane %v3911_v49, 1  ;;  %v4104_v52 = vsel %vm4079_vm10, %v4069_v42, %v4103_v36 }
 0x7b7   :  { %v3916_v13 = vmax.f32 %v3914_v4, %v3915_v45  ;;  %v3913_v34 = vmax.f32 %v3911_v49, %v3912_v63  ;;  %v4941_v49 = vpop.eup %4940 }
 0x7b8   :  { %vm4320_vm15 = vweird.f32 %v4941_v49 }
 0x7b9   :  { %v3917_v29 = vrot.slane %v3916_v13, 2  ;;  %v3477_v10 = vpop.f32.mrf.mxu0  ;;  %v3998_v48 = vpack.c.bf16 %v3913_v34, %v3913_v34 }
 0x7ba   :  { %v3478_v53 = vadd.f32 %v3477_v10, %v3388_v20  ;;  %v4294_v50 = vpop.f32.mrf.mxu2 }
 0x7bb   :  { %v3918_v23 = vmax.f32 %v3916_v13, %v3917_v29  ;;  %v4070_v57 = vunpack.c.l.b16 %v3998_v48  ;;  %v4316_v13 = vmul.f32 128.0, %v4941_v49 }
 0x7bc   :  { %v3921_v56 = vsel %vm2194_vm8, %v3478_v53, -inf }
 0x7bd   :  { %v3919_v41 = vrot.slane %v3918_v23, 1  ;;  %v3922_v25 = vrot.slane %v3921_v56, 4  ;;  %v4105_v21 = vsel %vm4081_vm3, %v4070_v57, %v4104_v52  ;;  %v4317_v32 = vsub.f32 1.0, %v4316_v13 }
 0x7bf   :  { %v3923_v2 = vmax.f32 %v3921_v56, %v3922_v25  ;;  %v3920_v5 = vmax.f32 %v3918_v23, %v3919_v41  ;;  %v4318_v60 = vmul.f32 %v4941_v49, %v4317_v32 }
 0x7c1   :  { %v3924_v46 = vrot.slane %v3923_v2, 2  ;;  %v3999_v58 = vpack.c.bf16 %v3920_v5, %v3920_v5 }
 0x7c2   :  { %v4297_v63 = vpop.f32.mrf.mxu2 }
 0x7c3   :  { %v3925_v9 = vmax.f32 %v3923_v2, %v3924_v46  ;;  %v4071_v40 = vunpack.c.l.b16 %v3999_v58  ;;  %v7898_v58 = vperm.slane %v7866_v16, 2 }
 0x7c5   :  { %v3926_v28 = vrot.slane %v3925_v9, 1  ;;  %v4106_v24 = vsel %vm4083_vm0, %v4071_v40, %v4105_v21 }
 0x7c7   :  { %v3927_v12 = vmax.f32 %v3925_v9, %v3926_v28 }
 0x7c9   :  { %v4000_v61 = vpack.c.bf16 %v3927_v12, %v3927_v12 }
 0x7ca   :  { %v4299_v41 = vpop.f32.mrf.mxu2 }
 0x7cb   :  { %v4072_v43 = vunpack.c.l.b16 %v4000_v61 }
 0x7cd   :  { %v4149_v59 = vpop.f32.mrf.mxu1  ;;  %v4107_v54 = vsel %vm4085_vm13, %v4072_v43, %v4106_v24 }
 0x7ce   :  { %v4293_v51 = vadd.f32 %v4292_v6, %v4149_v59  ;;  %v4109_v22 = vpack.c.b16 %v4107_v54, %v7853_v62  ;;  %v4319_v62 = vadd.f32 %v4941_v49, %v4318_v60 }
 0x7d0   :  { %v4303_v47 = vadd.f32 %v4302_v37, %v4293_v51  ;;  %4716 = vmatmul.msk.bf16.gmra.mxu1 %vm2194_vm8, %v4109_v22  ;;  %v7878_v31 = vsel %vm4320_vm15, %v4941_v49, %v4319_v62 }
 0x7d2   :  { %4307 = vadd.xlane.f32.xlu2 %v4303_v47  ;;  %v4326_v4 = vmul.f32 %v4303_v47, %v4303_v47 }
 0x7d4   :  { %4330 = vadd.xlane.f32.xlu0 %v4326_v4 }
 0x7d5   :  { %v4151_v15 = vpop.f32.mrf.mxu1 }
 0x7d6   :  { %v4295_v45 = vadd.f32 %v4294_v50, %v4151_v15 }
 0x7d8   :  { %v7875_v17 = vadd.f32 %v4302_v37, %v4295_v45 }
 0x7da   :  { %v4327_v39 = vmul.f32 %v7875_v17, %v7875_v17 }
 0x7dc   :  { %4309 = vadd.xlane.f32.xlu0 %v7875_v17 }
 0x845   :  { %v4308_v29 = vpop.xlane.xlu2 %4307 }
 0x846   :  { %v4322_v20 = vmul.f32 %v7878_v31, %v4308_v29 }
 0x847   :  { %v4331_v10 = vpop.xlane.xlu0 %4330 }
 0x848   :  { %v4342_v30 = vmul.f32 %v4322_v20, %v4322_v20  ;;  %v4338_v53 = vmul.f32 %v4331_v10, %v7878_v31  ;;  %v4354_v48 = vsub.f32 %v4303_v47, %v4322_v20 }
 0x84a   :  { %v4346_v11 = vsub.f32 %v4338_v53, %v4342_v30 }
 0x84c   :  { %v4350_v23 = vmax.f32 %v4346_v11, 0.0 }
 0x84d   :  { %v4154_v19 = vpop.f32.mrf.mxu1 }
 0x84e   :  { %v4358_v56 = vadd.f32 1e-05, %v4350_v23  ;;  %v4298_v38 = vadd.f32 %v4297_v63, %v4154_v19 }
 0x84f   :  { %v4310_v27 = vpop.xlane.xlu0 %4309 }
 0x850   :  { %4942 = vrsqrt.f32 %v4358_v56  ;;  %v7882_v33 = vadd.f32 %v4302_v37, %v4298_v38  ;;  %vm4368_vm2 = vweird.f32 %v4358_v56  ;;  %v4323_v57 = vmul.f32 %v7878_v31, %v4310_v27 }
 0x852   :  { %4311 = vadd.xlane.f32.xlu1 %v7882_v33  ;;  %v4328_v9 = vmul.f32 %v7882_v33, %v7882_v33  ;;  %v4343_v40 = vmul.f32 %v4323_v57, %v4323_v57  ;;  %v4355_v63 = vsub.f32 %v7875_v17, %v4323_v57 }
 0x855   :  { %v4156_v25 = vpop.f32.mrf.mxu1 }
 0x856   :  { %v4943_v14 = vpop.eup %4942  ;;  %v4300_v3 = vadd.f32 %v4299_v41, %v4156_v25 }
 0x857   :  { %v4363_v34 = vmul.f32 %v4943_v14, %v4358_v56  ;;  %vm4369_vm8 = vweird.f32 %v4943_v14 }
 0x858   :  { %v7885_v2 = vadd.f32 %v4302_v37, %v4300_v3  ;;  %vm4370_vm9 = vmor %vm4368_vm2, %vm4369_vm8 }
 0x859   :  { %v4364_v5 = vmul.f32 %v4943_v14, %v4363_v34 }
 0x85a   :  { %4332 = vadd.xlane.f32.xlu1 %v4327_v39  ;;  %4313 = vadd.xlane.f32.xlu2 %v7885_v2  ;;  %v4329_v55 = vmul.f32 %v7885_v2, %v7885_v2 }
 0x85b   :  { %v4365_v26 = vmul.f32 0.5, %v4364_v5 }
 0x85c   :  { %4336 = vadd.xlane.f32.xlu0 %v4329_v55 }
 0x85d   :  { %v4366_v46 = vsub.f32 1.5, %v4365_v26 }
 0x85f   :  { %v4367_v44 = vmul.f32 %v4943_v14, %v4366_v46 }
 0x861   :  { %v4371_v8 = vsel %vm4370_vm9, %v4943_v14, %v4367_v44 }
 0x862   :  { %v4402_v7 = vmul.f32 %v4371_v8, %v4354_v48  ;;  %4334 = vadd.xlane.f32.xlu2 %v4328_v9 }
 0x864   :  { %v4407_v0 = vmul.f32 %v7893_v1, %v4402_v7 }
 0x866   :  { %v4412_v28 = vadd.f32 %v7898_v58, %v4407_v0 }
 0x868   :  { %4416 = vst [vmem:[#allocation17] sm:$0xff] %v4412_v28 }
 0x8c5   :  { %v4312_v42 = vpop.xlane.xlu1 %4311 }
 0x8c6   :  { %v4324_v21 = vmul.f32 %v7878_v31, %v4312_v42 }
 0x8c8   :  { %v4344_v22 = vmul.f32 %v4324_v21, %v4324_v21  ;;  %v4356_v26 = vsub.f32 %v7882_v33, %v4324_v21 }
 0x8cd   :  { %v4333_v12 = vpop.xlane.xlu1 %4332  ;;  %v4314_v35 = vpop.xlane.xlu2 %4313 }
 0x8ce   :  { %v4339_v36 = vmul.f32 %v4333_v12, %v7878_v31  ;;  %v4325_v61 = vmul.f32 %v7878_v31, %v4314_v35 }
 0x8cf   :  { %v4337_v16 = vpop.xlane.xlu0 %4336 }
 0x8d0   :  { %v4347_v52 = vsub.f32 %v4339_v36, %v4343_v40  ;;  %v4345_v6 = vmul.f32 %v4325_v61, %v4325_v61  ;;  %v4341_v43 = vmul.f32 %v4337_v16, %v7878_v31  ;;  %v4357_v41 = vsub.f32 %v7885_v2, %v4325_v61 }
 0x8d2   :  { %v4351_v37 = vmax.f32 %v4347_v52, 0.0  ;;  %v4349_v24 = vsub.f32 %v4341_v43, %v4345_v6 }
 0x8d4   :  { %v4359_v59 = vadd.f32 1e-05, %v4351_v37  ;;  %v4353_v54 = vmax.f32 %v4349_v24, 0.0 }
 0x8d5   :  { %v4335_v51 = vpop.xlane.xlu2 %4334 }
 0x8d6   :  { %4944 = vrsqrt.f32 %v4359_v59  ;;  %v4361_v47 = vadd.f32 1e-05, %v4353_v54  ;;  %v4340_v4 = vmul.f32 %v4335_v51, %v7878_v31  ;;  %vm4378_vm3 = vweird.f32 %v4359_v59 }
 0x8d8   :  { %4946 = vrsqrt.f32 %v4361_v47  ;;  %v4348_v50 = vsub.f32 %v4340_v4, %v4344_v22  ;;  %vm4398_vm6 = vweird.f32 %v4361_v47 }
 0x8da   :  { %v4352_v15 = vmax.f32 %v4348_v50, 0.0 }
 0x8dc   :  { %v4945_v45 = vpop.eup %4944  ;;  %v4360_v18 = vadd.f32 1e-05, %v4352_v15 }
 0x8dd   :  { %v4373_v49 = vmul.f32 %v4945_v45, %v4359_v59  ;;  %vm4379_vm10 = vweird.f32 %v4945_v45 }
 0x8de   :  { %v4947_v13 = vpop.eup %4946  ;;  %4948 = vrsqrt.f32 %v4360_v18  ;;  %vm4380_vm13 = vmor %vm4378_vm3, %vm4379_vm10  ;;  %vm4388_vm12 = vweird.f32 %v4360_v18 }
 0x8df   :  { %v4374_v32 = vmul.f32 %v4945_v45, %v4373_v49  ;;  %v4393_v60 = vmul.f32 %v4947_v13, %v4361_v47  ;;  %vm4399_vm0 = vweird.f32 %v4947_v13 }
 0x8e0   :  { %vm4400_vm7 = vmor %vm4398_vm6, %vm4399_vm0 }
 0x8e1   :  { %v4375_v62 = vmul.f32 0.5, %v4374_v32  ;;  %v4394_v29 = vmul.f32 %v4947_v13, %v4393_v60 }
 0x8e3   :  { %v4376_v20 = vsub.f32 1.5, %v4375_v62  ;;  %v4395_v10 = vmul.f32 0.5, %v4394_v29 }
 0x8e4   :  { %v4949_v30 = vpop.eup %4948 }
 0x8e5   :  { %v4377_v53 = vmul.f32 %v4945_v45, %v4376_v20  ;;  %v4396_v11 = vsub.f32 1.5, %v4395_v10  ;;  %v4383_v31 = vmul.f32 %v4949_v30, %v4360_v18  ;;  %vm4389_vm11 = vweird.f32 %v4949_v30 }
 0x8e6   :  { %vm4390_vm14 = vmor %vm4388_vm12, %vm4389_vm11 }
 0x8e7   :  { %v4381_v23 = vsel %vm4380_vm13, %v4945_v45, %v4377_v53  ;;  %v4397_v19 = vmul.f32 %v4947_v13, %v4396_v11  ;;  %v4384_v56 = vmul.f32 %v4949_v30, %v4383_v31 }
 0x8e8   :  { %v4403_v38 = vmul.f32 %v4381_v23, %v4355_v63 }
 0x8e9   :  { %v4401_v25 = vsel %vm4400_vm7, %v4947_v13, %v4397_v19  ;;  %v4385_v14 = vmul.f32 0.5, %v4384_v56 }
 0x8ea   :  { %v4408_v3 = vmul.f32 %v7893_v1, %v4403_v38  ;;  %v4405_v34 = vmul.f32 %v4401_v25, %v4357_v41 }
 0x8eb   :  { %v4386_v39 = vsub.f32 1.5, %v4385_v14 }
 0x8ec   :  { %v4410_v5 = vmul.f32 %v7893_v1, %v4405_v34  ;;  %v4413_v17 = vadd.f32 %v7898_v58, %v4408_v3 }
 0x8ed   :  { %v4387_v55 = vmul.f32 %v4949_v30, %v4386_v39 }
 0x8ee   :  { %v4415_v46 = vadd.f32 %v7898_v58, %v4410_v5  ;;  %4417 = vst [vmem:[#allocation17 + $0x8] sm:$0xff] %v4413_v17 }
 0x8ef   :  { %v4391_v2 = vsel %vm4390_vm14, %v4949_v30, %v4387_v55 }
 0x8f0   :  { %v4404_v44 = vmul.f32 %v4391_v2, %v4356_v26  ;;  %4419 = vst [vmem:[#allocation17 + $0x18] sm:$0xff] %v4415_v46 }
 0x8f2   :  { %v4409_v48 = vmul.f32 %v7893_v1, %v4404_v44 }
 0x8f4   :  { %v4414_v9 = vadd.f32 %v7898_v58, %v4409_v48 }
 0x8f6   :  { %4418 = vst [vmem:[#allocation17 + $0x10] sm:$0xff] %v4414_v9 }
 0x8f7   :  { %4432 = dma.vmem_to_hbm [thread:$0]  %s4425_s16, 512, %s4427_s8, [#allocation4], %s5205_s18, %s5205_s18, %s5206_s19  }
 0x8f8   :  { %5202 = dma.done.wait [#allocation4], 512  }
 0x8f9   :  { %5203 = vsyncadd [#allocation4], 4294966784 }
 0x8fa   :  { %4437 = vsyncpa [#allocation3], 1 }
 0x8fb   :  { %4438 = vsyncpa [#allocation6], 1 }
 0x8fc   :  { %4439 = vsyncpa [#allocation9], 1 }
 0x8fd   :  { %4440 = vsyncpa [#allocation12], 1 }
 0x8fe   :  { %4441 = vsyncpa [#allocation15], 1 }
 0x8ff   :  { %4442 = vsyncpa [#allocation4], 1 }

</bundles_post_ra>
